<compile_context>
chip_gen: v7x
topology: tpu7x:2x2x1
jax: 0.10.0
libtpu: 0.0.40
codegen_flags: <defaults>
</compile_context>

<pallas_src>
import jax
import jax.numpy as jnp
from jax import lax
from jax.experimental import pallas as pl
from jax.experimental.pallas import tpu as pltpu


# ----------------------------- hardware queries -----------------------------

def _tpu_info_attr(names, default):
    try:
        get = getattr(pltpu, "get_tpu_info", None)
        if get is None:
            return default
        info = get()
        for n in names:
            v = getattr(info, n, None)
            if isinstance(v, int) and v > 0:
                return int(v)
    except Exception:
        pass
    return default


def _num_tensorcores():
    return _tpu_info_attr(
        ("num_cores", "core_count", "num_tensorcores", "tensorcores_per_chip"), 1)


def _vmem_budget_bytes():
    cap = _tpu_info_attr(("vmem_capacity_bytes", "vmem_bytes", "vmem_capacity"),
                         64 << 20)  # assume the smallest (v7x) physical VMEM
    # Leave headroom for Mosaic internal scratch / double-buffered outputs.
    return int(max(32 << 20, min(cap - (16 << 20), 96 << 20)))


def _compiler_params(dim_sem, block_bytes, budget):
    limit = int(min(max(4 * block_bytes + (4 << 20), 16 << 20), budget))
    return pltpu.CompilerParams(dimension_semantics=dim_sem,
                                vmem_limit_bytes=limit)


def _pick_batch_tile(B, per_item_bytes, n_cores, budget):
    """Images per grid step for the conv layers (leading block dim, no align req)."""
    cap = max(1, min(8, B, budget // max(1, 4 * per_item_bytes)))
    tb = 1
    for t in range(1, cap + 1):
        # keep at least 2*n_cores grid steps when possible (megacore only helps
        # when >1 TensorCore exists; on v5e/v6e this keeps tiles large).
        if B % t == 0 and (B // t) >= min(B, 2 * n_cores):
            tb = t
    return tb


def _pick_final_batch_tile(B):
    # out block is (tb, 1): tb must equal B or be a multiple of 8 (sublane rule).
    if B > 8 and B % 8 == 0:
        return 8
    return B


# ------------------------------ Pallas kernels ------------------------------

def conv_relu_kernel(x_ref, w_ref, b_ref, o_ref):
    # x: (tb, K, S) feature-major patches   w: (Cout, K) bf16   b: (Cout, 1) f32
    # o: (tb, Cout, S) bf16  -- last dim = spatial tile -> lane-dense stores.
    for i in range(x_ref.shape[0]):
        y = jnp.dot(w_ref[...], x_ref[i], preferred_element_type=jnp.float32)
        o_ref[i] = jnp.maximum(y + b_ref[...], 0.0).astype(o_ref.dtype)


def conv_relu_linear_kernel(x_ref, w_ref, b_ref, wl_ref, bl_ref, o_ref):
    # Last conv (Cout = 8*DIM) + ReLU + fused Linear(4*4*8*DIM -> 1).
    # x: (tb, K, 16)  w: (Cout, K)  b: (Cout, 1)  wl: (Cout, 16)  bl: (1, 1)
    # o: (tb, 1) f32
    rows = []
    for i in range(x_ref.shape[0]):
        y = jnp.dot(w_ref[...], x_ref[i], preferred_element_type=jnp.float32)
        y = jnp.maximum(y + b_ref[...], 0.0)                 # (Cout, 16) f32
        rows.append(jnp.sum(y * wl_ref[...]).reshape(1, 1))  # VPU mul + XLU reduce
    acc = rows[0] if len(rows) == 1 else jnp.concatenate(rows, axis=0)
    o_ref[...] = acc + bl_ref[...]


# --------------------------------- wrappers ---------------------------------

def _patches_km(x_nchw):
    """5x5 / stride-2 / pad-2 patches, feature-major: (B, 25*Cin, Ho*Wo).

    Single fused XLA op (identity depthwise conv); feature index = c*25 + ky*5 + kx,
    which matches the row-major flatten of the OIHW conv weights.
    """
    p = lax.conv_general_dilated_patches(
        x_nchw, filter_shape=(5, 5), window_strides=(2, 2),
        padding=((2, 2), (2, 2)))                      # (B, 25*Cin, Ho, Wo)
    B, K, Ho, Wo = p.shape
    return p.reshape(B, K, Ho * Wo), (Ho, Wo)


def conv5x5_s2_relu(x_nchw, w_oihw, b, *, n_cores, budget):
    """Conv2d(Cin, Cout, 5, stride=2, padding=2) + ReLU; NCHW in / NCHW out (bf16)."""
    Cout = w_oihw.shape[0]
    patches, (Ho, Wo) = _patches_km(x_nchw)
    B, K, S = patches.shape
    w_mat = w_oihw.reshape(Cout, K).astype(jnp.bfloat16)   # rows: c*25 + ky*5 + kx
    b_col = b.reshape(Cout, 1).astype(jnp.float32)

    per_item = 2 * (K * S + Cout * S)                      # bf16 in + out per image
    tb = _pick_batch_tile(B, per_item, n_cores, budget)
    block_bytes = tb * per_item + 2 * Cout * K + 4 * Cout

    out = pl.pallas_call(
        conv_relu_kernel,
        out_shape=jax.ShapeDtypeStruct((B, Cout, S), jnp.bfloat16),
        grid=(B // tb,),
        in_specs=[pl.BlockSpec((tb, K, S), lambda i: (i, 0, 0)),
                  pl.BlockSpec((Cout, K), lambda i: (0, 0)),
                  pl.BlockSpec((Cout, 1), lambda i: (0, 0))],
        out_specs=pl.BlockSpec((tb, Cout, S), lambda i: (i, 0, 0)),
        compiler_params=_compiler_params(("parallel",), block_bytes, budget),
    )(patches, w_mat, b_col)
    return out.reshape(B, Cout, Ho, Wo)


def conv5x5_s2_relu_plus_linear(x_nchw, w_oihw, b, w_lin, b_lin, *, n_cores, budget):
    """Last conv block + ReLU + Linear(4*4*8*DIM -> 1), fused, batch-tiled."""
    Cout = w_oihw.shape[0]
    patches, (Ho, Wo) = _patches_km(x_nchw)                # Ho = Wo = 4
    B, K, S = patches.shape                                # S = 16
    w_mat = w_oihw.reshape(Cout, K).astype(jnp.bfloat16)
    b_col = b.reshape(Cout, 1).astype(jnp.float32)
    # PyTorch flattens NCHW: linear feature index = c*(Ho*Wo) + h*Wo + w.
    wl = w_lin.reshape(Cout, S).astype(jnp.float32)
    bl = b_lin.reshape(1, 1).astype(jnp.float32)

    tb = _pick_final_batch_tile(B)
    block_bytes = tb * 2 * K * S + 2 * Cout * K + 4 * (Cout + Cout * S + tb)

    out = pl.pallas_call(
        conv_relu_linear_kernel,
        out_shape=jax.ShapeDtypeStruct((B, 1), jnp.float32),
        grid=(B // tb,),
        in_specs=[pl.BlockSpec((tb, K, S), lambda i: (i, 0, 0)),
                  pl.BlockSpec((Cout, K), lambda i: (0, 0)),
                  pl.BlockSpec((Cout, 1), lambda i: (0, 0)),
                  pl.BlockSpec((Cout, S), lambda i: (0, 0)),
                  pl.BlockSpec((1, 1), lambda i: (0, 0))],
        out_specs=pl.BlockSpec((tb, 1), lambda i: (i, 0)),
        compiler_params=_compiler_params(("parallel",), block_bytes, budget),
    )(patches, w_mat, b_col, wl, bl)
    return out.reshape(B)


# ------------------------------- Discriminator ------------------------------

def make_discriminator_params(key, DIM):
    ks = jax.random.split(key, 10)
    s = 0.05
    p = {}
    p["w1"] = jax.random.normal(ks[0], (DIM, 1, 5, 5), jnp.float32) * s
    p["b1"] = jax.random.normal(ks[1], (DIM,), jnp.float32) * s
    p["w2"] = jax.random.normal(ks[2], (2 * DIM, DIM, 5, 5), jnp.float32) * s
    p["b2"] = jax.random.normal(ks[3], (2 * DIM,), jnp.float32) * s
    p["w3"] = jax.random.normal(ks[4], (4 * DIM, 2 * DIM, 5, 5), jnp.float32) * s
    p["b3"] = jax.random.normal(ks[5], (4 * DIM,), jnp.float32) * s
    p["w4"] = jax.random.normal(ks[6], (8 * DIM, 4 * DIM, 5, 5), jnp.float32) * s
    p["b4"] = jax.random.normal(ks[7], (8 * DIM,), jnp.float32) * s
    p["w_lin"] = jax.random.normal(ks[8], (1, 4 * 4 * 8 * DIM), jnp.float32) * s
    p["b_lin"] = jax.random.normal(ks[9], (1,), jnp.float32) * s
    return p


def discriminator_forward(x_flat, p, DIM, sample_size):
    B = x_flat.shape[0]
    n_cores = _num_tensorcores()
    budget = _vmem_budget_bytes()
    # input.view(-1, 1, S, S); activations in bf16 (MXU-native, half the HBM traffic).
    h = x_flat.reshape(B, 1, sample_size, sample_size).astype(jnp.bfloat16)
    h = conv5x5_s2_relu(h, p["w1"], p["b1"], n_cores=n_cores, budget=budget)
    h = conv5x5_s2_relu(h, p["w2"], p["b2"], n_cores=n_cores, budget=budget)
    h = conv5x5_s2_relu(h, p["w3"], p["b3"], n_cores=n_cores, budget=budget)
    return conv5x5_s2_relu_plus_linear(
        h, p["w4"], p["b4"], p["w_lin"], p["b_lin"], n_cores=n_cores, budget=budget)


# ----------------------------- pure-JAX references --------------------------

def _conv_stack_reference(x_flat, p, DIM, sample_size, quantize):
    """quantize=True mirrors the kernel's bf16 casts (weights, inputs, inter-layer
    activations) with f32 accumulation; quantize=False is the exact f32 module."""
    B = x_flat.shape[0]
    cast = ((lambda a: a.astype(jnp.bfloat16).astype(jnp.float32))
            if quantize else (lambda a: a))
    h = cast(x_flat).reshape(B, 1, sample_size, sample_size)
    layers = (("w1", "b1"), ("w2", "b2"), ("w3", "b3"), ("w4", "b4"))
    for li, (wk, bk) in enumerate(layers):
        h = lax.conv_general_dilated(
            h, cast(p[wk]), window_strides=(2, 2), padding=((2, 2), (2, 2)),
            dimension_numbers=("NCHW", "OIHW", "NCHW"),
            precision=lax.Precision.HIGHEST)
        h = jnp.maximum(h + p[bk][None, :, None, None], 0.0)
        if quantize and li < 3:          # kernel keeps the layer-4 output in f32
            h = cast(h)
    flat = h.reshape(B, -1)
    out = jnp.dot(flat, p["w_lin"].T, precision=lax.Precision.HIGHEST)
    return out.reshape(-1) + p["b_lin"][0]


if __name__ == "__main__":
    DIM = 16            # config.model_dim (small)
    SAMPLE = 64         # config.sample_size (4 stride-2 convs -> 4x4 spatial)
    B = 2

    key = jax.random.PRNGKey(0)
    pkey, xkey = jax.random.split(key)
    params = make_discriminator_params(pkey, DIM)
    x = jax.random.normal(xkey, (B, SAMPLE * SAMPLE), jnp.float32)

    fwd = jax.jit(lambda xx: discriminator_forward(xx, params, DIM, SAMPLE))
    out = fwd(x)
    jax.block_until_ready(out)

    assert out.shape == (B,), out.shape
    assert out.dtype == jnp.float32
    assert bool(jnp.all(jnp.isfinite(out)))

    # Tight check vs a reference that quantizes at the same points as the kernels.
    ref_q = _conv_stack_reference(x, params, DIM, SAMPLE, quantize=True)
    err_q = float(jnp.max(jnp.abs(out - ref_q)))
    scale_q = max(1.0, float(jnp.max(jnp.abs(ref_q))))
    assert err_q <= 2e-2 * scale_q, (err_q, scale_q, out, ref_q)

    # Loose check vs the exact f32 PyTorch-semantics reference (bf16 inputs /
    # weights are an intentional precision trade in the kernels).
    ref_f = _conv_stack_reference(x, params, DIM, SAMPLE, quantize=False)
    err_f = float(jnp.max(jnp.abs(out - ref_f)))
    scale_f = max(1.0, float(jnp.max(jnp.abs(ref_f))))
    assert err_f <= 2e-1 * scale_f, (err_f, scale_f, out, ref_f)

    print("KERNEL_OK")
</pallas_src>

<mosaic_0001>
module attributes {stable_mosaic.version = 11 : i64} {
  func.func @conv_relu_kernel(%arg0: i32, %arg1: memref<1x25x1024xbf16, #tpu.memory_space<vmem>>, %arg2: memref<16x25xbf16, #tpu.memory_space<vmem>>, %arg3: memref<16x1xf32, #tpu.memory_space<vmem>>, %arg4: memref<1x16x1024xbf16, #tpu.memory_space<vmem>>) attributes {dimension_semantics = [#tpu.dimension_semantics<parallel>], iteration_bounds = array<i64: 2>, scalar_prefetch = 0 : i64, scratch_operands = 0 : i64, tpu.core_type = #tpu.core_type<tc>, window_params = [{transform_indices = @transform_0, window_bounds = array<i64: 1, 25, 1024>}, {pipeline_mode = #tpu.pipeline_mode<synchronous>, transform_indices = @transform_1, window_bounds = array<i64: 16, 25>}, {pipeline_mode = #tpu.pipeline_mode<synchronous>, transform_indices = @transform_2, window_bounds = array<i64: 16, 1>}, {transform_indices = @transform_3, window_bounds = array<i64: 1, 16, 1024>}]} {
    %c0 = arith.constant 0 : index
    %c0_0 = arith.constant 0 : index
    %0 = vector.load %arg2[%c0, %c0_0] : memref<16x25xbf16, #tpu.memory_space<vmem>>, vector<16x25xbf16>
    %c0_1 = arith.constant 0 : index
    %c0_2 = arith.constant 0 : index
    %c0_3 = arith.constant 0 : index
    %1 = vector.load %arg1[%c0_1, %c0_2, %c0_3] : memref<1x25x1024xbf16, #tpu.memory_space<vmem>>, vector<1x25x1024xbf16>
    %2 = vector.shape_cast %1 : vector<1x25x1024xbf16> to vector<25x1024xbf16>
    %cst = arith.constant dense<0.000000e+00> : vector<16x1024xf32>
    %3 = tpu.matmul %0, %2, %cst {dimension_numbers = #tpu.dot_dimension_numbers<[1], [0], [0], [1], [0, 0, 1, 1], [], []>} : vector<16x25xbf16>, vector<25x1024xbf16>, vector<16x1024xf32> -> vector<16x1024xf32>
    %c0_4 = arith.constant 0 : index
    %c0_5 = arith.constant 0 : index
    %4 = vector.load %arg3[%c0_4, %c0_5] : memref<16x1xf32, #tpu.memory_space<vmem>>, vector<16x1xf32>
    %5 = vector.broadcast %4 : vector<16x1xf32> to vector<16x1024xf32>
    %6 = arith.addf %3, %5 : vector<16x1024xf32>
    %cst_6 = arith.constant 0.000000e+00 : f32
    %7 = vector.broadcast %cst_6 : f32 to vector<16x1024xf32>
    %8 = arith.maximumf %6, %7 : vector<16x1024xf32>
    %9 = arith.truncf %8 : vector<16x1024xf32> to vector<16x1024xbf16>
    %c0_7 = arith.constant 0 : index
    %c0_8 = arith.constant 0 : index
    %c0_9 = arith.constant 0 : index
    %10 = vector.load %arg4[%c0_7, %c0_8, %c0_9] : memref<1x16x1024xbf16, #tpu.memory_space<vmem>>, vector<1x16x1024xbf16>
    %11 = vector.shape_cast %10 : vector<1x16x1024xbf16> to vector<16x1024xbf16>
    %12 = vector.shape_cast %9 : vector<16x1024xbf16> to vector<1x16x1024xbf16>
    tpu.vector_store %arg4[%c0_7, %c0_8, %c0_9], %12 {strides = array<i32>} : memref<1x16x1024xbf16, #tpu.memory_space<vmem>>, vector<1x16x1024xbf16>,
    return
  }
  func.func @transform_0(%arg0: i32) -> (i32, i32, i32) {
    %c0_i32 = arith.constant 0 : i32
    %c0_i32_0 = arith.constant 0 : i32
    %c0_i32_1 = arith.constant 0 : i32
    return %arg0, %c0_i32, %c0_i32_0 : i32, i32, i32
  }
  func.func @transform_1(%arg0: i32) -> (i32, i32) {
    %c0_i32 = arith.constant 0 : i32
    %c0_i32_0 = arith.constant 0 : i32
    %c0_i32_1 = arith.constant 0 : i32
    return %c0_i32, %c0_i32_0 : i32, i32
  }
  func.func @transform_2(%arg0: i32) -> (i32, i32) {
    %c0_i32 = arith.constant 0 : i32
    %c0_i32_0 = arith.constant 0 : i32
    %c0_i32_1 = arith.constant 0 : i32
    return %c0_i32, %c0_i32_0 : i32, i32
  }
  func.func @transform_3(%arg0: i32) -> (i32, i32, i32) {
    %c0_i32 = arith.constant 0 : i32
    %c0_i32_0 = arith.constant 0 : i32
    %c0_i32_1 = arith.constant 0 : i32
    return %arg0, %c0_i32, %c0_i32_0 : i32, i32, i32
  }
}

module attributes {stable_mosaic.version = 11 : i64} {
  func.func @conv_relu_kernel(%arg0: i32, %arg1: memref<1x400x256xbf16, #tpu.memory_space<vmem>>, %arg2: memref<32x400xbf16, #tpu.memory_space<vmem>>, %arg3: memref<32x1xf32, #tpu.memory_space<vmem>>, %arg4: memref<1x32x256xbf16, #tpu.memory_space<vmem>>) attributes {dimension_semantics = [#tpu.dimension_semantics<parallel>], iteration_bounds = array<i64: 2>, scalar_prefetch = 0 : i64, scratch_operands = 0 : i64, tpu.core_type = #tpu.core_type<tc>, window_params = [{transform_indices = @transform_0, window_bounds = array<i64: 1, 400, 256>}, {pipeline_mode = #tpu.pipeline_mode<synchronous>, transform_indices = @transform_1, window_bounds = array<i64: 32, 400>}, {pipeline_mode = #tpu.pipeline_mode<synchronous>, transform_indices = @transform_2, window_bounds = array<i64: 32, 1>}, {transform_indices = @transform_3, window_bounds = array<i64: 1, 32, 256>}]} {
    %c0 = arith.constant 0 : index
    %c0_0 = arith.constant 0 : index
    %0 = vector.load %arg2[%c0, %c0_0] : memref<32x400xbf16, #tpu.memory_space<vmem>>, vector<32x400xbf16>
    %c0_1 = arith.constant 0 : index
    %c0_2 = arith.constant 0 : index
    %c0_3 = arith.constant 0 : index
    %1 = vector.load %arg1[%c0_1, %c0_2, %c0_3] : memref<1x400x256xbf16, #tpu.memory_space<vmem>>, vector<1x400x256xbf16>
    %2 = vector.shape_cast %1 : vector<1x400x256xbf16> to vector<400x256xbf16>
    %cst = arith.constant dense<0.000000e+00> : vector<32x256xf32>
    %3 = tpu.matmul %0, %2, %cst {dimension_numbers = #tpu.dot_dimension_numbers<[1], [0], [0], [1], [0, 0, 1, 1], [], []>} : vector<32x400xbf16>, vector<400x256xbf16>, vector<32x256xf32> -> vector<32x256xf32>
    %c0_4 = arith.constant 0 : index
    %c0_5 = arith.constant 0 : index
    %4 = vector.load %arg3[%c0_4, %c0_5] : memref<32x1xf32, #tpu.memory_space<vmem>>, vector<32x1xf32>
    %5 = vector.broadcast %4 : vector<32x1xf32> to vector<32x256xf32>
    %6 = arith.addf %3, %5 : vector<32x256xf32>
    %cst_6 = arith.constant 0.000000e+00 : f32
    %7 = vector.broadcast %cst_6 : f32 to vector<32x256xf32>
    %8 = arith.maximumf %6, %7 : vector<32x256xf32>
    %9 = arith.truncf %8 : vector<32x256xf32> to vector<32x256xbf16>
    %c0_7 = arith.constant 0 : index
    %c0_8 = arith.constant 0 : index
    %c0_9 = arith.constant 0 : index
    %10 = vector.load %arg4[%c0_7, %c0_8, %c0_9] : memref<1x32x256xbf16, #tpu.memory_space<vmem>>, vector<1x32x256xbf16>
    %11 = vector.shape_cast %10 : vector<1x32x256xbf16> to vector<32x256xbf16>
    %12 = vector.shape_cast %9 : vector<32x256xbf16> to vector<1x32x256xbf16>
    tpu.vector_store %arg4[%c0_7, %c0_8, %c0_9], %12 {strides = array<i32>} : memref<1x32x256xbf16, #tpu.memory_space<vmem>>, vector<1x32x256xbf16>,
    return
  }
  func.func @transform_0(%arg0: i32) -> (i32, i32, i32) {
    %c0_i32 = arith.constant 0 : i32
    %c0_i32_0 = arith.constant 0 : i32
    %c0_i32_1 = arith.constant 0 : i32
    return %arg0, %c0_i32, %c0_i32_0 : i32, i32, i32
  }
  func.func @transform_1(%arg0: i32) -> (i32, i32) {
    %c0_i32 = arith.constant 0 : i32
    %c0_i32_0 = arith.constant 0 : i32
    %c0_i32_1 = arith.constant 0 : i32
    return %c0_i32, %c0_i32_0 : i32, i32
  }
  func.func @transform_2(%arg0: i32) -> (i32, i32) {
    %c0_i32 = arith.constant 0 : i32
    %c0_i32_0 = arith.constant 0 : i32
    %c0_i32_1 = arith.constant 0 : i32
    return %c0_i32, %c0_i32_0 : i32, i32
  }
  func.func @transform_3(%arg0: i32) -> (i32, i32, i32) {
    %c0_i32 = arith.constant 0 : i32
    %c0_i32_0 = arith.constant 0 : i32
    %c0_i32_1 = arith.constant 0 : i32
    return %arg0, %c0_i32, %c0_i32_0 : i32, i32, i32
  }
}

module attributes {stable_mosaic.version = 11 : i64} {
  func.func @conv_relu_kernel(%arg0: i32, %arg1: memref<1x800x64xbf16, #tpu.memory_space<vmem>>, %arg2: memref<64x800xbf16, #tpu.memory_space<vmem>>, %arg3: memref<64x1xf32, #tpu.memory_space<vmem>>, %arg4: memref<1x64x64xbf16, #tpu.memory_space<vmem>>) attributes {dimension_semantics = [#tpu.dimension_semantics<parallel>], iteration_bounds = array<i64: 2>, scalar_prefetch = 0 : i64, scratch_operands = 0 : i64, tpu.core_type = #tpu.core_type<tc>, window_params = [{transform_indices = @transform_0, window_bounds = array<i64: 1, 800, 64>}, {pipeline_mode = #tpu.pipeline_mode<synchronous>, transform_indices = @transform_1, window_bounds = array<i64: 64, 800>}, {pipeline_mode = #tpu.pipeline_mode<synchronous>, transform_indices = @transform_2, window_bounds = array<i64: 64, 1>}, {transform_indices = @transform_3, window_bounds = array<i64: 1, 64, 64>}]} {
    %c0 = arith.constant 0 : index
    %c0_0 = arith.constant 0 : index
    %0 = vector.load %arg2[%c0, %c0_0] : memref<64x800xbf16, #tpu.memory_space<vmem>>, vector<64x800xbf16>
    %c0_1 = arith.constant 0 : index
    %c0_2 = arith.constant 0 : index
    %c0_3 = arith.constant 0 : index
    %1 = vector.load %arg1[%c0_1, %c0_2, %c0_3] : memref<1x800x64xbf16, #tpu.memory_space<vmem>>, vector<1x800x64xbf16>
    %2 = vector.shape_cast %1 : vector<1x800x64xbf16> to vector<800x64xbf16>
    %cst = arith.constant dense<0.000000e+00> : vector<64x64xf32>
    %3 = tpu.matmul %0, %2, %cst {dimension_numbers = #tpu.dot_dimension_numbers<[1], [0], [0], [1], [0, 0, 1, 1], [], []>} : vector<64x800xbf16>, vector<800x64xbf16>, vector<64x64xf32> -> vector<64x64xf32>
    %c0_4 = arith.constant 0 : index
    %c0_5 = arith.constant 0 : index
    %4 = vector.load %arg3[%c0_4, %c0_5] : memref<64x1xf32, #tpu.memory_space<vmem>>, vector<64x1xf32>
    %5 = vector.broadcast %4 : vector<64x1xf32> to vector<64x64xf32>
    %6 = arith.addf %3, %5 : vector<64x64xf32>
    %cst_6 = arith.constant 0.000000e+00 : f32
    %7 = vector.broadcast %cst_6 : f32 to vector<64x64xf32>
    %8 = arith.maximumf %6, %7 : vector<64x64xf32>
    %9 = arith.truncf %8 : vector<64x64xf32> to vector<64x64xbf16>
    %c0_7 = arith.constant 0 : index
    %c0_8 = arith.constant 0 : index
    %c0_9 = arith.constant 0 : index
    %10 = vector.load %arg4[%c0_7, %c0_8, %c0_9] : memref<1x64x64xbf16, #tpu.memory_space<vmem>>, vector<1x64x64xbf16>
    %11 = vector.shape_cast %10 : vector<1x64x64xbf16> to vector<64x64xbf16>
    %12 = vector.shape_cast %9 : vector<64x64xbf16> to vector<1x64x64xbf16>
    tpu.vector_store %arg4[%c0_7, %c0_8, %c0_9], %12 {strides = array<i32>} : memref<1x64x64xbf16, #tpu.memory_space<vmem>>, vector<1x64x64xbf16>,
    return
  }
  func.func @transform_0(%arg0: i32) -> (i32, i32, i32) {
    %c0_i32 = arith.constant 0 : i32
    %c0_i32_0 = arith.constant 0 : i32
    %c0_i32_1 = arith.constant 0 : i32
    return %arg0, %c0_i32, %c0_i32_0 : i32, i32, i32
  }
  func.func @transform_1(%arg0: i32) -> (i32, i32) {
    %c0_i32 = arith.constant 0 : i32
    %c0_i32_0 = arith.constant 0 : i32
    %c0_i32_1 = arith.constant 0 : i32
    return %c0_i32, %c0_i32_0 : i32, i32
  }
  func.func @transform_2(%arg0: i32) -> (i32, i32) {
    %c0_i32 = arith.constant 0 : i32
    %c0_i32_0 = arith.constant 0 : i32
    %c0_i32_1 = arith.constant 0 : i32
    return %c0_i32, %c0_i32_0 : i32, i32
  }
  func.func @transform_3(%arg0: i32) -> (i32, i32, i32) {
    %c0_i32 = arith.constant 0 : i32
    %c0_i32_0 = arith.constant 0 : i32
    %c0_i32_1 = arith.constant 0 : i32
    return %arg0, %c0_i32, %c0_i32_0 : i32, i32, i32
  }
}

module attributes {stable_mosaic.version = 11 : i64} {
  func.func @conv_relu_linear_kernel(%arg0: i32, %arg1: memref<2x1600x16xbf16, #tpu.memory_space<vmem>>, %arg2: memref<128x1600xbf16, #tpu.memory_space<vmem>>, %arg3: memref<128x1xf32, #tpu.memory_space<vmem>>, %arg4: memref<128x16xf32, #tpu.memory_space<vmem>>, %arg5: memref<1x1xf32, #tpu.memory_space<vmem>>, %arg6: memref<2x1xf32, #tpu.memory_space<vmem>>) attributes {dimension_semantics = [#tpu.dimension_semantics<parallel>], iteration_bounds = array<i64: 1>, scalar_prefetch = 0 : i64, scratch_operands = 0 : i64, tpu.core_type = #tpu.core_type<tc>, window_params = [{transform_indices = @transform_0, window_bounds = array<i64: 2, 1600, 16>}, {pipeline_mode = #tpu.pipeline_mode<synchronous>, transform_indices = @transform_1, window_bounds = array<i64: 128, 1600>}, {pipeline_mode = #tpu.pipeline_mode<synchronous>, transform_indices = @transform_2, window_bounds = array<i64: 128, 1>}, {pipeline_mode = #tpu.pipeline_mode<synchronous>, transform_indices = @transform_3, window_bounds = array<i64: 128, 16>}, {pipeline_mode = #tpu.pipeline_mode<synchronous>, transform_indices = @transform_4, window_bounds = array<i64: 1, 1>}, {transform_indices = @transform_5, window_bounds = array<i64: 2, 1>}]} {
    %c0 = arith.constant 0 : index
    %c0_0 = arith.constant 0 : index
    %0 = vector.load %arg2[%c0, %c0_0] : memref<128x1600xbf16, #tpu.memory_space<vmem>>, vector<128x1600xbf16>
    %c0_1 = arith.constant 0 : index
    %c0_2 = arith.constant 0 : index
    %c0_3 = arith.constant 0 : index
    %1 = vector.load %arg1[%c0_1, %c0_2, %c0_3] : memref<2x1600x16xbf16, #tpu.memory_space<vmem>>, vector<1x1600x16xbf16>
    %2 = vector.shape_cast %1 : vector<1x1600x16xbf16> to vector<1600x16xbf16>
    %cst = arith.constant dense<0.000000e+00> : vector<128x16xf32>
    %3 = tpu.matmul %0, %2, %cst {dimension_numbers = #tpu.dot_dimension_numbers<[1], [0], [0], [1], [0, 0, 1, 1], [], []>} : vector<128x1600xbf16>, vector<1600x16xbf16>, vector<128x16xf32> -> vector<128x16xf32>
    %c0_4 = arith.constant 0 : index
    %c0_5 = arith.constant 0 : index
    %4 = vector.load %arg3[%c0_4, %c0_5] : memref<128x1xf32, #tpu.memory_space<vmem>>, vector<128x1xf32>
    %5 = vector.broadcast %4 : vector<128x1xf32> to vector<128x16xf32>
    %6 = arith.addf %3, %5 : vector<128x16xf32>
    %cst_6 = arith.constant 0.000000e+00 : f32
    %7 = vector.broadcast %cst_6 : f32 to vector<128x16xf32>
    %8 = arith.maximumf %6, %7 : vector<128x16xf32>
    %c0_7 = arith.constant 0 : index
    %c0_8 = arith.constant 0 : index
    %9 = vector.load %arg4[%c0_7, %c0_8] : memref<128x16xf32, #tpu.memory_space<vmem>>, vector<128x16xf32>
    %10 = arith.mulf %8, %9 : vector<128x16xf32>
    %11 = vector.shape_cast %10 : vector<128x16xf32> to vector<1x128x16xf32>
    %cst_9 = arith.constant dense<0.000000e+00> : vector<1xf32>
    %12 = vector.multi_reduction <add>, %11, %cst_9 [1, 2] : vector<1x128x16xf32> to vector<1xf32>
    %13 = vector.shape_cast %12 : vector<1xf32> to vector<1x1x1xf32>
    %14 = vector.extract %13[0, 0, 0] : f32 from vector<1x1x1xf32>
    %15 = vector.broadcast %14 : f32 to vector<1x1xf32>
    %c0_10 = arith.constant 0 : index
    %c0_11 = arith.constant 0 : index
    %16 = vector.load %arg2[%c0_10, %c0_11] : memref<128x1600xbf16, #tpu.memory_space<vmem>>, vector<128x1600xbf16>
    %c1 = arith.constant 1 : index
    %c0_12 = arith.constant 0 : index
    %c0_13 = arith.constant 0 : index
    %17 = vector.load %arg1[%c1, %c0_12, %c0_13] : memref<2x1600x16xbf16, #tpu.memory_space<vmem>>, vector<1x1600x16xbf16>
    %18 = vector.shape_cast %17 : vector<1x1600x16xbf16> to vector<1600x16xbf16>
    %cst_14 = arith.constant dense<0.000000e+00> : vector<128x16xf32>
    %19 = tpu.matmul %16, %18, %cst_14 {dimension_numbers = #tpu.dot_dimension_numbers<[1], [0], [0], [1], [0, 0, 1, 1], [], []>} : vector<128x1600xbf16>, vector<1600x16xbf16>, vector<128x16xf32> -> vector<128x16xf32>
    %c0_15 = arith.constant 0 : index
    %c0_16 = arith.constant 0 : index
    %20 = vector.load %arg3[%c0_15, %c0_16] : memref<128x1xf32, #tpu.memory_space<vmem>>, vector<128x1xf32>
    %21 = vector.broadcast %20 : vector<128x1xf32> to vector<128x16xf32>
    %22 = arith.addf %19, %21 : vector<128x16xf32>
    %cst_17 = arith.constant 0.000000e+00 : f32
    %23 = vector.broadcast %cst_17 : f32 to vector<128x16xf32>
    %24 = arith.maximumf %22, %23 : vector<128x16xf32>
    %c0_18 = arith.constant 0 : index
    %c0_19 = arith.constant 0 : index
    %25 = vector.load %arg4[%c0_18, %c0_19] : memref<128x16xf32, #tpu.memory_space<vmem>>, vector<128x16xf32>
    %26 = arith.mulf %24, %25 : vector<128x16xf32>
    %27 = vector.shape_cast %26 : vector<128x16xf32> to vector<1x128x16xf32>
    %cst_20 = arith.constant dense<0.000000e+00> : vector<1xf32>
    %28 = vector.multi_reduction <add>, %27, %cst_20 [1, 2] : vector<1x128x16xf32> to vector<1xf32>
    %29 = vector.shape_cast %28 : vector<1xf32> to vector<1x1x1xf32>
    %30 = vector.extract %29[0, 0, 0] : f32 from vector<1x1x1xf32>
    %31 = vector.broadcast %30 : f32 to vector<1x1xf32>
    %32 = tpu.concatenate %15, %31 in 0 : vector<1x1xf32>, vector<1x1xf32> -> vector<2x1xf32>
    %c0_21 = arith.constant 0 : index
    %c0_22 = arith.constant 0 : index
    %33 = vector.load %arg5[%c0_21, %c0_22] : memref<1x1xf32, #tpu.memory_space<vmem>>, vector<1x1xf32>
    %34 = vector.broadcast %33 : vector<1x1xf32> to vector<2x1xf32>
    %35 = arith.addf %32, %34 : vector<2x1xf32>
    %c0_23 = arith.constant 0 : index
    %c0_24 = arith.constant 0 : index
    %36 = vector.load %arg6[%c0_23, %c0_24] : memref<2x1xf32, #tpu.memory_space<vmem>>, vector<2x1xf32>
    tpu.vector_store %arg6[%c0_23, %c0_24], %35 {strides = array<i32>} : memref<2x1xf32, #tpu.memory_space<vmem>>, vector<2x1xf32>,
    return
  }
  func.func @transform_0(%arg0: i32) -> (i32, i32, i32) {
    %c0_i32 = arith.constant 0 : i32
    %c0_i32_0 = arith.constant 0 : i32
    %c0_i32_1 = arith.constant 0 : i32
    return %arg0, %c0_i32, %c0_i32_0 : i32, i32, i32
  }
  func.func @transform_1(%arg0: i32) -> (i32, i32) {
    %c0_i32 = arith.constant 0 : i32
    %c0_i32_0 = arith.constant 0 : i32
    %c0_i32_1 = arith.constant 0 : i32
    return %c0_i32, %c0_i32_0 : i32, i32
  }
  func.func @transform_2(%arg0: i32) -> (i32, i32) {
    %c0_i32 = arith.constant 0 : i32
    %c0_i32_0 = arith.constant 0 : i32
    %c0_i32_1 = arith.constant 0 : i32
    return %c0_i32, %c0_i32_0 : i32, i32
  }
  func.func @transform_3(%arg0: i32) -> (i32, i32) {
    %c0_i32 = arith.constant 0 : i32
    %c0_i32_0 = arith.constant 0 : i32
    %c0_i32_1 = arith.constant 0 : i32
    return %c0_i32, %c0_i32_0 : i32, i32
  }
  func.func @transform_4(%arg0: i32) -> (i32, i32) {
    %c0_i32 = arith.constant 0 : i32
    %c0_i32_0 = arith.constant 0 : i32
    %c0_i32_1 = arith.constant 0 : i32
    return %c0_i32, %c0_i32_0 : i32, i32
  }
  func.func @transform_5(%arg0: i32) -> (i32, i32) {
    %c0_i32 = arith.constant 0 : i32
    %c0_i32_0 = arith.constant 0 : i32
    return %arg0, %c0_i32 : i32, i32
  }
}

</mosaic_0001>

<bundles_post_ra>
// kernel: _lambda_.4
= control target key start
LH: loop header
LB: loop body
LE: loop exit
PB: predicated region body
PF: predicated region fallthrough
CT: control target
= control target key end

     0   :  { %s702_s12 = smov 0   ;;  %s769_s0 = inlined_call_operand.vmem [shape: bf16[2,25,1024], index: 0, kind: input, shape index: {}]   ;;  %s770_s1 = inlined_call_operand.vmem [shape: bf16[16,25], index: 1, kind: input, shape index: {}]   ;;  %s771_s2 = inlined_call_operand.vmem [shape: f32[16,1], index: 2, kind: input, shape index: {}]   ;;  %s772_s3 = inlined_call_operand.vmem [shape: bf16[2,16,1024], index: 3, kind: output, shape index: {}]  }
   0x1 LB: > { %s610_s13 = sadd.s32 4294967295, %s678_s12   ;;  %p614_p0 = scmp.ge.s32.totalorder %s678_s12, 1  ;;  %s678_s12 = sphi %s702_s12, %s13_s12  }
   0x2   : > { %p137_p1 = scmp.lt.s32.totalorder %s678_s12, 3 }
   0x4   : > { %p138_p2 = pnand %p614_p0, %p137_p1 }
   0x5   : > { %p161_p3 = scmp.lt.s32.totalorder (!%p138_p2), %s610_s13, 1  ;;  %vm283_vm0 = vcmask (!%p138_p2), 1043456   ;;  %v680_v0 = vmov (!%p138_p2), 0   ;;  %v190_v1 = vld [vmem:[%s771_s2] sm:$0xff] (!%p138_p2)  ;;  %vm284_vm1 = vcmask (!%p138_p2), 1044480   ;;  %v681_v2 = vmov (!%p138_p2), 65535  }
   0x6   : > { %141 = sbr.rel (%p138_p2) target bundleno = 259 (0x103), region = 32  ;;  %343 = vmatprep.mubr.bf16.mxu0 (!%p138_p2), %v680_v0  ;;  %386 = vmatprep.mubr.bf16.mxu1 (!%p138_p2), %v680_v0  ;;  %v285_v3 = vsel (!%p138_p2), %vm283_vm0, 4294967295, %v681_v2  ;;  %v191_v4 = vld [vmem:[%s771_s2 + $0x8] sm:$0xff] (!%p138_p2)  ;;  %v671_v37 = vld [vmem:[%s770_s1] sm:$0xff] (!%p138_p2)   ;;  %vm279_vm2 = vcmask (!%p138_p2), 203776  }
   0x7   : > { %670 = vset.pattern.permute.xlu0 (!%p138_p2), %v680_v0  ;;  %v286_v13 = vsel (!%p138_p2), %vm284_vm1, %v285_v3, 0 }
   0x8   : > { %194 = vperm.xlu0 (!%p138_p2), %670, %v190_v1  }
   0xc   : > { %199 = vperm.xlu0 (!%p138_p2), %670, %v191_v4  }
   0xd   : > { %s774_s13 = smov (!%p161_p3, %s610_s13), 1 }
   0xe   : > { %s650_s16 = sshll.u32 %s774_s13, 7  ;;  %s651_s24 = sshll.u32 %s774_s13, 6 }
   0xf   : > { %s725_s21 = scalar_lea.vmem %s769_s0, %s650_s16  ;;  %s756_s27 = scalar_lea.vmem %s772_s3, %s651_s24 }
  0x10   : > { %v174_v5 = vld [vmem:[%s725_s21] sm:$0xff]  ;;  %v175_v7 = vld [vmem:[%s725_s21 + $0x8] sm:$0xff]  ;;  %v176_v20 = vld [vmem:[%s725_s21 + $0x10] sm:$0xff] }
  0x11   : > { %v178_v6 = vld [vmem:[%s725_s21 + $0x20] sm:$0xff]  ;;  %v179_v9 = vld [vmem:[%s725_s21 + $0x28] sm:$0xff]  ;;  %v180_v23 = vld [vmem:[%s725_s21 + $0x30] sm:$0xff] }
  0x12   : > { %v621_v8 = vcombine.high %v174_v5, %v178_v6  ;;  %v620_v10 = vcombine.low %v174_v5, %v178_v6  ;;  %v182_v11 = vld [vmem:[%s725_s21 + $0x40] sm:$0xff]  ;;  %v623_v14 = vcombine.high %v175_v7, %v179_v9  ;;  %v622_v15 = vcombine.low %v175_v7, %v179_v9  ;;  %v183_v17 = vld [vmem:[%s725_s21 + $0x48] sm:$0xff]  ;;  %v177_v24 = vld [vmem:[%s725_s21 + $0x18] sm:$0xff] }
  0x13   : > { %v186_v12 = vld [vmem:[%s725_s21 + $0x60] sm:$0x11]  ;;  %v187_v18 = vld [vmem:[%s725_s21 + $0x68] sm:$0x11]  ;;  %v181_v25 = vld [vmem:[%s725_s21 + $0x38] sm:$0xff]  ;;  %v625_v33 = vcombine.high %v176_v20, %v180_v23  ;;  %v624_v39 = vcombine.low %v176_v20, %v180_v23 }
  0x14   : > { %v629_v16 = vcombine.high %v182_v11, %v186_v12  ;;  %v628_v19 = vcombine.low %v182_v11, %v186_v12  ;;  %311 = vmatprep.subr.bf16.mxu0 %v621_v8  ;;  %v631_v21 = vcombine.high %v183_v17, %v187_v18  ;;  %v630_v22 = vcombine.low %v183_v17, %v187_v18  ;;  %v184_v28 = vld [vmem:[%s725_s21 + $0x50] sm:$0xff]  ;;  %v185_v30 = vld [vmem:[%s725_s21 + $0x58] sm:$0xff] }
  0x15   : > { %354 = vmatprep.subr.bf16.mxu1 %v623_v14  ;;  %312 = vmatpush1.bf16.msra.mxu0 %v620_v10  ;;  %v188_v29 = vld [vmem:[%s725_s21 + $0x70] sm:$0x11]  ;;  %v189_v34 = vld [vmem:[%s725_s21 + $0x78] sm:$0x11]  ;;  %v627_v35 = vcombine.high %v177_v24, %v181_v25  ;;  %v626_v41 = vcombine.low %v177_v24, %v181_v25 }
  0x16   : > { %v291_v26 = vand.u32 %v629_v16, %v286_v13  ;;  %v288_v27 = vand.u32 %v628_v19, %v286_v13  ;;  %355 = vmatpush1.bf16.msra.mxu1 %v622_v15  ;;  %v297_v31 = vand.u32 %v631_v21, %v286_v13  ;;  %v294_v32 = vand.u32 %v630_v22, %v286_v13 }
  0x17   : > { %v633_v36 = vcombine.high %v184_v28, %v188_v29  ;;  %v635_v38 = vcombine.high %v185_v30, %v189_v34  ;;  %v632_v40 = vcombine.low %v184_v28, %v188_v29  ;;  %v634_v43 = vcombine.low %v185_v30, %v189_v34 }
  0x18   : > { %313 = vmatprep.subr.bf16.mxu0 %v291_v26  ;;  %356 = vmatprep.subr.bf16.mxu1 %v297_v31 }
  0x19   : > { %314 = vmatpush1.bf16.msra.mxu0 %v288_v27  ;;  %v303_v42 = vand.u32 %v633_v36, %v286_v13  ;;  %v309_v44 = vand.u32 %v635_v38, %v286_v13  ;;  %v300_v45 = vand.u32 %v632_v40, %v286_v13  ;;  %v306_v46 = vand.u32 %v634_v43, %v286_v13 }
  0x1a   : > { %357 = vmatpush1.bf16.msra.mxu1 %v294_v32  ;;  %397 = vmatprep.subr.bf16.mxu0 %v625_v33 }
  0x1b   : > { %440 = vmatprep.subr.bf16.mxu1 %v627_v35 }
  0x1c   : > { %636 = vmatmul.mubr.msk.bf16.vlgmr.msra.gmra.mrb[0].mxu0 %vm279_vm2, %v671_v37 }
  0x1d   : > { %637 = vmatmul.mubr.msk.bf16.vlgmr.msra.gmra.mrb[0].mxu1 %vm279_vm2, %v671_v37  ;;  %398 = vmatpush1.bf16.msra.mxu0 %v624_v39 }
  0x1e   : > { %441 = vmatpush1.bf16.msra.mxu1 %v626_v41  ;;  %399 = vmatprep.subr.bf16.mxu0 %v303_v42 }
  0x1f   : > { %442 = vmatprep.subr.bf16.mxu1 %v309_v44  ;;  %429 = vmatprep.mubr.bf16.mxu0 %v680_v0 }
  0x20   : > { %472 = vmatprep.mubr.bf16.mxu1 %v680_v0 }
  0x21   : > { %400 = vmatpush1.bf16.msra.mxu0 %v300_v45 }
  0x22   : > { %443 = vmatpush1.bf16.msra.mxu1 %v306_v46 }
  0x24   : > { %638 = vmatmul.mubr.msk.bf16.vlgmr.msra.gmra.mrb[4].mxu0 %vm279_vm2, %v671_v37 }
  0x25   : > { %639 = vmatmul.mubr.msk.bf16.vlgmr.msra.gmra.mrb[4].mxu1 %vm279_vm2, %v671_v37 }
  0x87   : > { %v195_v47 = vpop.permute.xlu0 %194 }
  0x8b   : > { %v200_v49 = vpop.permute.xlu0 %199 }
  0xef   : > { %v345_v48 = vpop.f32.mrb[0].mxu0 }
  0xf0   : > { %v346_v50 = vadd.f32 %v345_v48, %v195_v47  ;;  %v388_v51 = vpop.f32.mrb[0].mxu1  ;;  %v347_v52 = vpop.f32.mrb[1].mxu0 }
  0xf1   : > { %v389_v53 = vadd.f32 %v388_v51, %v195_v47  ;;  %v348_v54 = vadd.f32 %v347_v52, %v195_v47  ;;  %v390_v55 = vpop.f32.mrb[1].mxu1  ;;  %v349_v56 = vpop.f32.mrb[2].mxu0 }
  0xf2   : > { %v483_v57 = vmax.f32 %v346_v50, 0.0  ;;  %v391_v58 = vadd.f32 %v390_v55, %v195_v47  ;;  %v350_v59 = vadd.f32 %v349_v56, %v200_v49  ;;  %v392_v60 = vpop.f32.mrb[2].mxu1  ;;  %v351_v61 = vpop.f32.mrb[3].mxu0 }
  0xf3   : > { %v485_v62 = vmax.f32 %v389_v53, 0.0  ;;  %v484_v63 = vmax.f32 %v348_v54, 0.0  ;;  %v393_v0 = vadd.f32 %v392_v60, %v200_v49  ;;  %v352_v1 = vadd.f32 %v351_v61, %v200_v49  ;;  %v394_v2 = vpop.f32.mrb[3].mxu1 }
  0xf4   : > { %v486_v3 = vmax.f32 %v391_v58, 0.0  ;;  %v491_v4 = vmax.f32 %v350_v59, 0.0  ;;  %v395_v5 = vadd.f32 %v394_v2, %v200_v49 }
  0xf5   : > { %v652_v6 = vpack.c.bf16 %v484_v63, %v483_v57  ;;  %v493_v7 = vmax.f32 %v393_v0, 0.0  ;;  %v492_v8 = vmax.f32 %v352_v1, 0.0 }
  0xf6   : > { %v653_v9 = vpack.c.bf16 %v486_v3, %v485_v62  ;;  %v494_v10 = vmax.f32 %v395_v5, 0.0 }
  0xf7   : > { %547 = vst [vmem:[%s756_s27] sm:$0xff] %v652_v6  ;;  %v656_v11 = vpack.c.bf16 %v492_v8, %v491_v4  ;;  %v431_v12 = vpop.f32.mrb[4].mxu0 }
  0xf8   : > { %548 = vst [vmem:[%s756_s27 + $0x8] sm:$0xff] %v653_v9  ;;  %v657_v13 = vpack.c.bf16 %v494_v10, %v493_v7  ;;  %v432_v14 = vadd.f32 %v431_v12, %v195_v47  ;;  %v474_v15 = vpop.f32.mrb[4].mxu1  ;;  %v433_v16 = vpop.f32.mrb[5].mxu0 }
  0xf9   : > { %551 = vst [vmem:[%s756_s27 + $0x20] sm:$0xff] %v656_v11  ;;  %v475_v17 = vadd.f32 %v474_v15, %v195_v47  ;;  %v434_v18 = vadd.f32 %v433_v16, %v195_v47  ;;  %v476_v19 = vpop.f32.mrb[5].mxu1  ;;  %v435_v20 = vpop.f32.mrb[6].mxu0 }
  0xfa   : > { %552 = vst [vmem:[%s756_s27 + $0x28] sm:$0xff] %v657_v13  ;;  %v487_v21 = vmax.f32 %v432_v14, 0.0  ;;  %v477_v22 = vadd.f32 %v476_v19, %v195_v47  ;;  %v436_v23 = vadd.f32 %v435_v20, %v200_v49  ;;  %v478_v24 = vpop.f32.mrb[6].mxu1  ;;  %v437_v25 = vpop.f32.mrb[7].mxu0 }
  0xfb   : > { %v489_v26 = vmax.f32 %v475_v17, 0.0  ;;  %v488_v27 = vmax.f32 %v434_v18, 0.0  ;;  %v479_v28 = vadd.f32 %v478_v24, %v200_v49  ;;  %v438_v29 = vadd.f32 %v437_v25, %v200_v49  ;;  %v480_v30 = vpop.f32.mrb[7].mxu1 }
  0xfc   : > { %v490_v31 = vmax.f32 %v477_v22, 0.0  ;;  %v495_v32 = vmax.f32 %v436_v23, 0.0  ;;  %v481_v33 = vadd.f32 %v480_v30, %v200_v49 }
  0xfd   : > { %v654_v34 = vpack.c.bf16 %v488_v27, %v487_v21  ;;  %v497_v35 = vmax.f32 %v479_v28, 0.0  ;;  %v496_v36 = vmax.f32 %v438_v29, 0.0 }
  0xfe   : > { %v655_v37 = vpack.c.bf16 %v490_v31, %v489_v26  ;;  %v498_v38 = vmax.f32 %v481_v33, 0.0 }
  0xff   : > { %549 = vst [vmem:[%s756_s27 + $0x10] sm:$0xff] %v654_v34  ;;  %v658_v39 = vpack.c.bf16 %v496_v36, %v495_v32 }
 0x100   : > { %550 = vst [vmem:[%s756_s27 + $0x18] sm:$0xff] %v655_v37  ;;  %v659_v40 = vpack.c.bf16 %v498_v38, %v497_v35 }
 0x101   : > { %553 = vst [vmem:[%s756_s27 + $0x30] sm:$0xff] %v658_v39 }
 0x102   : > { %554 = vst [vmem:[%s756_s27 + $0x38] sm:$0xff] %v659_v40 }
 0x103 PF: > { %s13_s12 = sadd.s32 1, %s678_s12  }
 0x104   : > { %p10_p4 = scmp.ge.s32.totalorder %s13_s12, 4  }
 0x106   :  { %12 = sbr.rel (!%p10_p4) target bundleno = 1 (0x1), region = 62 }

// kernel: _lambda_.5
= control target key start
LH: loop header
LB: loop body
LE: loop exit
PB: predicated region body
PF: predicated region fallthrough
CT: control target
= control target key end

     0   :  { %s969_s12 = smov 0   ;;  %s1080_s0 = inlined_call_operand.vmem [shape: bf16[2,400,256], index: 0, kind: input, shape index: {}]   ;;  %s1081_s1 = inlined_call_operand.vmem [shape: bf16[32,400], index: 1, kind: input, shape index: {}]   ;;  %s1082_s2 = inlined_call_operand.vmem [shape: f32[32,1], index: 2, kind: input, shape index: {}]   ;;  %s1083_s3 = inlined_call_operand.vmem [shape: bf16[2,32,256], index: 3, kind: output, shape index: {}]  }
   0x1 LB: > { %s746_s13 = sadd.s32 4294967295, %s946_s12   ;;  %p750_p0 = scmp.ge.s32.totalorder %s946_s12, 1  ;;  %s946_s12 = sphi %s969_s12, %s13_s12  }
   0x2   : > { %p137_p1 = scmp.lt.s32.totalorder %s946_s12, 3 }
   0x4   : > { %p138_p2 = pnand %p750_p0, %p137_p1 }
   0x5   : > { %p161_p3 = scmp.lt.s32.totalorder (!%p138_p2), %s746_s13, 1  ;;  %vm542_vm0 = vcmask (!%p138_p2), 130048   ;;  %v930_v0 = vld [vmem:[%s1081_s1 + $0xc] ss:$16 sps:$4 sm:$0xff] (!%p138_p2)   ;;  %v933_v1 = vld [vmem:[%s1081_s1 + $0x4] ss:$16 sps:$4 sm:$0xff] (!%p138_p2)  }
   0x6   : > { %141 = sbr.rel (%p138_p2) target bundleno = 314 (0x13a), region = 32  ;;  %v948_v2 = vmov (!%p138_p2), 0   ;;  %812 = vmatprep.mubr.msk.bf16.mxu0 (!%p138_p2), %vm542_vm0, %v930_v0  ;;  %581 = vmatprep.mubr.bf16.mxu1 (!%p138_p2), %v933_v1  ;;  %v230_v3 = vld [vmem:[%s1082_s2] sm:$0xff] (!%p138_p2)  ;;  %v231_v4 = vld [vmem:[%s1082_s2 + $0x8] sm:$0xff] (!%p138_p2)  ;;  %v232_v5 = vld [vmem:[%s1082_s2 + $0x10] sm:$0xff] (!%p138_p2) }
   0x7   : > { %851 = vset.pattern.permute.xlu0 (!%p138_p2), %v948_v2  ;;  %852 = vset.pattern.permute.xlu1 (!%p138_p2), %v948_v2  ;;  %v233_v6 = vld [vmem:[%s1082_s2 + $0x18] sm:$0xff] (!%p138_p2)  ;;  %v931_v60 = vld [vmem:[%s1081_s1] ss:$16 sps:$4 sm:$0xff] (!%p138_p2)   ;;  %v936_v61 = vld [vmem:[%s1081_s1 + $0x24] ss:$16 sps:$4 sm:$0xff] (!%p138_p2)  }
   0x8   : > { %236 = vperm.xlu0 (!%p138_p2), %851, %v230_v3   ;;  %246 = vperm.xlu1 (!%p138_p2), %852, %v232_v5   ;;  %v928_v50 = vld [vmem:[%s1081_s1 + $0x8] ss:$16 sps:$4 sm:$0xff] (!%p138_p2)   ;;  %v934_v51 = vld [vmem:[%s1081_s1 + $0x2c] ss:$16 sps:$4 sm:$0xff] (!%p138_p2)   ;;  %v939_v62 = vld [vmem:[%s1081_s1 + $0x20] ss:$16 sps:$4 sm:$0xff] (!%p138_p2)  }
   0x9   : > { %v938_v56 = vld [vmem:[%s1081_s1 + $0x28] ss:$16 sps:$4 sm:$0xff] (!%p138_p2)  }
   0xc   : > { %241 = vperm.xlu0 (!%p138_p2), %851, %v231_v4   ;;  %251 = vperm.xlu1 (!%p138_p2), %852, %v233_v6  }
   0xd   : > { %s1085_s13 = smov (!%p161_p3, %s746_s13), 1 }
   0xe   : > { %s841_s18 = smul.u32 400, %s1085_s13  ;;  %s820_s17 = sshll.u32 %s1085_s13, 5 }
   0xf   : > { %s170_s20 = scalar_lea.vmem %s1083_s3, %s820_s17 }
  0x10   : > { %s993_s23 = scalar_lea.vmem %s1080_s0, %s841_s18 }
  0x11   : > { %v853_v7 = vld [vmem:[%s993_s23 + $0x4] ss:$8 sps:$4 sm:$0xff]   ;;  %v855_v8 = vld [vmem:[%s993_s23] ss:$8 sps:$4 sm:$0xff]   ;;  %v856_v9 = vld [vmem:[%s993_s23 + $0x14] ss:$8 sps:$4 sm:$0xff]  }
  0x12   : > { %549 = vmatprep.subr.bf16.mxu1 %v853_v7  ;;  %v858_v10 = vld [vmem:[%s993_s23 + $0x10] ss:$8 sps:$4 sm:$0xff]   ;;  %v859_v11 = vld [vmem:[%s993_s23 + $0x24] ss:$8 sps:$4 sm:$0xff]   ;;  %v861_v12 = vld [vmem:[%s993_s23 + $0x20] ss:$8 sps:$4 sm:$0xff]  }
  0x13   : > { %550 = vmatpush1.bf16.msra.mxu1 %v855_v8  ;;  %v862_v13 = vld [vmem:[%s993_s23 + $0x34] ss:$8 sps:$4 sm:$0xff]   ;;  %v874_v14 = vld [vmem:[%s993_s23 + $0x104] ss:$8 sps:$4 sm:$0xff]   ;;  %v864_v15 = vld [vmem:[%s993_s23 + $0x30] ss:$8 sps:$4 sm:$0xff]  }
  0x14   : > { %551 = vmatprep.subr.bf16.mxu1 %v856_v9  ;;  %v865_v16 = vld [vmem:[%s993_s23 + $0x44] ss:$8 sps:$4 sm:$0xff]   ;;  %v878_v17 = vld [vmem:[%s993_s23 + $0x100] ss:$8 sps:$4 sm:$0xff]   ;;  %602 = vmatprep.subr.bf16.mxu0 %v874_v14  ;;  %v880_v18 = vld [vmem:[%s993_s23 + $0x114] ss:$8 sps:$4 sm:$0xff]  }
  0x15   : > { %603 = vmatpush1.bf16.msra.mxu0 %v878_v17  ;;  %v867_v19 = vld [vmem:[%s993_s23 + $0x40] ss:$8 sps:$4 sm:$0xff]   ;;  %v884_v20 = vld [vmem:[%s993_s23 + $0x110] ss:$8 sps:$4 sm:$0xff]   ;;  %v886_v21 = vld [vmem:[%s993_s23 + $0x124] ss:$8 sps:$4 sm:$0xff]  }
  0x16   : > { %604 = vmatprep.subr.bf16.mxu0 %v880_v18  ;;  %v868_v22 = vld [vmem:[%s993_s23 + $0x54] ss:$8 sps:$4 sm:$0xff]   ;;  %v890_v23 = vld [vmem:[%s993_s23 + $0x120] ss:$8 sps:$4 sm:$0xff]   ;;  %v870_v25 = vld [vmem:[%s993_s23 + $0x50] ss:$8 sps:$4 sm:$0xff]  }
  0x17   : > { %552 = vmatpush1.bf16.msra.mxu1 %v858_v10  ;;  %v892_v24 = vld [vmem:[%s993_s23 + $0x134] ss:$8 sps:$4 sm:$0xff]   ;;  %v871_v26 = vld [vmem:[%s993_s23 + $0x64] ss:$8 sps:$4 sm:$0xff]   ;;  %v896_v27 = vld [vmem:[%s993_s23 + $0x130] ss:$8 sps:$4 sm:$0xff]  }
  0x18   : > { %553 = vmatprep.subr.bf16.mxu1 %v859_v11  ;;  %v898_v28 = vld [vmem:[%s993_s23 + $0x144] ss:$8 sps:$4 sm:$0xff]   ;;  %v873_v29 = vld [vmem:[%s993_s23 + $0x60] ss:$8 sps:$4 sm:$0xff]   ;;  %v876_v30 = vld [vmem:[%s993_s23 + $0x74] ss:$8 sps:$4 sm:$0xff]  }
  0x19   : > { %605 = vmatpush1.bf16.msra.mxu0 %v884_v20  ;;  %v902_v31 = vld [vmem:[%s993_s23 + $0x140] ss:$8 sps:$4 sm:$0xff]   ;;  %v904_v32 = vld [vmem:[%s993_s23 + $0x154] ss:$8 sps:$4 sm:$0xff]   ;;  %v879_v33 = vld [vmem:[%s993_s23 + $0x70] ss:$8 sps:$4 sm:$0xff]  }
  0x1a   : > { %606 = vmatprep.subr.bf16.mxu0 %v886_v21  ;;  %v882_v34 = vld [vmem:[%s993_s23 + $0x84] ss:$8 sps:$4 sm:$0xff]   ;;  %v908_v35 = vld [vmem:[%s993_s23 + $0x150] ss:$8 sps:$4 sm:$0xff]   ;;  %v885_v37 = vld [vmem:[%s993_s23 + $0x80] ss:$8 sps:$4 sm:$0xff]  }
  0x1b   : > { %554 = vmatpush1.bf16.msra.mxu1 %v861_v12  ;;  %v910_v36 = vld [vmem:[%s993_s23 + $0x164] ss:$8 sps:$4 sm:$0xff]   ;;  %v888_v38 = vld [vmem:[%s993_s23 + $0x94] ss:$8 sps:$4 sm:$0xff]   ;;  %v914_v39 = vld [vmem:[%s993_s23 + $0x160] ss:$8 sps:$4 sm:$0xff]  }
  0x1c   : > { %555 = vmatprep.subr.bf16.mxu1 %v862_v13  ;;  %v916_v40 = vld [vmem:[%s993_s23 + $0x174] ss:$8 sps:$4 sm:$0xff]   ;;  %v891_v41 = vld [vmem:[%s993_s23 + $0x90] ss:$8 sps:$4 sm:$0xff]   ;;  %v894_v42 = vld [vmem:[%s993_s23 + $0xa4] ss:$8 sps:$4 sm:$0xff]  }
  0x1d   : > { %607 = vmatpush1.bf16.msra.mxu0 %v890_v23  ;;  %v920_v43 = vld [vmem:[%s993_s23 + $0x170] ss:$8 sps:$4 sm:$0xff]   ;;  %v922_v44 = vld [vmem:[%s993_s23 + $0x184] ss:$8 sps:$4 sm:$0xff]   ;;  %v897_v45 = vld [vmem:[%s993_s23 + $0xa0] ss:$8 sps:$4 sm:$0xff]  }
  0x1e   : > { %608 = vmatprep.subr.bf16.mxu0 %v892_v24  ;;  %v900_v46 = vld [vmem:[%s993_s23 + $0xb4] ss:$8 sps:$4 sm:$0xff]   ;;  %v926_v47 = vld [vmem:[%s993_s23 + $0x180] ss:$8 sps:$4 sm:$0xff]   ;;  %v903_v48 = vld [vmem:[%s993_s23 + $0xb0] ss:$8 sps:$4 sm:$0xff]  }
  0x1f   : > { %556 = vmatpush1.bf16.msra.mxu1 %v864_v15  ;;  %v906_v49 = vld [vmem:[%s993_s23 + $0xc4] ss:$8 sps:$4 sm:$0xff]   ;;  %v909_v52 = vld [vmem:[%s993_s23 + $0xc0] ss:$8 sps:$4 sm:$0xff]   ;;  %v912_v53 = vld [vmem:[%s993_s23 + $0xd4] ss:$8 sps:$4 sm:$0xff]  }
  0x20   : > { %557 = vmatprep.subr.bf16.mxu1 %v865_v16  ;;  %v915_v54 = vld [vmem:[%s993_s23 + $0xd0] ss:$8 sps:$4 sm:$0xff]   ;;  %v918_v55 = vld [vmem:[%s993_s23 + $0xe4] ss:$8 sps:$4 sm:$0xff]   ;;  %v921_v57 = vld [vmem:[%s993_s23 + $0xe0] ss:$8 sps:$4 sm:$0xff]  }
  0x21   : > { %609 = vmatpush1.bf16.msra.mxu0 %v896_v27  ;;  %v924_v58 = vld [vmem:[%s993_s23 + $0xf4] ss:$8 sps:$4 sm:$0xff]   ;;  %v927_v59 = vld [vmem:[%s993_s23 + $0xf0] ss:$8 sps:$4 sm:$0xff]  }
  0x22   : > { %610 = vmatprep.subr.bf16.mxu0 %v898_v28 }
  0x23   : > { %558 = vmatpush1.bf16.msra.mxu1 %v867_v19 }
  0x24   : > { %559 = vmatprep.subr.bf16.mxu1 %v868_v22 }
  0x25   : > { %611 = vmatpush1.bf16.msra.mxu0 %v902_v31 }
  0x26   : > { %612 = vmatprep.subr.bf16.mxu0 %v904_v32 }
  0x27   : > { %560 = vmatpush1.bf16.msra.mxu1 %v870_v25 }
  0x28   : > { %561 = vmatprep.subr.bf16.mxu1 %v871_v26 }
  0x29   : > { %613 = vmatpush1.bf16.msra.mxu0 %v908_v35 }
  0x2a   : > { %614 = vmatprep.subr.bf16.mxu0 %v910_v36 }
  0x2b   : > { %562 = vmatpush1.bf16.msra.mxu1 %v873_v29 }
  0x2c   : > { %563 = vmatprep.subr.bf16.mxu1 %v876_v30 }
  0x2d   : > { %615 = vmatpush1.bf16.msra.mxu0 %v914_v39 }
  0x2e   : > { %616 = vmatprep.subr.bf16.mxu0 %v916_v40 }
  0x2f   : > { %564 = vmatpush1.bf16.msra.mxu1 %v879_v33 }
  0x30   : > { %565 = vmatprep.subr.bf16.mxu1 %v882_v34 }
  0x31   : > { %617 = vmatpush1.bf16.msra.mxu0 %v920_v43 }
  0x32   : > { %618 = vmatprep.subr.bf16.mxu0 %v922_v44 }
  0x33   : > { %566 = vmatpush1.bf16.msra.mxu1 %v885_v37 }
  0x34   : > { %567 = vmatprep.subr.bf16.mxu1 %v888_v38 }
  0x35   : > { %619 = vmatpush1.bf16.msra.mxu0 %v926_v47 }
  0x37   : > { %568 = vmatpush1.bf16.msra.mxu1 %v891_v41 }
  0x38   : > { %569 = vmatprep.subr.bf16.mxu1 %v894_v42  ;;  %635 = vmatmul.mubr.bf16.vlgmr.msra.gmra.mrb[0].mxu0 %v928_v50 }
  0x39   : > { %813 = vmatprep.mubr.msk.bf16.mxu0 %vm542_vm0, %v934_v51 }
  0x3b   : > { %570 = vmatpush1.bf16.msra.mxu1 %v897_v45 }
  0x3c   : > { %571 = vmatprep.subr.bf16.mxu1 %v900_v46 }
  0x3f   : > { %572 = vmatpush1.bf16.msra.mxu1 %v903_v48 }
  0x40   : > { %573 = vmatprep.subr.bf16.mxu1 %v906_v49  ;;  %645 = vmatmul.mubr.bf16.gmra.mrb[4].mxu0 %v938_v56 }
  0x43   : > { %574 = vmatpush1.bf16.msra.mxu1 %v909_v52 }
  0x44   : > { %575 = vmatprep.subr.bf16.mxu1 %v912_v53 }
  0x47   : > { %576 = vmatpush1.bf16.msra.mxu1 %v915_v54 }
  0x48   : > { %577 = vmatprep.subr.bf16.mxu1 %v918_v55 }
  0x4b   : > { %578 = vmatpush1.bf16.msra.mxu1 %v921_v57 }
  0x4c   : > { %579 = vmatprep.subr.bf16.mxu1 %v924_v58 }
  0x4f   : > { %580 = vmatpush1.bf16.msra.mxu1 %v927_v59 }
  0x52   : > { %582 = vmatmul.mubr.bf16.vlgmr.msra.gmra.mrb[0].mxu1 %v931_v60 }
  0x53   : > { %591 = vmatprep.mubr.bf16.mxu1 %v936_v61 }
  0x5a   : > { %592 = vmatmul.mubr.bf16.gmra.mrb[4].mxu1 %v939_v62 }
  0x87   : > { %v237_v7 = vpop.permute.xlu0 %236  ;;  %v247_v18 = vpop.permute.xlu1 %246 }
  0x8b   : > { %v242_v9 = vpop.permute.xlu0 %241  ;;  %v252_v31 = vpop.permute.xlu1 %251 }
 0x10b   : > { %v636_v63 = vpop.f32.mrb[0].mxu0 }
 0x10c   : > { %v638_v0 = vpop.f32.mrb[1].mxu0 }
 0x10d   : > { %v640_v1 = vpop.f32.mrb[2].mxu0 }
 0x10e   : > { %v642_v2 = vpop.f32.mrb[3].mxu0 }
 0x113   : > { %v646_v3 = vpop.f32.mrb[4].mxu0 }
 0x114   : > { %v648_v4 = vpop.f32.mrb[5].mxu0 }
 0x115   : > { %v650_v5 = vpop.f32.mrb[6].mxu0 }
 0x116   : > { %v652_v6 = vpop.f32.mrb[7].mxu0 }
 0x125   : > { %v583_v8 = vpop.f32.mrb[0].mxu1 }
 0x126   : > { %v584_v10 = vadd.f32 %v583_v8, %v237_v7  ;;  %v585_v11 = vpop.f32.mrb[1].mxu1 }
 0x127   : > { %v586_v12 = vadd.f32 %v585_v11, %v237_v7  ;;  %v587_v13 = vpop.f32.mrb[2].mxu1 }
 0x128   : > { %v637_v14 = vadd.f32 %v636_v63, %v584_v10  ;;  %v588_v15 = vadd.f32 %v587_v13, %v242_v9  ;;  %v589_v16 = vpop.f32.mrb[3].mxu1 }
 0x129   : > { %v639_v17 = vadd.f32 %v638_v0, %v586_v12  ;;  %v590_v19 = vadd.f32 %v589_v16, %v242_v9 }
 0x12a   : > { %v655_v20 = vmax.f32 %v637_v14, 0.0  ;;  %v641_v21 = vadd.f32 %v640_v1, %v588_v15 }
 0x12b   : > { %v656_v22 = vmax.f32 %v639_v17, 0.0  ;;  %v643_v23 = vadd.f32 %v642_v2, %v590_v19 }
 0x12c   : > { %v657_v24 = vmax.f32 %v641_v21, 0.0 }
 0x12d   : > { %v821_v25 = vpack.c.bf16 %v656_v22, %v655_v20  ;;  %v658_v26 = vmax.f32 %v643_v23, 0.0  ;;  %v593_v27 = vpop.f32.mrb[4].mxu1 }
 0x12e   : > { %v594_v28 = vadd.f32 %v593_v27, %v247_v18  ;;  %v595_v29 = vpop.f32.mrb[5].mxu1 }
 0x12f   : > { %687 = vst [vmem:[%s170_s20] sm:$0xff] %v821_v25  ;;  %v822_v30 = vpack.c.bf16 %v658_v26, %v657_v24  ;;  %v596_v32 = vadd.f32 %v595_v29, %v247_v18  ;;  %v597_v33 = vpop.f32.mrb[6].mxu1 }
 0x130   : > { %v647_v34 = vadd.f32 %v646_v3, %v594_v28  ;;  %v598_v35 = vadd.f32 %v597_v33, %v252_v31  ;;  %v599_v36 = vpop.f32.mrb[7].mxu1 }
 0x131   : > { %688 = vst [vmem:[%s170_s20 + $0x8] sm:$0xff] %v822_v30  ;;  %v649_v37 = vadd.f32 %v648_v4, %v596_v32  ;;  %v600_v38 = vadd.f32 %v599_v36, %v252_v31 }
 0x132   : > { %v659_v39 = vmax.f32 %v647_v34, 0.0  ;;  %v651_v40 = vadd.f32 %v650_v5, %v598_v35 }
 0x133   : > { %v660_v41 = vmax.f32 %v649_v37, 0.0  ;;  %v653_v42 = vadd.f32 %v652_v6, %v600_v38 }
 0x134   : > { %v661_v43 = vmax.f32 %v651_v40, 0.0 }
 0x135   : > { %v823_v44 = vpack.c.bf16 %v660_v41, %v659_v39  ;;  %v662_v45 = vmax.f32 %v653_v42, 0.0 }
 0x137   : > { %689 = vst [vmem:[%s170_s20 + $0x10] sm:$0xff] %v823_v44  ;;  %v824_v46 = vpack.c.bf16 %v662_v45, %v661_v43 }
 0x139   : > { %690 = vst [vmem:[%s170_s20 + $0x18] sm:$0xff] %v824_v46 }
 0x13a PF: > { %s13_s12 = sadd.s32 1, %s946_s12  }
 0x13b   : > { %p10_p4 = scmp.ge.s32.totalorder %s13_s12, 4  }
 0x13d   :  { %12 = sbr.rel (!%p10_p4) target bundleno = 1 (0x1), region = 62 }

// kernel: _lambda_.6
= control target key start
LH: loop header
LB: loop body
LE: loop exit
PB: predicated region body
PF: predicated region fallthrough
CT: control target
= control target key end

     0   :  { %s1563_s12 = smov 0   ;;  %s1784_s0 = inlined_call_operand.vmem [shape: bf16[2,800,64], index: 0, kind: input, shape index: {}]   ;;  %s1785_s1 = inlined_call_operand.vmem [shape: bf16[64,800], index: 1, kind: input, shape index: {}]   ;;  %s1786_s2 = inlined_call_operand.vmem [shape: f32[64,1], index: 2, kind: input, shape index: {}]   ;;  %s1787_s3 = inlined_call_operand.vmem [shape: bf16[2,64,64], index: 3, kind: output, shape index: {}]  }
   0x1 LB: > { %s1169_s13 = sadd.s32 4294967295, %s1540_s12   ;;  %p1173_p0 = scmp.ge.s32.totalorder %s1540_s12, 1  ;;  %s1540_s12 = sphi %s1563_s12, %s13_s12  }
   0x2   : > { %p137_p1 = scmp.lt.s32.totalorder %s1540_s12, 3 }
   0x4   : > { %p138_p2 = pnand %p1173_p0, %p137_p1 }
   0x5   : > { %p161_p3 = scmp.lt.s32.totalorder (!%p138_p2), %s1169_s13, 1  ;;  %v1478_v0 = vld [vmem:[%s1785_s1 + $0x4] ss:$28 sps:$4 sm:$0xff] (!%p138_p2)   ;;  %v1481_v1 = vld [vmem:[%s1785_s1 + $0xc] ss:$28 sps:$4 sm:$0xff] (!%p138_p2)   ;;  %v1542_v2 = vmov (!%p138_p2), 0  }
   0x6   : > { %141 = sbr.rel (%p138_p2) target bundleno = 326 (0x146), region = 32  ;;  %1442 = vset.pattern.permute.xlu0 (!%p138_p2), %v1542_v2  ;;  %1443 = vset.pattern.permute.xlu1 (!%p138_p2), %v1542_v2  ;;  %v1476_v33 = vld [vmem:[%s1785_s1] ss:$28 sps:$4 sm:$0xff] (!%p138_p2)   ;;  %v1479_v35 = vld [vmem:[%s1785_s1 + $0x8] ss:$28 sps:$4 sm:$0xff] (!%p138_p2)   ;;  %vm792_vm0 = vcmask (!%p138_p2), 261120  }
   0x7   : > { %837 = vmatprep.mubr.bf16.mxu0 (!%p138_p2), %v1478_v0  ;;  %902 = vmatprep.mubr.bf16.mxu1 (!%p138_p2), %v1481_v1  ;;  %v1486_v38 = vld [vmem:[%s1785_s1 + $0x3c] ss:$28 sps:$4 sm:$0xff] (!%p138_p2)   ;;  %v1488_v41 = vld [vmem:[%s1785_s1 + $0x44] ss:$28 sps:$4 sm:$0xff] (!%p138_p2)   ;;  %v1496_v48 = vld [vmem:[%s1785_s1 + $0x74] ss:$28 sps:$4 sm:$0xff] (!%p138_p2)  }
   0x8   : > { %v1490_v44 = vld [vmem:[%s1785_s1 + $0x38] ss:$28 sps:$4 sm:$0xff] (!%p138_p2)   ;;  %v1491_v45 = vld [vmem:[%s1785_s1 + $0x40] ss:$28 sps:$4 sm:$0xff] (!%p138_p2)   ;;  %v1500_v52 = vld [vmem:[%s1785_s1 + $0x70] ss:$28 sps:$4 sm:$0xff] (!%p138_p2)  }
   0x9   : > { %v1498_v49 = vld [vmem:[%s1785_s1 + $0x7c] ss:$28 sps:$4 sm:$0xff] (!%p138_p2)   ;;  %v1506_v56 = vld [vmem:[%s1785_s1 + $0xac] ss:$28 sps:$4 sm:$0xff] (!%p138_p2)   ;;  %v1508_v57 = vld [vmem:[%s1785_s1 + $0xb4] ss:$28 sps:$4 sm:$0xff] (!%p138_p2)  }
   0xa   : > { %v1501_v53 = vld [vmem:[%s1785_s1 + $0x78] ss:$28 sps:$4 sm:$0xff] (!%p138_p2)   ;;  %v1510_v60 = vld [vmem:[%s1785_s1 + $0xa8] ss:$28 sps:$4 sm:$0xff] (!%p138_p2)   ;;  %v1511_v61 = vld [vmem:[%s1785_s1 + $0xb0] ss:$28 sps:$4 sm:$0xff] (!%p138_p2)  }
   0xb   : > { %v1518_v0 = vld [vmem:[%s1785_s1 + $0x14] ss:$28 sps:$4 sm:$0xff] (!%p138_p2)   ;;  %v1521_v1 = vld [vmem:[%s1785_s1 + $0xbc] ss:$28 sps:$4 sm:$0xff] (!%p138_p2)   ;;  %vm1105_vm1 = vcmask (!%p138_p2), 519168  }
   0xd   : > { %s1789_s13 = smov (!%p161_p3, %s1169_s13), 1 }
   0xe   : > { %s1432_s18 = smul.u32 400, %s1789_s13  ;;  %s1269_s16 = sshll.u32 %s1789_s13, 5 }
   0xf   : > { %s1760_s19 = scalar_lea.vmem %s1787_s3, %s1269_s16 }
  0x10   : > { %s1583_s21 = scalar_lea.vmem %s1784_s0, %s1432_s18 }
  0x11   : > { %v1444_v3 = vld [vmem:[%s1583_s21 + $0x40] sm:$0xff]   ;;  %v1448_v7 = vld [vmem:[%s1583_s21 + $0x48] sm:$0xff]   ;;  %v1452_v11 = vld [vmem:[%s1583_s21 + $0x50] sm:$0xff]  }
  0x12   : > { %v1445_v4 = vld [vmem:[%s1583_s21 + $0xc0] sm:$0xff]   ;;  %1278 = vmatprep.subr.bf16.mxu0 %v1444_v3  ;;  %v1449_v8 = vld [vmem:[%s1583_s21 + $0xc8] sm:$0xff]   ;;  %v1453_v12 = vld [vmem:[%s1583_s21 + $0xd0] sm:$0xff]  }
  0x13   : > { %v1446_v5 = vld [vmem:[%s1583_s21] sm:$0xff]   ;;  %1318 = vmatprep.subr.bf16.mxu1 %v1445_v4  ;;  %v1450_v9 = vld [vmem:[%s1583_s21 + $0x8] sm:$0xff]   ;;  %v1454_v13 = vld [vmem:[%s1583_s21 + $0x10] sm:$0xff]  }
  0x14   : > { %v1447_v6 = vld [vmem:[%s1583_s21 + $0x80] sm:$0xff]   ;;  %1279 = vmatpush3.bf16.msra.mxu0 %v1446_v5  ;;  %v1451_v10 = vld [vmem:[%s1583_s21 + $0x88] sm:$0xff]   ;;  %v1455_v14 = vld [vmem:[%s1583_s21 + $0x90] sm:$0xff]  }
  0x15   : > { %1319 = vmatpush3.bf16.msra.mxu1 %v1447_v6  ;;  %1280 = vmatprep.subr.bf16.mxu0 %v1448_v7  ;;  %v1456_v15 = vld [vmem:[%s1583_s21 + $0x58] sm:$0xff]   ;;  %v1460_v19 = vld [vmem:[%s1583_s21 + $0x60] sm:$0xff]   ;;  %v1464_v23 = vld [vmem:[%s1583_s21 + $0x68] sm:$0xff]  }
  0x16   : > { %1320 = vmatprep.subr.bf16.mxu1 %v1449_v8  ;;  %v1457_v16 = vld [vmem:[%s1583_s21 + $0xd8] sm:$0xff]   ;;  %v1461_v20 = vld [vmem:[%s1583_s21 + $0xe0] sm:$0xff]   ;;  %v1465_v24 = vld [vmem:[%s1583_s21 + $0xe8] sm:$0xff]  }
  0x17   : > { %v1458_v17 = vld [vmem:[%s1583_s21 + $0x18] sm:$0xff]   ;;  %v1462_v21 = vld [vmem:[%s1583_s21 + $0x20] sm:$0xff]   ;;  %v1466_v25 = vld [vmem:[%s1583_s21 + $0x28] sm:$0xff]  }
  0x18   : > { %1281 = vmatpush3.bf16.msra.mxu0 %v1450_v9  ;;  %v1459_v18 = vld [vmem:[%s1583_s21 + $0x98] sm:$0xff]   ;;  %v1463_v22 = vld [vmem:[%s1583_s21 + $0xa0] sm:$0xff]   ;;  %v1467_v26 = vld [vmem:[%s1583_s21 + $0xa8] sm:$0xff]  }
  0x19   : > { %1321 = vmatpush3.bf16.msra.mxu1 %v1451_v10  ;;  %1282 = vmatprep.subr.bf16.mxu0 %v1452_v11  ;;  %v1468_v27 = vld [vmem:[%s1583_s21 + $0x70] sm:$0xff]   ;;  %v1472_v31 = vld [vmem:[%s1583_s21 + $0x78] sm:$0xff]   ;;  %v1482_v37 = vld [vmem:[%s1583_s21 + $0x140] sm:$0xff]  }
  0x1a   : > { %1322 = vmatprep.subr.bf16.mxu1 %v1453_v12  ;;  %v1469_v28 = vld [vmem:[%s1583_s21 + $0xf0] sm:$0xff]   ;;  %v1473_v32 = vld [vmem:[%s1583_s21 + $0xf8] sm:$0xff]   ;;  %v1483_v39 = vld [vmem:[%s1583_s21 + $0x100] sm:$0xff]  }
  0x1b   : > { %v1470_v29 = vld [vmem:[%s1583_s21 + $0x30] sm:$0xff]   ;;  %v1474_v34 = vld [vmem:[%s1583_s21 + $0x38] sm:$0xff]   ;;  %v1484_v40 = vld [vmem:[%s1583_s21 + $0x148] sm:$0xff]  }
  0x1c   : > { %1283 = vmatpush3.bf16.msra.mxu0 %v1454_v13  ;;  %v1471_v30 = vld [vmem:[%s1583_s21 + $0xb0] sm:$0xff]   ;;  %v1475_v36 = vld [vmem:[%s1583_s21 + $0xb8] sm:$0xff]   ;;  %v1485_v42 = vld [vmem:[%s1583_s21 + $0x108] sm:$0xff]  }
  0x1d   : > { %1323 = vmatpush3.bf16.msra.mxu1 %v1455_v14  ;;  %1284 = vmatprep.subr.bf16.mxu0 %v1456_v15  ;;  %v1492_v43 = vld [vmem:[%s1583_s21 + $0x150] sm:$0xff]   ;;  %v1494_v47 = vld [vmem:[%s1583_s21 + $0x158] sm:$0xff]   ;;  %v1502_v51 = vld [vmem:[%s1583_s21 + $0x160] sm:$0xff]  }
  0x1e   : > { %1324 = vmatprep.subr.bf16.mxu1 %v1457_v16  ;;  %v1493_v46 = vld [vmem:[%s1583_s21 + $0x110] sm:$0xff]   ;;  %v1495_v50 = vld [vmem:[%s1583_s21 + $0x118] sm:$0xff]   ;;  %v1503_v54 = vld [vmem:[%s1583_s21 + $0x120] sm:$0xff]  }
  0x1f   : > { %v1504_v55 = vld [vmem:[%s1583_s21 + $0x168] sm:$0xff]   ;;  %v1512_v59 = vld [vmem:[%s1583_s21 + $0x170] sm:$0xff]   ;;  %v1514_v63 = vld [vmem:[%s1583_s21 + $0x178] sm:$0xff]  }
  0x20   : > { %1285 = vmatpush3.bf16.msra.mxu0 %v1458_v17  ;;  %v1505_v58 = vld [vmem:[%s1583_s21 + $0x128] sm:$0xff]   ;;  %v1513_v62 = vld [vmem:[%s1583_s21 + $0x130] sm:$0xff]   ;;  %v1515_v2 = vld [vmem:[%s1583_s21 + $0x138] sm:$0xff]  }
  0x21   : > { %1325 = vmatpush3.bf16.msra.mxu1 %v1459_v18  ;;  %1286 = vmatprep.subr.bf16.mxu0 %v1460_v19  ;;  %v1522_v3 = vld [vmem:[%s1583_s21 + $0x180] sm:$0xff]   ;;  %v1516_v4 = vld [vmem:[%s1785_s1 + $0x10] ss:$28 sps:$4 sm:$0xff]   ;;  %v1519_v7 = vld [vmem:[%s1785_s1 + $0xb8] ss:$28 sps:$4 sm:$0xff]  }
  0x22   : > { %1326 = vmatprep.subr.bf16.mxu1 %v1461_v20  ;;  %v304_v5 = vld [vmem:[%s1786_s2] sm:$0xff]  ;;  %v306_v6 = vld [vmem:[%s1786_s2 + $0x10] sm:$0xff]  ;;  %v1524_v8 = vld [vmem:[%s1785_s1 + $0x4c] ss:$28 sps:$4 sm:$0xff]  }
  0x23   : > { %314 = vperm.xlu0 %1442, %v304_v5   ;;  %v1526_v9 = vld [vmem:[%s1785_s1 + $0x18] ss:$28 sps:$4 sm:$0xff]   ;;  %324 = vperm.xlu1 %1443, %v306_v6   ;;  %v1523_v10 = vld [vmem:[%s1583_s21 + $0x188] sm:$0xff]   ;;  %v308_v14 = vld [vmem:[%s1786_s2 + $0x20] sm:$0xff] }
  0x24   : > { %1287 = vmatpush3.bf16.msra.mxu0 %v1462_v21  ;;  %v305_v11 = vld [vmem:[%s1786_s2 + $0x8] sm:$0xff]  ;;  %v307_v12 = vld [vmem:[%s1786_s2 + $0x18] sm:$0xff]  ;;  %v1529_v16 = vld [vmem:[%s1785_s1 + $0x84] ss:$28 sps:$4 sm:$0xff]  }
  0x25   : > { %1327 = vmatpush3.bf16.msra.mxu1 %v1463_v22  ;;  %1288 = vmatprep.subr.bf16.mxu0 %v1464_v23  ;;  %v1527_v13 = vld [vmem:[%s1785_s1 + $0x48] ss:$28 sps:$4 sm:$0xff]   ;;  %v1528_v15 = vld [vmem:[%s1785_s1 + $0x50] ss:$28 sps:$4 sm:$0xff]   ;;  %v311_v20 = vld [vmem:[%s1786_s2 + $0x38] sm:$0xff] }
  0x26   : > { %1328 = vmatprep.subr.bf16.mxu1 %v1465_v24  ;;  %v309_v17 = vld [vmem:[%s1786_s2 + $0x28] sm:$0xff]  ;;  %v310_v19 = vld [vmem:[%s1786_s2 + $0x30] sm:$0xff]  ;;  %v1532_v21 = vld [vmem:[%s1785_s1 + $0x80] ss:$28 sps:$4 sm:$0xff]  }
  0x27   : > { %319 = vperm.xlu0 %1442, %v305_v11   ;;  %329 = vperm.xlu1 %1443, %v307_v12   ;;  %v1531_v18 = vld [vmem:[%s1785_s1 + $0x88] ss:$28 sps:$4 sm:$0xff]   ;;  %v1533_v22 = vld [vmem:[%s1785_s1 + $0xc0] ss:$28 sps:$4 sm:$0xff]  }
  0x28   : > { %1289 = vmatpush3.bf16.msra.mxu0 %v1466_v25 }
  0x29   : > { %1329 = vmatpush3.bf16.msra.mxu1 %v1467_v26  ;;  %1290 = vmatprep.subr.bf16.mxu0 %v1468_v27 }
  0x2a   : > { %1330 = vmatprep.subr.bf16.mxu1 %v1469_v28 }
  0x2b   : > { %334 = vperm.xlu0 %1442, %v308_v14   ;;  %339 = vperm.xlu1 %1443, %v309_v17  }
  0x2c   : > { %1291 = vmatpush3.bf16.msra.mxu0 %v1470_v29 }
  0x2d   : > { %1331 = vmatpush3.bf16.msra.mxu1 %v1471_v30  ;;  %1292 = vmatprep.subr.bf16.mxu0 %v1472_v31 }
  0x2e   : > { %1332 = vmatprep.subr.bf16.mxu1 %v1473_v32 }
  0x2f   : > { %344 = vperm.xlu0 %1442, %v310_v19   ;;  %349 = vperm.xlu1 %1443, %v311_v20  }
  0x30   : > { %1293 = vmatpush3.bf16.msra.mxu0 %v1474_v34 }
  0x31   : > { %1333 = vmatpush3.bf16.msra.mxu1 %v1475_v36  ;;  %1358 = vmatprep.subr.bf16.mxu0 %v1482_v37 }
  0x32   : > { %1416 = vmatprep.subr.bf16.mxu1 %v1482_v37 }
  0x33   : > { %838 = vmatmul.mubr.bf16.vlgmr.msra.gmra.mrb[0].mxu0 %v1476_v33 }
  0x34   : > { %903 = vmatmul.mubr.bf16.vlgmr.msra.gmra.mrb[0].mxu1 %v1479_v35  ;;  %1359 = vmatpush3.bf16.msra.mxu0 %v1483_v39 }
  0x35   : > { %1424 = vmatpush3.bf16.msra.mxu1 %v1483_v39  ;;  %1360 = vmatprep.subr.bf16.mxu0 %v1484_v40 }
  0x36   : > { %1417 = vmatprep.subr.bf16.mxu1 %v1484_v40  ;;  %845 = vmatprep.mubr.bf16.mxu0 %v1486_v38 }
  0x37   : > { %910 = vmatprep.mubr.bf16.mxu1 %v1488_v41 }
  0x38   : > { %1361 = vmatpush3.bf16.msra.mxu0 %v1485_v42 }
  0x39   : > { %1425 = vmatpush3.bf16.msra.mxu1 %v1485_v42  ;;  %1362 = vmatprep.subr.bf16.mxu0 %v1492_v43 }
  0x3a   : > { %1418 = vmatprep.subr.bf16.mxu1 %v1492_v43 }
  0x3b   : > { %846 = vmatmul.mubr.bf16.gmra.mrb[4].mxu0 %v1490_v44 }
  0x3c   : > { %911 = vmatmul.mubr.bf16.gmra.mrb[4].mxu1 %v1491_v45  ;;  %1363 = vmatpush3.bf16.msra.mxu0 %v1493_v46 }
  0x3d   : > { %1426 = vmatpush3.bf16.msra.mxu1 %v1493_v46  ;;  %1364 = vmatprep.subr.bf16.mxu0 %v1494_v47 }
  0x3e   : > { %1419 = vmatprep.subr.bf16.mxu1 %v1494_v47  ;;  %853 = vmatprep.mubr.bf16.mxu0 %v1496_v48 }
  0x3f   : > { %918 = vmatprep.mubr.bf16.mxu1 %v1498_v49 }
  0x40   : > { %1365 = vmatpush3.bf16.msra.mxu0 %v1495_v50 }
  0x41   : > { %1427 = vmatpush3.bf16.msra.mxu1 %v1495_v50  ;;  %1366 = vmatprep.subr.bf16.mxu0 %v1502_v51 }
  0x42   : > { %1420 = vmatprep.subr.bf16.mxu1 %v1502_v51 }
  0x43   : > { %854 = vmatmul.mubr.bf16.gmra.mrb[8].mxu0 %v1500_v52 }
  0x44   : > { %919 = vmatmul.mubr.bf16.gmra.mrb[8].mxu1 %v1501_v53  ;;  %1367 = vmatpush3.bf16.msra.mxu0 %v1503_v54 }
  0x45   : > { %1428 = vmatpush3.bf16.msra.mxu1 %v1503_v54  ;;  %1368 = vmatprep.subr.bf16.mxu0 %v1504_v55 }
  0x46   : > { %1421 = vmatprep.subr.bf16.mxu1 %v1504_v55  ;;  %861 = vmatprep.mubr.bf16.mxu0 %v1506_v56 }
  0x47   : > { %926 = vmatprep.mubr.bf16.mxu1 %v1508_v57 }
  0x48   : > { %1369 = vmatpush3.bf16.msra.mxu0 %v1505_v58 }
  0x49   : > { %1429 = vmatpush3.bf16.msra.mxu1 %v1505_v58  ;;  %1370 = vmatprep.subr.bf16.mxu0 %v1512_v59 }
  0x4a   : > { %1422 = vmatprep.subr.bf16.mxu1 %v1512_v59 }
  0x4b   : > { %862 = vmatmul.mubr.bf16.gmra.mrb[12].mxu0 %v1510_v60 }
  0x4c   : > { %927 = vmatmul.mubr.bf16.gmra.mrb[12].mxu1 %v1511_v61  ;;  %1371 = vmatpush3.bf16.msra.mxu0 %v1513_v62 }
  0x4d   : > { %1430 = vmatpush3.bf16.msra.mxu1 %v1513_v62  ;;  %1372 = vmatprep.subr.bf16.mxu0 %v1514_v63 }
  0x4e   : > { %1423 = vmatprep.subr.bf16.mxu1 %v1514_v63  ;;  %967 = vmatprep.mubr.bf16.mxu0 %v1518_v0 }
  0x4f   : > { %991 = vmatprep.mubr.bf16.mxu1 %v1521_v1 }
  0x50   : > { %1373 = vmatpush3.bf16.msra.mxu0 %v1515_v2 }
  0x51   : > { %1431 = vmatpush3.bf16.msra.mxu1 %v1515_v2 }
  0x52   : > { %1404 = vmatprep.subr.bf16.mxu1 %v1522_v3 }
  0x53   : > { %968 = vmatmul.mubr.bf16.vlgmr.msra.gmra.mrb[16].mxu0 %v1516_v4 }
  0x54   : > { %992 = vmatmul.mubr.bf16.vlgmr.msra.gmra.mrb[16].mxu1 %v1519_v7  ;;  %975 = vmatprep.mubr.bf16.mxu0 %v1524_v8 }
  0x55   : > { %1405 = vmatpush3.bf16.msra.mxu1 %v1522_v3  ;;  %1408 = vmatprep.mubr.msk.bf16.mxu1 %vm792_vm0, %v1526_v9 }
  0x56   : > { %1406 = vmatprep.subr.bf16.mxu1 %v1523_v10 }
  0x59   : > { %1407 = vmatpush3.bf16.msra.mxu1 %v1523_v10 }
  0x5b   : > { %976 = vmatmul.mubr.bf16.gmra.mrb[20].mxu0 %v1527_v13 }
  0x5c   : > { %1409 = vmatmul.mubr.msk.bf16.vlgmr.msra.gmra.mrb[20].mxu1 %vm792_vm0, %v1528_v15  ;;  %983 = vmatprep.mubr.bf16.mxu0 %v1529_v16 }
  0x5d   : > { %1412 = vmatprep.mubr.msk.bf16.mxu1 %vm792_vm0, %v1531_v18 }
  0x63   : > { %984 = vmatmul.mubr.bf16.gmra.mrb[24].mxu0 %v1532_v21 }
  0x64   : > { %1413 = vmatmul.mubr.msk.bf16.gmra.mrb[24].mxu1 %vm792_vm0, %v1533_v22 }
  0xa2   : > { %v315_v23 = vpop.permute.xlu0 %314  ;;  %v325_v24 = vpop.permute.xlu1 %324 }
  0xa6   : > { %v320_v26 = vpop.permute.xlu0 %319  ;;  %v330_v43 = vpop.permute.xlu1 %329 }
  0xaa   : > { %v335_v58 = vpop.permute.xlu0 %334  ;;  %v340_v61 = vpop.permute.xlu1 %339 }
  0xae   : > { %v345_v12 = vpop.permute.xlu0 %344  ;;  %v350_v15 = vpop.permute.xlu1 %349 }
 0x106   : > { %v1294_v25 = vpop.f32.mrb[0].mxu0 }
 0x107   : > { %v1295_v27 = vpop.f32.mrb[1].mxu0  ;;  %v1334_v28 = vpop.f32.mrb[0].mxu1 }
 0x108   : > { %v1296_v29 = vadd.f32 %v1295_v27, %v1294_v25  ;;  %v1297_v30 = vpop.f32.mrb[2].mxu0  ;;  %v1335_v31 = vpop.f32.mrb[1].mxu1 }
 0x109   : > { %v1298_v32 = vpop.f32.mrb[3].mxu0  ;;  %v1336_v33 = vadd.f32 %v1335_v31, %v1334_v28  ;;  %v1337_v34 = vpop.f32.mrb[2].mxu1 }
 0x10a   : > { %v840_v35 = vadd.f32 %v1296_v29, %v315_v23  ;;  %v1299_v36 = vadd.f32 %v1298_v32, %v1297_v30  ;;  %v1338_v37 = vpop.f32.mrb[3].mxu1 }
 0x10b   : > { %v1339_v38 = vadd.f32 %v1338_v37, %v1337_v34 }
 0x10c   : > { %v1741_v39 = vadd.f32 %v1336_v33, %v840_v35  ;;  %v843_v40 = vadd.f32 %v1299_v36, %v320_v26 }
 0x10e   : > { %v1743_v41 = vadd.f32 %v1339_v38, %v843_v40  ;;  %v1300_v42 = vpop.f32.mrb[4].mxu0 }
 0x10f   : > { %v1301_v44 = vpop.f32.mrb[5].mxu0  ;;  %v1340_v45 = vpop.f32.mrb[4].mxu1 }
 0x110   : > { %v1302_v46 = vadd.f32 %v1301_v44, %v1300_v42  ;;  %v1303_v47 = vpop.f32.mrb[6].mxu0  ;;  %v1341_v48 = vpop.f32.mrb[5].mxu1 }
 0x111   : > { %v1304_v49 = vpop.f32.mrb[7].mxu0  ;;  %v1342_v50 = vadd.f32 %v1341_v48, %v1340_v45  ;;  %v1343_v51 = vpop.f32.mrb[6].mxu1 }
 0x112   : > { %v848_v52 = vadd.f32 %v1302_v46, %v325_v24  ;;  %v1305_v53 = vadd.f32 %v1304_v49, %v1303_v47  ;;  %v1344_v54 = vpop.f32.mrb[7].mxu1 }
 0x113   : > { %v1345_v55 = vadd.f32 %v1344_v54, %v1343_v51 }
 0x114   : > { %v1745_v56 = vadd.f32 %v1342_v50, %v848_v52  ;;  %v851_v57 = vadd.f32 %v1305_v53, %v330_v43 }
 0x116   : > { %v1747_v59 = vadd.f32 %v1345_v55, %v851_v57  ;;  %v1306_v60 = vpop.f32.mrb[8].mxu0 }
 0x117   : > { %v1307_v62 = vpop.f32.mrb[9].mxu0  ;;  %v1346_v63 = vpop.f32.mrb[8].mxu1 }
 0x118   : > { %v1308_v0 = vadd.f32 %v1307_v62, %v1306_v60  ;;  %v1309_v1 = vpop.f32.mrb[10].mxu0  ;;  %v1347_v2 = vpop.f32.mrb[9].mxu1 }
 0x119   : > { %v1310_v3 = vpop.f32.mrb[11].mxu0  ;;  %v1348_v4 = vadd.f32 %v1347_v2, %v1346_v63  ;;  %v1349_v5 = vpop.f32.mrb[10].mxu1 }
 0x11a   : > { %v856_v6 = vadd.f32 %v1308_v0, %v335_v58  ;;  %v1311_v7 = vadd.f32 %v1310_v3, %v1309_v1  ;;  %v1350_v8 = vpop.f32.mrb[11].mxu1 }
 0x11b   : > { %v1351_v9 = vadd.f32 %v1350_v8, %v1349_v5 }
 0x11c   : > { %v1749_v10 = vadd.f32 %v1348_v4, %v856_v6  ;;  %v859_v11 = vadd.f32 %v1311_v7, %v340_v61 }
 0x11e   : > { %v1751_v13 = vadd.f32 %v1351_v9, %v859_v11  ;;  %v1312_v14 = vpop.f32.mrb[12].mxu0 }
 0x11f   : > { %v1313_v16 = vpop.f32.mrb[13].mxu0  ;;  %v1352_v17 = vpop.f32.mrb[12].mxu1 }
 0x120   : > { %v1314_v18 = vadd.f32 %v1313_v16, %v1312_v14  ;;  %v1315_v19 = vpop.f32.mrb[14].mxu0  ;;  %v1353_v20 = vpop.f32.mrb[13].mxu1 }
 0x121   : > { %v1316_v21 = vpop.f32.mrb[15].mxu0  ;;  %v1354_v22 = vadd.f32 %v1353_v20, %v1352_v17  ;;  %v1355_v23 = vpop.f32.mrb[14].mxu1 }
 0x122   : > { %v864_v24 = vadd.f32 %v1314_v18, %v345_v12  ;;  %v1317_v25 = vadd.f32 %v1316_v21, %v1315_v19  ;;  %v1356_v26 = vpop.f32.mrb[15].mxu1 }
 0x123   : > { %v1357_v27 = vadd.f32 %v1356_v26, %v1355_v23 }
 0x124   : > { %v929_v28 = vadd.f32 %v1354_v22, %v864_v24  ;;  %v867_v29 = vadd.f32 %v1317_v25, %v350_v15 }
 0x126   : > { %v932_v30 = vadd.f32 %v1357_v27, %v867_v29  ;;  %v1374_v31 = vpop.f32.mrb[16].mxu0 }
 0x127   : > { %v1392_v32 = vpop.f32.mrb[16].mxu1  ;;  %v1375_v33 = vpop.f32.mrb[17].mxu0 }
 0x128   : > { %v1376_v34 = vadd.f32 %v1375_v33, %v1374_v31  ;;  %v1393_v35 = vpop.f32.mrb[17].mxu1  ;;  %v1377_v36 = vpop.f32.mrb[18].mxu0 }
 0x129   : > { %v1394_v37 = vadd.f32 %v1393_v35, %v1392_v32  ;;  %v1395_v38 = vpop.f32.mrb[18].mxu1  ;;  %v1378_v40 = vpop.f32.mrb[19].mxu0 }
 0x12a   : > { %v1379_v42 = vadd.f32 %v1378_v40, %v1377_v36  ;;  %v1396_v43 = vpop.f32.mrb[19].mxu1  ;;  %v970_v44 = vadd.f32 %v1376_v34, %v1741_v39 }
 0x12b   : > { %v1397_v45 = vadd.f32 %v1396_v43, %v1395_v38  ;;  %v994_v46 = vadd.f32 %v1394_v37, %v929_v28 }
 0x12c   : > { %v973_v47 = vadd.f32 %v1379_v42, %v1743_v41 }
 0x12d   : > { %v997_v48 = vadd.f32 %v1397_v45, %v932_v30 }
 0x12e   : > { %v1380_v49 = vpop.f32.mrb[20].mxu0 }
 0x12f   : > { %v1410_v50 = vpop.f32.mrb[20].mxu1  ;;  %v1381_v51 = vpop.f32.mrb[21].mxu0 }
 0x130   : > { %v1382_v52 = vadd.f32 %v1381_v51, %v1380_v49  ;;  %v1034_v53 = vpop.f32.mrb[21].mxu1  ;;  %v1383_v54 = vpop.f32.mrb[22].mxu0 }
 0x131   : > { %v1035_v55 = vadd.f32 %v1034_v53, %v970_v44  ;;  %v1411_v57 = vpop.f32.mrb[22].mxu1  ;;  %v1384_v58 = vpop.f32.mrb[23].mxu0 }
 0x132   : > { %v978_v60 = vadd.f32 %v1382_v52, %v1745_v56  ;;  %v1385_v61 = vadd.f32 %v1384_v58, %v1383_v54  ;;  %v1037_v62 = vpop.f32.mrb[23].mxu1 }
 0x133   : > { %v1065_v39 = vmax.f32 %v1035_v55, 0.0  ;;  %v1038_v63 = vadd.f32 %v1037_v62, %v973_v47 }
 0x134   : > { %v1043_v41 = vadd.f32 %v1410_v50, %v978_v60  ;;  %v981_v0 = vadd.f32 %v1385_v61, %v1747_v59 }
 0x135   : > { %v1270_v1 = vpack.c.bf16 %v1065_v39, %v1065_v39  ;;  %v1066_v2 = vmax.f32 %v1038_v63, 0.0 }
 0x136   : > { %v1067_v3 = vmax.f32 %v1043_v41, 0.0  ;;  %v1046_v56 = vadd.f32 %v1411_v57, %v981_v0  ;;  %v1386_v4 = vpop.f32.mrb[24].mxu0 }
 0x137   : > { %1106 = vst.msk [vmem:[%s1760_s19] sm:$0xf] %vm1105_vm1, %v1270_v1  ;;  %v1271_v5 = vpack.c.bf16 %v1066_v2, %v1066_v2  ;;  %v1414_v6 = vpop.f32.mrb[24].mxu1  ;;  %v1387_v7 = vpop.f32.mrb[25].mxu0 }
 0x138   : > { %v1272_v8 = vpack.c.bf16 %v1067_v3, %v1067_v3  ;;  %v1068_v9 = vmax.f32 %v1046_v56, 0.0  ;;  %v1059_v11 = vadd.f32 %v1414_v6, %v994_v46  ;;  %v1388_v12 = vadd.f32 %v1387_v7, %v1386_v4  ;;  %v1050_v14 = vpop.f32.mrb[25].mxu1  ;;  %v1389_v15 = vpop.f32.mrb[26].mxu0 }
 0x139   : > { %1107 = vst.msk [vmem:[%s1760_s19 + $0x4] sm:$0xf] %vm1105_vm1, %v1271_v5  ;;  %v1415_v59 = vpop.f32.mrb[26].mxu1  ;;  %v1390_v16 = vpop.f32.mrb[27].mxu0 }
 0x13a   : > { %1108 = vst.msk [vmem:[%s1760_s19 + $0x8] sm:$0xf] %vm1105_vm1, %v1272_v8  ;;  %v1273_v17 = vpack.c.bf16 %v1068_v9, %v1068_v9  ;;  %v1071_v18 = vmax.f32 %v1059_v11, 0.0  ;;  %v986_v19 = vadd.f32 %v1388_v12, %v1749_v10  ;;  %v1062_v20 = vadd.f32 %v1415_v59, %v997_v48  ;;  %v1053_v21 = vpop.f32.mrb[27].mxu1 }
 0x13b   : > { %v1391_v22 = vadd.f32 %v1390_v16, %v1389_v15 }
 0x13c   : > { %1109 = vst.msk [vmem:[%s1760_s19 + $0xc] sm:$0xf] %vm1105_vm1, %v1273_v17  ;;  %v1276_v23 = vpack.c.bf16 %v1071_v18, %v1071_v18  ;;  %v1051_v24 = vadd.f32 %v1050_v14, %v986_v19  ;;  %v1072_v25 = vmax.f32 %v1062_v20, 0.0 }
 0x13d   : > { %v989_v26 = vadd.f32 %v1391_v22, %v1751_v13 }
 0x13e   : > { %1112 = vst.msk [vmem:[%s1760_s19 + $0x18] sm:$0xf] %vm1105_vm1, %v1276_v23  ;;  %v1069_v27 = vmax.f32 %v1051_v24, 0.0  ;;  %v1277_v28 = vpack.c.bf16 %v1072_v25, %v1072_v25 }
 0x13f   : > { %v1054_v29 = vadd.f32 %v1053_v21, %v989_v26 }
 0x140   : > { %v1274_v30 = vpack.c.bf16 %v1069_v27, %v1069_v27  ;;  %1113 = vst.msk [vmem:[%s1760_s19 + $0x1c] sm:$0xf] %vm1105_vm1, %v1277_v28 }
 0x141   : > { %v1070_v10 = vmax.f32 %v1054_v29, 0.0 }
 0x142   : > { %1110 = vst.msk [vmem:[%s1760_s19 + $0x10] sm:$0xf] %vm1105_vm1, %v1274_v30 }
 0x143   : > { %v1275_v31 = vpack.c.bf16 %v1070_v10, %v1070_v10 }
 0x145   : > { %1111 = vst.msk [vmem:[%s1760_s19 + $0x14] sm:$0xf] %vm1105_vm1, %v1275_v31 }
 0x146 PF: > { %s13_s12 = sadd.s32 1, %s1540_s12  }
 0x147   : > { %p10_p4 = scmp.ge.s32.totalorder %s13_s12, 4  }
 0x149   :  { %12 = sbr.rel (!%p10_p4) target bundleno = 1 (0x1), region = 62 }

// kernel: _lambda_.7
= control target key start
LH: loop header
LB: loop body
LE: loop exit
PB: predicated region body
PF: predicated region fallthrough
CT: control target
= control target key end

     0   :  { %v5738_v1 = vmov 0   ;;  %vm1551_vm0 = vcmask 523264   ;;  %vm2303_vm1 = vcmask 130048   ;;  %vm3898_vm2 = vcmask 1040384   ;;  %s7647_s0 = inlined_call_operand.vmem [shape: bf16[2,1600,16], index: 0, kind: input, shape index: {}]   ;;  %s7648_s1 = inlined_call_operand.vmem [shape: bf16[128,1600], index: 1, kind: input, shape index: {}]   ;;  %s7649_s2 = inlined_call_operand.vmem [shape: f32[128,1], index: 2, kind: input, shape index: {}]   ;;  %s7650_s3 = inlined_call_operand.vmem [shape: f32[128,16], index: 3, kind: input, shape index: {}]   ;;  %s7651_s4 = inlined_call_operand.<no memory space> [shape: f32[1,1], index: 4, kind: input, shape index: {}]   ;;  %s7652_s5 = inlined_call_operand.vmem [shape: f32[2,1], index: 5, kind: output, shape index: {}]  }
   0x1   :  { %v5282_v0 = vld [vmem:[%s7647_s0 + $0x40] sm:$0xff]   ;;  %5280 = vset.pattern.permute.xlu0 %v5738_v1  ;;  %5281 = vset.pattern.permute.xlu1 %v5738_v1  ;;  %v5286_v5 = vld [vmem:[%s7647_s0 + $0x48] sm:$0xff]   ;;  %v5290_v9 = vld [vmem:[%s7647_s0 + $0x50] sm:$0xff]   ;;  %vm3908_vm3 = vcmask 1024  }
   0x2   :  { %v5283_v2 = vld [vmem:[%s7647_s0 + $0xc0] sm:$0xff]   ;;  %4435 = vmatprep.subr.bf16.mxu0 %v5282_v0  ;;  %v5287_v6 = vld [vmem:[%s7647_s0 + $0xc8] sm:$0xff]   ;;  %v5291_v10 = vld [vmem:[%s7647_s0 + $0xd0] sm:$0xff]  }
   0x3   :  { %v5284_v3 = vld [vmem:[%s7647_s0] sm:$0xff]   ;;  %4499 = vmatprep.subr.bf16.mxu1 %v5283_v2  ;;  %v5288_v7 = vld [vmem:[%s7647_s0 + $0x8] sm:$0xff]   ;;  %v5292_v11 = vld [vmem:[%s7647_s0 + $0x10] sm:$0xff]  }
   0x4   :  { %v5285_v4 = vld [vmem:[%s7647_s0 + $0x80] sm:$0xff]   ;;  %4436 = vmatpush3.bf16.msra.mxu0 %v5284_v3  ;;  %v5289_v8 = vld [vmem:[%s7647_s0 + $0x88] sm:$0xff]   ;;  %v5293_v12 = vld [vmem:[%s7647_s0 + $0x90] sm:$0xff]  }
   0x5   :  { %4500 = vmatpush3.bf16.msra.mxu1 %v5285_v4  ;;  %4437 = vmatprep.subr.bf16.mxu0 %v5286_v5  ;;  %v5294_v13 = vld [vmem:[%s7647_s0 + $0x58] sm:$0xff]   ;;  %v5298_v17 = vld [vmem:[%s7647_s0 + $0x60] sm:$0xff]   ;;  %v5302_v21 = vld [vmem:[%s7647_s0 + $0x68] sm:$0xff]  }
   0x6   :  { %4501 = vmatprep.subr.bf16.mxu1 %v5287_v6  ;;  %v5295_v14 = vld [vmem:[%s7647_s0 + $0xd8] sm:$0xff]   ;;  %v5299_v18 = vld [vmem:[%s7647_s0 + $0xe0] sm:$0xff]   ;;  %v5303_v22 = vld [vmem:[%s7647_s0 + $0xe8] sm:$0xff]  }
   0x7   :  { %v5296_v15 = vld [vmem:[%s7647_s0 + $0x18] sm:$0xff]   ;;  %v5300_v19 = vld [vmem:[%s7647_s0 + $0x20] sm:$0xff]   ;;  %v5304_v23 = vld [vmem:[%s7647_s0 + $0x28] sm:$0xff]  }
   0x8   :  { %4438 = vmatpush3.bf16.msra.mxu0 %v5288_v7  ;;  %v5297_v16 = vld [vmem:[%s7647_s0 + $0x98] sm:$0xff]   ;;  %v5301_v20 = vld [vmem:[%s7647_s0 + $0xa0] sm:$0xff]   ;;  %v5305_v24 = vld [vmem:[%s7647_s0 + $0xa8] sm:$0xff]  }
   0x9   :  { %4502 = vmatpush3.bf16.msra.mxu1 %v5289_v8  ;;  %4439 = vmatprep.subr.bf16.mxu0 %v5290_v9  ;;  %v5306_v25 = vld [vmem:[%s7647_s0 + $0x70] sm:$0xff]   ;;  %v5310_v29 = vld [vmem:[%s7647_s0 + $0x78] sm:$0xff]   ;;  %v5319_v36 = vld [vmem:[%s7648_s1 + $0xc] ss:$52 sps:$4 sm:$0xff]  }
   0xa   :  { %4503 = vmatprep.subr.bf16.mxu1 %v5291_v10  ;;  %v5307_v26 = vld [vmem:[%s7647_s0 + $0xf0] sm:$0xff]   ;;  %v5311_v30 = vld [vmem:[%s7647_s0 + $0xf8] sm:$0xff]   ;;  %v5320_v37 = vld [vmem:[%s7647_s0 + $0x140] sm:$0xff]   ;;  %1705 = vmatprep.mubr.bf16.mxu1 %v5319_v36 }
   0xb   :  { %v5308_v27 = vld [vmem:[%s7647_s0 + $0x30] sm:$0xff]   ;;  %v5312_v31 = vld [vmem:[%s7647_s0 + $0x38] sm:$0xff]   ;;  %v5321_v38 = vld [vmem:[%s7647_s0 + $0x1c0] sm:$0xff]  }
   0xc   :  { %4440 = vmatpush3.bf16.msra.mxu0 %v5292_v11  ;;  %v5309_v28 = vld [vmem:[%s7647_s0 + $0xb0] sm:$0xff]   ;;  %v5313_v32 = vld [vmem:[%s7647_s0 + $0xb8] sm:$0xff]   ;;  %v5322_v39 = vld [vmem:[%s7647_s0 + $0x100] sm:$0xff]  }
   0xd   :  { %4504 = vmatpush3.bf16.msra.mxu1 %v5293_v12  ;;  %4441 = vmatprep.subr.bf16.mxu0 %v5294_v13  ;;  %v5314_v33 = vld [vmem:[%s7648_s1] ss:$52 sps:$4 sm:$0xff]   ;;  %v5316_v34 = vld [vmem:[%s7648_s1 + $0x4] ss:$52 sps:$4 sm:$0xff]   ;;  %v5317_v35 = vld [vmem:[%s7648_s1 + $0x8] ss:$52 sps:$4 sm:$0xff]  }
   0xe   :  { %4505 = vmatprep.subr.bf16.mxu1 %v5295_v14  ;;  %1608 = vmatprep.mubr.bf16.mxu0 %v5316_v34  ;;  %v5323_v40 = vld [vmem:[%s7647_s0 + $0x180] sm:$0xff]   ;;  %v5326_v42 = vld [vmem:[%s7648_s1 + $0x74] ss:$52 sps:$4 sm:$0xff]   ;;  %v5336_v50 = vld [vmem:[%s7648_s1 + $0xdc] ss:$52 sps:$4 sm:$0xff]  }
   0xf   :  { %v5324_v41 = vld [vmem:[%s7648_s1 + $0x6c] ss:$52 sps:$4 sm:$0xff]   ;;  %v5328_v43 = vld [vmem:[%s7648_s1 + $0x68] ss:$52 sps:$4 sm:$0xff]   ;;  %v5329_v44 = vld [vmem:[%s7648_s1 + $0x70] ss:$52 sps:$4 sm:$0xff]  }
  0x10   :  { %4442 = vmatpush3.bf16.msra.mxu0 %v5296_v15  ;;  %v5330_v45 = vld [vmem:[%s7647_s0 + $0x148] sm:$0xff]   ;;  %v5338_v51 = vld [vmem:[%s7648_s1 + $0xd0] ss:$52 sps:$4 sm:$0xff]   ;;  %v5349_v60 = vld [vmem:[%s7648_s1 + $0x140] ss:$52 sps:$4 sm:$0xff]  }
  0x11   :  { %4506 = vmatpush3.bf16.msra.mxu1 %v5297_v16  ;;  %4443 = vmatprep.subr.bf16.mxu0 %v5298_v17  ;;  %v5331_v46 = vld [vmem:[%s7647_s0 + $0x1c8] sm:$0xff]   ;;  %v5340_v53 = vld [vmem:[%s7647_s0 + $0x150] sm:$0xff]   ;;  %v5346_v58 = vld [vmem:[%s7648_s1 + $0x144] ss:$52 sps:$4 sm:$0xff]  }
  0x12   :  { %4507 = vmatprep.subr.bf16.mxu1 %v5299_v18  ;;  %v5332_v47 = vld [vmem:[%s7647_s0 + $0x108] sm:$0xff]   ;;  %v5341_v54 = vld [vmem:[%s7647_s0 + $0x1d0] sm:$0xff]   ;;  %v5350_v61 = vld [vmem:[%s7647_s0 + $0x158] sm:$0xff]  }
  0x13   :  { %v5333_v48 = vld [vmem:[%s7647_s0 + $0x188] sm:$0xff]   ;;  %v5342_v55 = vld [vmem:[%s7647_s0 + $0x110] sm:$0xff]   ;;  %v5351_v62 = vld [vmem:[%s7647_s0 + $0x1d8] sm:$0xff]  }
  0x14   :  { %4444 = vmatpush3.bf16.msra.mxu0 %v5300_v19  ;;  %v5334_v49 = vld [vmem:[%s7648_s1 + $0xd4] ss:$52 sps:$4 sm:$0xff]   ;;  %v5339_v52 = vld [vmem:[%s7648_s1 + $0xd8] ss:$52 sps:$4 sm:$0xff]   ;;  %v5344_v57 = vld [vmem:[%s7648_s1 + $0x13c] ss:$52 sps:$4 sm:$0xff]  }
  0x15   :  { %4508 = vmatpush3.bf16.msra.mxu1 %v5301_v20  ;;  %4445 = vmatprep.subr.bf16.mxu0 %v5302_v21  ;;  %v5343_v56 = vld [vmem:[%s7647_s0 + $0x190] sm:$0xff]   ;;  %v5348_v59 = vld [vmem:[%s7648_s1 + $0x138] ss:$52 sps:$4 sm:$0xff]   ;;  %v5360_v4 = vld [vmem:[%s7647_s0 + $0x160] sm:$0xff]  }
  0x16   :  { %4509 = vmatprep.subr.bf16.mxu1 %v5303_v22  ;;  %v5352_v63 = vld [vmem:[%s7647_s0 + $0x118] sm:$0xff]   ;;  %v5356_v2 = vld [vmem:[%s7648_s1 + $0x1ac] ss:$52 sps:$4 sm:$0xff]   ;;  %v5366_v10 = vld [vmem:[%s7648_s1 + $0x214] ss:$52 sps:$4 sm:$0xff]  }
  0x17   :  { %v5353_v0 = vld [vmem:[%s7647_s0 + $0x198] sm:$0xff]   ;;  %v5358_v3 = vld [vmem:[%s7648_s1 + $0x1a0] ss:$52 sps:$4 sm:$0xff]   ;;  %v5370_v11 = vld [vmem:[%s7647_s0 + $0x168] sm:$0xff]  }
  0x18   :  { %4446 = vmatpush3.bf16.msra.mxu0 %v5304_v23  ;;  %v5354_v1 = vld [vmem:[%s7648_s1 + $0x1a4] ss:$52 sps:$4 sm:$0xff]   ;;  %v5359_v5 = vld [vmem:[%s7648_s1 + $0x1a8] ss:$52 sps:$4 sm:$0xff]   ;;  %v5364_v9 = vld [vmem:[%s7648_s1 + $0x20c] ss:$52 sps:$4 sm:$0xff]  }
  0x19   :  { %4510 = vmatpush3.bf16.msra.mxu1 %v5305_v24  ;;  %4447 = vmatprep.subr.bf16.mxu0 %v5306_v25  ;;  %v5361_v6 = vld [vmem:[%s7647_s0 + $0x1e0] sm:$0xff]   ;;  %v5371_v12 = vld [vmem:[%s7647_s0 + $0x1e8] sm:$0xff]   ;;  %v5376_v18 = vld [vmem:[%s7648_s1 + $0x27c] ss:$52 sps:$4 sm:$0xff]  }
  0x1a   :  { %4511 = vmatprep.subr.bf16.mxu1 %v5307_v26  ;;  %v5362_v7 = vld [vmem:[%s7647_s0 + $0x120] sm:$0xff]   ;;  %v5368_v13 = vld [vmem:[%s7648_s1 + $0x208] ss:$52 sps:$4 sm:$0xff]   ;;  %v5380_v19 = vld [vmem:[%s7647_s0 + $0x170] sm:$0xff]  }
  0x1b   :  { %v5363_v8 = vld [vmem:[%s7647_s0 + $0x1a0] sm:$0xff]   ;;  %v5372_v14 = vld [vmem:[%s7647_s0 + $0x128] sm:$0xff]   ;;  %v5381_v20 = vld [vmem:[%s7647_s0 + $0x1f0] sm:$0xff]  }
  0x1c   :  { %4448 = vmatpush3.bf16.msra.mxu0 %v5308_v27  ;;  %v5373_v15 = vld [vmem:[%s7647_s0 + $0x1a8] sm:$0xff]   ;;  %v5369_v16 = vld [vmem:[%s7648_s1 + $0x210] ss:$52 sps:$4 sm:$0xff]   ;;  %v5390_v27 = vld [vmem:[%s7647_s0 + $0x178] sm:$0xff]  }
  0x1d   :  { %4512 = vmatpush3.bf16.msra.mxu1 %v5309_v28  ;;  %4449 = vmatprep.subr.bf16.mxu0 %v5310_v29  ;;  %v5374_v17 = vld [vmem:[%s7648_s1 + $0x274] ss:$52 sps:$4 sm:$0xff]   ;;  %v5378_v23 = vld [vmem:[%s7648_s1 + $0x270] ss:$52 sps:$4 sm:$0xff]   ;;  %v5379_v24 = vld [vmem:[%s7648_s1 + $0x278] ss:$52 sps:$4 sm:$0xff]  }
  0x1e   :  { %4513 = vmatprep.subr.bf16.mxu1 %v5311_v30  ;;  %v5382_v21 = vld [vmem:[%s7647_s0 + $0x130] sm:$0xff]   ;;  %v5386_v26 = vld [vmem:[%s7648_s1 + $0x2e4] ss:$52 sps:$4 sm:$0xff]  }
  0x1f   :  { %v5383_v22 = vld [vmem:[%s7647_s0 + $0x1b0] sm:$0xff]   ;;  %v5391_v28 = vld [vmem:[%s7647_s0 + $0x1f8] sm:$0xff]   ;;  %v5400_v34 = vld [vmem:[%s7647_s0 + $0x240] sm:$0xff]  }
  0x20   :  { %4450 = vmatpush3.bf16.msra.mxu0 %v5312_v31  ;;  %v5384_v25 = vld [vmem:[%s7648_s1 + $0x2dc] ss:$52 sps:$4 sm:$0xff]   ;;  %v5388_v31 = vld [vmem:[%s7648_s1 + $0x2d8] ss:$52 sps:$4 sm:$0xff]  }
  0x21   :  { %4514 = vmatpush3.bf16.msra.mxu1 %v5313_v32  ;;  %4563 = vmatprep.subr.bf16.mxu0 %v5320_v37  ;;  %v5392_v29 = vld [vmem:[%s7647_s0 + $0x138] sm:$0xff]   ;;  %v5389_v32 = vld [vmem:[%s7648_s1 + $0x2e0] ss:$52 sps:$4 sm:$0xff]   ;;  %v5394_v37 = vld [vmem:[%s7648_s1 + $0x10] ss:$52 sps:$4 sm:$0xff]  }
  0x22   :  { %4627 = vmatprep.subr.bf16.mxu1 %v5321_v38  ;;  %v5393_v30 = vld [vmem:[%s7647_s0 + $0x1b8] sm:$0xff]  }
  0x23   :  { %1609 = vmatmul.mubr.bf16.vlgmr.msra.gmra.mrb[0].mxu0 %v5314_v33  ;;  %v5396_v33 = vld [vmem:[%s7648_s1 + $0x14] ss:$52 sps:$4 sm:$0xff]   ;;  %v5399_v36 = vld [vmem:[%s7648_s1 + $0x1c] ss:$52 sps:$4 sm:$0xff]   ;;  %v5397_v38 = vld [vmem:[%s7648_s1 + $0x18] ss:$52 sps:$4 sm:$0xff]  }
  0x24   :  { %1706 = vmatmul.mubr.bf16.vlgmr.msra.gmra.mrb[0].mxu1 %v5317_v35  ;;  %4564 = vmatpush3.bf16.msra.mxu0 %v5322_v39  ;;  %v5401_v35 = vld [vmem:[%s7647_s0 + $0x2c0] sm:$0xff]  }
  0x25   :  { %4628 = vmatpush3.bf16.msra.mxu1 %v5323_v40  ;;  %1616 = vmatprep.mubr.bf16.mxu0 %v5324_v41  ;;  %v5402_v39 = vld [vmem:[%s7647_s0 + $0x200] sm:$0xff]   ;;  %v5404_v41 = vld [vmem:[%s7648_s1 + $0x7c] ss:$52 sps:$4 sm:$0xff]  }
  0x26   :  { %1713 = vmatprep.mubr.bf16.mxu1 %v5326_v42  ;;  %4565 = vmatprep.subr.bf16.mxu0 %v5330_v45  ;;  %v5403_v40 = vld [vmem:[%s7647_s0 + $0x280] sm:$0xff]   ;;  %v5412_v45 = vld [vmem:[%s7647_s0 + $0x208] sm:$0xff]  }
  0x27   :  { %4629 = vmatprep.subr.bf16.mxu1 %v5331_v46  ;;  %v5406_v42 = vld [vmem:[%s7648_s1 + $0x84] ss:$52 sps:$4 sm:$0xff]   ;;  %v5413_v46 = vld [vmem:[%s7647_s0 + $0x288] sm:$0xff]  }
  0x28   :  { %4566 = vmatpush3.bf16.msra.mxu0 %v5332_v47  ;;  %v5408_v47 = vld [vmem:[%s7648_s1 + $0x78] ss:$52 sps:$4 sm:$0xff]  }
  0x29   :  { %4630 = vmatpush3.bf16.msra.mxu1 %v5333_v48  ;;  %4567 = vmatprep.subr.bf16.mxu0 %v5340_v53  ;;  %v5420_v48 = vld [vmem:[%s7647_s0 + $0x250] sm:$0xff]   ;;  %v335_v53 = vld [vmem:[%s7649_s2] sm:$0xff] }
  0x2a   :  { %4631 = vmatprep.subr.bf16.mxu1 %v5341_v54  ;;  %v5422_v54 = vld [vmem:[%s7647_s0 + $0x210] sm:$0xff]   ;;  %353 = vperm.xlu0 %5280, %v335_v53  }
  0x2b   :  { %1617 = vmatmul.mubr.bf16.gmra.mrb[4].mxu0 %v5328_v43  ;;  %v5410_v43 = vld [vmem:[%s7647_s0 + $0x248] sm:$0xff]   ;;  %v5474_v53 = vld [vmem:[%s7648_s1 + $0x20] ss:$52 sps:$4 sm:$0xff]  }
  0x2c   :  { %1714 = vmatmul.mubr.bf16.gmra.mrb[4].mxu1 %v5329_v44  ;;  %1624 = vmatprep.mubr.bf16.mxu0 %v5334_v49  ;;  %v5411_v44 = vld [vmem:[%s7647_s0 + $0x2c8] sm:$0xff]   ;;  %v5409_v49 = vld [vmem:[%s7648_s1 + $0x80] ss:$52 sps:$4 sm:$0xff]  }
  0x2d   :  { %1721 = vmatprep.mubr.bf16.mxu1 %v5336_v50  ;;  %4568 = vmatpush3.bf16.msra.mxu0 %v5342_v55  ;;  %v5421_v50 = vld [vmem:[%s7647_s0 + $0x2d0] sm:$0xff]  }
  0x2e   :  { %4632 = vmatpush3.bf16.msra.mxu1 %v5343_v56  ;;  %4569 = vmatprep.subr.bf16.mxu0 %v5350_v61  ;;  %v5423_v55 = vld [vmem:[%s7647_s0 + $0x290] sm:$0xff]   ;;  %v5430_v56 = vld [vmem:[%s7647_s0 + $0x258] sm:$0xff]  }
  0x2f   :  { %4633 = vmatprep.subr.bf16.mxu1 %v5351_v62  ;;  %v5432_v61 = vld [vmem:[%s7647_s0 + $0x218] sm:$0xff]  }
  0x30   :  { %v5433_v62 = vld [vmem:[%s7647_s0 + $0x298] sm:$0xff]  }
  0x31   :  { %4570 = vmatpush3.bf16.msra.mxu0 %v5352_v63  ;;  %v337_v63 = vld [vmem:[%s7649_s2 + $0x10] sm:$0xff] }
  0x32   :  { %4634 = vmatpush3.bf16.msra.mxu1 %v5353_v0  ;;  %4571 = vmatprep.subr.bf16.mxu0 %v5360_v4  ;;  %v5424_v0 = vld [vmem:[%s7648_s1 + $0x14c] ss:$52 sps:$4 sm:$0xff]   ;;  %v338_v4 = vld [vmem:[%s7649_s2 + $0x18] sm:$0xff] }
  0x33   :  { %1625 = vmatmul.mubr.bf16.gmra.mrb[8].mxu0 %v5338_v51  ;;  %4635 = vmatprep.subr.bf16.mxu1 %v5361_v6  ;;  %v5414_v51 = vld [vmem:[%s7648_s1 + $0xe4] ss:$52 sps:$4 sm:$0xff]  }
  0x34   :  { %1722 = vmatmul.mubr.bf16.gmra.mrb[8].mxu1 %v5339_v52  ;;  %1632 = vmatprep.mubr.bf16.mxu0 %v5344_v57  ;;  %v5416_v52 = vld [vmem:[%s7648_s1 + $0xec] ss:$52 sps:$4 sm:$0xff]  }
  0x35   :  { %1729 = vmatprep.mubr.bf16.mxu1 %v5346_v58  ;;  %4572 = vmatpush3.bf16.msra.mxu0 %v5362_v7  ;;  %v5418_v57 = vld [vmem:[%s7648_s1 + $0xe0] ss:$52 sps:$4 sm:$0xff]   ;;  %v5431_v58 = vld [vmem:[%s7647_s0 + $0x2d8] sm:$0xff]   ;;  %v5429_v7 = vld [vmem:[%s7648_s1 + $0x150] ss:$52 sps:$4 sm:$0xff]  }
  0x36   :  { %4636 = vmatpush3.bf16.msra.mxu1 %v5363_v8  ;;  %4573 = vmatprep.subr.bf16.mxu0 %v5370_v11  ;;  %v5442_v6 = vld [vmem:[%s7647_s0 + $0x220] sm:$0xff]   ;;  %v5436_v11 = vld [vmem:[%s7648_s1 + $0x1bc] ss:$52 sps:$4 sm:$0xff]  }
  0x37   :  { %4637 = vmatprep.subr.bf16.mxu1 %v5371_v12  ;;  %363 = vperm.xlu1 %5281, %v337_v63   ;;  %v5443_v8 = vld [vmem:[%s7647_s0 + $0x2a0] sm:$0xff]   ;;  %v5450_v12 = vld [vmem:[%s7647_s0 + $0x268] sm:$0xff]  }
  0x38   :  { %v5491_v63 = vld [vmem:[%s7648_s1 + $0xf4] ss:$52 sps:$4 sm:$0xff]  }
  0x39   :  { %4574 = vmatpush3.bf16.msra.mxu0 %v5372_v14  ;;  %v340_v14 = vld [vmem:[%s7649_s2 + $0x28] sm:$0xff] }
  0x3a   :  { %4638 = vmatpush3.bf16.msra.mxu1 %v5373_v15  ;;  %4575 = vmatprep.subr.bf16.mxu0 %v5380_v19  ;;  %v5452_v15 = vld [vmem:[%s7647_s0 + $0x228] sm:$0xff]  }
  0x3b   :  { %1633 = vmatmul.mubr.bf16.gmra.mrb[12].mxu0 %v5348_v59  ;;  %4639 = vmatprep.subr.bf16.mxu1 %v5381_v20  ;;  %v336_v59 = vld [vmem:[%s7649_s2 + $0x8] sm:$0xff]  ;;  %v5444_v20 = vld [vmem:[%s7648_s1 + $0x21c] ss:$52 sps:$4 sm:$0xff]  }
  0x3c   :  { %1730 = vmatmul.mubr.bf16.gmra.mrb[12].mxu1 %v5349_v60  ;;  %1640 = vmatprep.mubr.bf16.mxu0 %v5354_v1  ;;  %v5419_v60 = vld [vmem:[%s7648_s1 + $0xe8] ss:$52 sps:$4 sm:$0xff]   ;;  %v5439_v19 = vld [vmem:[%s7648_s1 + $0x1b8] ss:$52 sps:$4 sm:$0xff]  }
  0x3d   :  { %1737 = vmatprep.mubr.bf16.mxu1 %v5356_v2  ;;  %4576 = vmatpush3.bf16.msra.mxu0 %v5382_v21  ;;  %v5426_v1 = vld [vmem:[%s7648_s1 + $0x154] ss:$52 sps:$4 sm:$0xff]   ;;  %v5440_v2 = vld [vmem:[%s7647_s0 + $0x260] sm:$0xff]  }
  0x3e   :  { %4640 = vmatpush3.bf16.msra.mxu1 %v5383_v22  ;;  %4577 = vmatprep.subr.bf16.mxu0 %v5390_v27  ;;  %v5446_v21 = vld [vmem:[%s7648_s1 + $0x224] ss:$52 sps:$4 sm:$0xff]   ;;  %v5460_v22 = vld [vmem:[%s7647_s0 + $0x270] sm:$0xff]  }
  0x3f   :  { %4641 = vmatprep.subr.bf16.mxu1 %v5391_v28  ;;  %358 = vperm.xlu0 %5280, %v336_v59   ;;  %v343_v27 = vld [vmem:[%s7649_s2 + $0x40] sm:$0xff]  ;;  %v5448_v28 = vld [vmem:[%s7648_s1 + $0x218] ss:$52 sps:$4 sm:$0xff]  }
  0x40   :  { %368 = vperm.xlu1 %5281, %v338_v4   ;;  %v5497_v59 = vld [vmem:[%s7647_s0 + $0x308] sm:$0xff]   ;;  %v5506_v4 = vld [vmem:[%s7647_s0 + $0x378] sm:$0xff]  }
  0x41   :  { %4578 = vmatpush3.bf16.msra.mxu0 %v5392_v29  ;;  %v5449_v29 = vld [vmem:[%s7648_s1 + $0x220] ss:$52 sps:$4 sm:$0xff]  }
  0x42   :  { %4642 = vmatpush3.bf16.msra.mxu1 %v5393_v30  ;;  %4691 = vmatprep.subr.bf16.mxu0 %v5400_v34  ;;  %v5454_v30 = vld [vmem:[%s7648_s1 + $0x284] ss:$52 sps:$4 sm:$0xff]   ;;  %v344_v34 = vld [vmem:[%s7649_s2 + $0x48] sm:$0xff] }
  0x43   :  { %1641 = vmatmul.mubr.bf16.gmra.mrb[16].mxu0 %v5358_v3  ;;  %4755 = vmatprep.subr.bf16.mxu1 %v5401_v35  ;;  %v5441_v3 = vld [vmem:[%s7647_s0 + $0x2e0] sm:$0xff]   ;;  %v5472_v35 = vld [vmem:[%s7647_s0 + $0x238] sm:$0xff]  }
  0x44   :  { %1738 = vmatmul.mubr.bf16.gmra.mrb[16].mxu1 %v5359_v5  ;;  %1648 = vmatprep.mubr.bf16.mxu0 %v5364_v9  ;;  %v5428_v5 = vld [vmem:[%s7648_s1 + $0x148] ss:$52 sps:$4 sm:$0xff]   ;;  %v339_v9 = vld [vmem:[%s7649_s2 + $0x20] sm:$0xff] }
  0x45   :  { %1745 = vmatprep.mubr.bf16.mxu1 %v5366_v10  ;;  %v5434_v10 = vld [vmem:[%s7648_s1 + $0x1b4] ss:$52 sps:$4 sm:$0xff]   ;;  %373 = vperm.xlu0 %5280, %v339_v9   ;;  %v5500_v9 = vld [vmem:[%s7648_s1 + $0x15c] ss:$52 sps:$4 sm:$0xff]  }
  0x46   :  { %378 = vperm.xlu1 %5281, %v340_v14   ;;  %v5504_v14 = vld [vmem:[%s7648_s1 + $0x158] ss:$52 sps:$4 sm:$0xff]  }
  0x4b   :  { %1649 = vmatmul.mubr.bf16.gmra.mrb[20].mxu0 %v5368_v13  ;;  %v5451_v13 = vld [vmem:[%s7647_s0 + $0x2e8] sm:$0xff]  }
  0x4c   :  { %1746 = vmatmul.mubr.bf16.gmra.mrb[20].mxu1 %v5369_v16  ;;  %1656 = vmatprep.mubr.bf16.mxu0 %v5374_v17  ;;  %v5453_v16 = vld [vmem:[%s7647_s0 + $0x2a8] sm:$0xff]   ;;  %v341_v17 = vld [vmem:[%s7649_s2 + $0x30] sm:$0xff] }
  0x4d   :  { %1753 = vmatprep.mubr.bf16.mxu1 %v5376_v18  ;;  %v5438_v18 = vld [vmem:[%s7648_s1 + $0x1b0] ss:$52 sps:$4 sm:$0xff]   ;;  %383 = vperm.xlu0 %5280, %v341_v17  }
  0x4e   :  { %v5532_v17 = vld [vmem:[%s7647_s0 + $0x390] sm:$0xff]  }
  0x51   :  { %393 = vperm.xlu0 %5280, %v343_v27   ;;  %v5517_v27 = vld [vmem:[%s7648_s1 + $0x22c] ss:$52 sps:$4 sm:$0xff]  }
  0x53   :  { %1657 = vmatmul.mubr.bf16.gmra.mrb[24].mxu0 %v5378_v23  ;;  %v5461_v23 = vld [vmem:[%s7647_s0 + $0x2f0] sm:$0xff]  }
  0x54   :  { %1754 = vmatmul.mubr.bf16.gmra.mrb[24].mxu1 %v5379_v24  ;;  %1664 = vmatprep.mubr.bf16.mxu0 %v5384_v25  ;;  %v342_v24 = vld [vmem:[%s7649_s2 + $0x38] sm:$0xff]  ;;  %v5462_v25 = vld [vmem:[%s7647_s0 + $0x230] sm:$0xff]  }
  0x55   :  { %1761 = vmatprep.mubr.bf16.mxu1 %v5386_v26  ;;  %v5463_v26 = vld [vmem:[%s7647_s0 + $0x2b0] sm:$0xff]   ;;  %388 = vperm.xlu1 %5281, %v342_v24   ;;  %v5541_v24 = vld [vmem:[%s7647_s0 + $0x358] sm:$0xff]  }
  0x59   :  { %398 = vperm.xlu1 %5281, %v344_v34   ;;  %v5530_v34 = vld [vmem:[%s7648_s1 + $0x298] ss:$52 sps:$4 sm:$0xff]  }
  0x5b   :  { %1665 = vmatmul.mubr.bf16.gmra.mrb[28].mxu0 %v5388_v31  ;;  %v5456_v31 = vld [vmem:[%s7648_s1 + $0x28c] ss:$52 sps:$4 sm:$0xff]  }
  0x5c   :  { %1762 = vmatmul.mubr.bf16.gmra.mrb[28].mxu1 %v5389_v32  ;;  %1802 = vmatprep.mubr.bf16.mxu0 %v5396_v33  ;;  %v5470_v32 = vld [vmem:[%s7647_s0 + $0x278] sm:$0xff]  }
  0x5d   :  { %1899 = vmatprep.mubr.bf16.mxu1 %v5399_v36  ;;  %v5471_v33 = vld [vmem:[%s7647_s0 + $0x2f8] sm:$0xff]  }
  0x5e   :  { %v5473_v36 = vld [vmem:[%s7647_s0 + $0x2b8] sm:$0xff]  }
  0x63   :  { %1803 = vmatmul.mubr.bf16.vlgmr.msra.gmra.mrb[32].mxu0 %v5394_v37  ;;  %v345_v37 = vld [vmem:[%s7649_s2 + $0x50] sm:$0xff] }
  0x64   :  { %1900 = vmatmul.mubr.bf16.vlgmr.msra.gmra.mrb[32].mxu1 %v5397_v38  ;;  %4692 = vmatpush3.bf16.msra.mxu0 %v5402_v39  ;;  %v5458_v38 = vld [vmem:[%s7648_s1 + $0x280] ss:$52 sps:$4 sm:$0xff]   ;;  %v5459_v39 = vld [vmem:[%s7648_s1 + $0x288] ss:$52 sps:$4 sm:$0xff]  }
  0x65   :  { %4756 = vmatpush3.bf16.msra.mxu1 %v5403_v40  ;;  %1810 = vmatprep.mubr.bf16.mxu0 %v5404_v41  ;;  %v5464_v40 = vld [vmem:[%s7648_s1 + $0x2ec] ss:$52 sps:$4 sm:$0xff]   ;;  %v5466_v41 = vld [vmem:[%s7648_s1 + $0x2f4] ss:$52 sps:$4 sm:$0xff]  }
  0x66   :  { %1907 = vmatprep.mubr.bf16.mxu1 %v5406_v42  ;;  %4693 = vmatprep.subr.bf16.mxu0 %v5410_v43  ;;  %v5480_v42 = vld [vmem:[%s7647_s0 + $0x300] sm:$0xff]  }
  0x67   :  { %4757 = vmatprep.subr.bf16.mxu1 %v5411_v44  ;;  %403 = vperm.xlu0 %5280, %v345_v37   ;;  %v5481_v43 = vld [vmem:[%s7647_s0 + $0x360] sm:$0xff]   ;;  %v346_v44 = vld [vmem:[%s7649_s2 + $0x58] sm:$0xff] }
  0x68   :  { %4694 = vmatpush3.bf16.msra.mxu0 %v5412_v45  ;;  %v347_v45 = vld [vmem:[%s7649_s2 + $0x60] sm:$0xff]  ;;  %408 = vperm.xlu1 %5281, %v346_v44   ;;  %v5538_v37 = vld [vmem:[%s7648_s1 + $0x2f8] ss:$52 sps:$4 sm:$0xff]  }
  0x69   :  { %4758 = vmatpush3.bf16.msra.mxu1 %v5413_v46  ;;  %4695 = vmatprep.subr.bf16.mxu0 %v5420_v48  ;;  %v5468_v46 = vld [vmem:[%s7648_s1 + $0x2e8] ss:$52 sps:$4 sm:$0xff]  }
  0x6a   :  { %4759 = vmatprep.subr.bf16.mxu1 %v5421_v50  ;;  %v348_v48 = vld [vmem:[%s7649_s2 + $0x68] sm:$0xff]  ;;  %v349_v50 = vld [vmem:[%s7649_s2 + $0x70] sm:$0xff] }
  0x6b   :  { %1811 = vmatmul.mubr.bf16.gmra.mrb[36].mxu0 %v5408_v47  ;;  %413 = vperm.xlu0 %5280, %v347_v45   ;;  %v5469_v47 = vld [vmem:[%s7648_s1 + $0x2f0] ss:$52 sps:$4 sm:$0xff]   ;;  %v5548_v44 = vld [vmem:[%s7647_s0 + $0x3e8] sm:$0xff]  }
  0x6c   :  { %1908 = vmatmul.mubr.bf16.gmra.mrb[36].mxu1 %v5409_v49  ;;  %1818 = vmatprep.mubr.bf16.mxu0 %v5414_v51  ;;  %v5476_v49 = vld [vmem:[%s7648_s1 + $0x24] ss:$52 sps:$4 sm:$0xff]   ;;  %v5479_v51 = vld [vmem:[%s7648_s1 + $0x2c] ss:$52 sps:$4 sm:$0xff]  }
  0x6d   :  { %1915 = vmatprep.mubr.bf16.mxu1 %v5416_v52  ;;  %4696 = vmatpush3.bf16.msra.mxu0 %v5422_v54  ;;  %v350_v52 = vld [vmem:[%s7649_s2 + $0x78] sm:$0xff]  ;;  %v5549_v45 = vld [vmem:[%s7647_s0 + $0x3a8] sm:$0xff]  }
  0x6e   :  { %4760 = vmatpush3.bf16.msra.mxu1 %v5423_v55  ;;  %4697 = vmatprep.subr.bf16.mxu0 %v5430_v56  ;;  %v5477_v54 = vld [vmem:[%s7648_s1 + $0x28] ss:$52 sps:$4 sm:$0xff]   ;;  %v5482_v55 = vld [vmem:[%s7647_s0 + $0x320] sm:$0xff]  }
  0x6f   :  { %4761 = vmatprep.subr.bf16.mxu1 %v5431_v58  ;;  %418 = vperm.xlu1 %5281, %v348_v48   ;;  %v5483_v56 = vld [vmem:[%s7648_s1 + $0x8c] ss:$52 sps:$4 sm:$0xff]  }
  0x70   :  { %423 = vperm.xlu0 %5280, %v349_v50   ;;  %v5489_v58 = vld [vmem:[%s7647_s0 + $0x368] sm:$0xff]   ;;  %v5635_v48 = vld [vmem:[%s7648_s1] ss:$52 sps:$4 sm:$0xff]  }
  0x71   :  { %4698 = vmatpush3.bf16.msra.mxu0 %v5432_v61  ;;  %v5490_v61 = vld [vmem:[%s7647_s0 + $0x328] sm:$0xff]  }
  0x72   :  { %4762 = vmatpush3.bf16.msra.mxu1 %v5433_v62  ;;  %4699 = vmatprep.subr.bf16.mxu0 %v5440_v2  ;;  %v5488_v62 = vld [vmem:[%s7648_s1 + $0x90] ss:$52 sps:$4 sm:$0xff]   ;;  %v5551_v50 = vld [vmem:[%s7648_s1 + $0x168] ss:$52 sps:$4 sm:$0xff]  }
  0x73   :  { %1819 = vmatmul.mubr.bf16.gmra.mrb[40].mxu0 %v5418_v57  ;;  %4763 = vmatprep.subr.bf16.mxu1 %v5441_v3  ;;  %v5485_v57 = vld [vmem:[%s7648_s1 + $0x94] ss:$52 sps:$4 sm:$0xff]   ;;  %v5493_v2 = vld [vmem:[%s7648_s1 + $0xfc] ss:$52 sps:$4 sm:$0xff]  }
  0x74   :  { %1916 = vmatmul.mubr.bf16.gmra.mrb[40].mxu1 %v5419_v60  ;;  %1826 = vmatprep.mubr.bf16.mxu0 %v5424_v0  ;;  %v5487_v60 = vld [vmem:[%s7648_s1 + $0x88] ss:$52 sps:$4 sm:$0xff]   ;;  %v5498_v0 = vld [vmem:[%s7647_s0 + $0x370] sm:$0xff]  }
  0x75   :  { %1923 = vmatprep.mubr.bf16.mxu1 %v5426_v1  ;;  %4700 = vmatpush3.bf16.msra.mxu0 %v5442_v6  ;;  %v5514_v1 = vld [vmem:[%s7647_s0 + $0x310] sm:$0xff]   ;;  %v5507_v6 = vld [vmem:[%s7647_s0 + $0x338] sm:$0xff]  }
  0x76   :  { %4764 = vmatpush3.bf16.msra.mxu1 %v5443_v8  ;;  %4701 = vmatprep.subr.bf16.mxu0 %v5450_v12  ;;  %v5499_v3 = vld [vmem:[%s7647_s0 + $0x330] sm:$0xff]   ;;  %v5515_v8 = vld [vmem:[%s7647_s0 + $0x380] sm:$0xff]   ;;  %v5531_v12 = vld [vmem:[%s7647_s0 + $0x318] sm:$0xff]  }
  0x77   :  { %4765 = vmatprep.subr.bf16.mxu1 %v5451_v13  ;;  %428 = vperm.xlu1 %5281, %v350_v52   ;;  %v5523_v13 = vld [vmem:[%s7647_s0 + $0x388] sm:$0xff]  }
  0x78   :  { %v5636_v52 = vld [vmem:[%s7648_s1 + $0x6c] ss:$52 sps:$4 sm:$0xff]  }
  0x79   :  { %4702 = vmatpush3.bf16.msra.mxu0 %v5452_v15  ;;  %v5524_v15 = vld [vmem:[%s7647_s0 + $0x348] sm:$0xff]  }
  0x7a   :  { %4766 = vmatpush3.bf16.msra.mxu1 %v5453_v16  ;;  %4703 = vmatprep.subr.bf16.mxu0 %v5460_v22  ;;  %v5505_v16 = vld [vmem:[%s7648_s1 + $0x160] ss:$52 sps:$4 sm:$0xff]  }
  0x7b   :  { %1827 = vmatmul.mubr.bf16.gmra.mrb[44].mxu0 %v5428_v5  ;;  %4767 = vmatprep.subr.bf16.mxu1 %v5461_v23  ;;  %v5495_v5 = vld [vmem:[%s7648_s1 + $0xf0] ss:$52 sps:$4 sm:$0xff]   ;;  %v5512_v23 = vld [vmem:[%s7648_s1 + $0x1c0] ss:$52 sps:$4 sm:$0xff]  }
  0x7c   :  { %1924 = vmatmul.mubr.bf16.gmra.mrb[44].mxu1 %v5429_v7  ;;  %1834 = vmatprep.mubr.bf16.mxu0 %v5434_v10  ;;  %v5496_v7 = vld [vmem:[%s7648_s1 + $0xf8] ss:$52 sps:$4 sm:$0xff]   ;;  %v5544_v22 = vld [vmem:[%s7647_s0 + $0x3e0] sm:$0xff]  }
  0x7d   :  { %1931 = vmatprep.mubr.bf16.mxu1 %v5436_v11  ;;  %4704 = vmatpush3.bf16.msra.mxu0 %v5462_v25  ;;  %v5502_v10 = vld [vmem:[%s7648_s1 + $0x164] ss:$52 sps:$4 sm:$0xff]  }
  0x7e   :  { %4768 = vmatpush3.bf16.msra.mxu1 %v5463_v26  ;;  %4705 = vmatprep.subr.bf16.mxu0 %v5470_v32  ;;  %v5516_v11 = vld [vmem:[%s7647_s0 + $0x340] sm:$0xff]   ;;  %v5513_v26 = vld [vmem:[%s7648_s1 + $0x1c8] ss:$52 sps:$4 sm:$0xff]  }
  0x7f   :  { %4769 = vmatprep.subr.bf16.mxu1 %v5471_v33  ;;  %v5545_v25 = vld [vmem:[%s7647_s0 + $0x460] sm:$0xff]   ;;  %v5527_v32 = vld [vmem:[%s7648_s1 + $0x29c] ss:$52 sps:$4 sm:$0xff]  }
  0x80   :  { %v5529_v33 = vld [vmem:[%s7648_s1 + $0x290] ss:$52 sps:$4 sm:$0xff]  }
  0x81   :  { %4706 = vmatpush3.bf16.msra.mxu0 %v5472_v35  ;;  %v5534_v35 = vld [vmem:[%s7648_s1 + $0x2fc] ss:$52 sps:$4 sm:$0xff]  }
  0x82   :  { %4770 = vmatpush3.bf16.msra.mxu1 %v5473_v36  ;;  %5227 = vmatprep.subr.bf16.mxu0 %v5480_v42  ;;  %v5536_v36 = vld [vmem:[%s7648_s1 + $0x304] ss:$52 sps:$4 sm:$0xff]  }
  0x83   :  { %1835 = vmatmul.mubr.bf16.gmra.mrb[48].mxu0 %v5438_v18  ;;  %4831 = vmatprep.subr.bf16.mxu1 %v5481_v43  ;;  %v5508_v18 = vld [vmem:[%s7648_s1 + $0x1c4] ss:$52 sps:$4 sm:$0xff]  }
  0x84   :  { %1932 = vmatmul.mubr.bf16.gmra.mrb[48].mxu1 %v5439_v19  ;;  %1842 = vmatprep.mubr.bf16.mxu0 %v5444_v20  ;;  %v5510_v19 = vld [vmem:[%s7648_s1 + $0x1cc] ss:$52 sps:$4 sm:$0xff]   ;;  %v5533_v20 = vld [vmem:[%s7647_s0 + $0x350] sm:$0xff]  }
  0x85   :  { %1939 = vmatprep.mubr.bf16.mxu1 %v5446_v21  ;;  %v5540_v21 = vld [vmem:[%s7647_s0 + $0x398] sm:$0xff]   ;;  %v5547_v43 = vld [vmem:[%s7647_s0 + $0x420] sm:$0xff]  }
  0x8b   :  { %1843 = vmatmul.mubr.bf16.gmra.mrb[52].mxu0 %v5448_v28  ;;  %v5519_v28 = vld [vmem:[%s7648_s1 + $0x234] ss:$52 sps:$4 sm:$0xff]  }
  0x8c   :  { %1940 = vmatmul.mubr.bf16.gmra.mrb[52].mxu1 %v5449_v29  ;;  %1850 = vmatprep.mubr.bf16.mxu0 %v5454_v30  ;;  %v5521_v29 = vld [vmem:[%s7648_s1 + $0x228] ss:$52 sps:$4 sm:$0xff]   ;;  %v5522_v30 = vld [vmem:[%s7648_s1 + $0x230] ss:$52 sps:$4 sm:$0xff]  }
  0x8d   :  { %1947 = vmatprep.mubr.bf16.mxu1 %v5456_v31  ;;  %v5525_v31 = vld [vmem:[%s7648_s1 + $0x294] ss:$52 sps:$4 sm:$0xff]  }
  0x93   :  { %1851 = vmatmul.mubr.bf16.gmra.mrb[56].mxu0 %v5458_v38  ;;  %v5539_v38 = vld [vmem:[%s7648_s1 + $0x300] ss:$52 sps:$4 sm:$0xff]  }
  0x94   :  { %1948 = vmatmul.mubr.bf16.gmra.mrb[56].mxu1 %v5459_v39  ;;  %1858 = vmatprep.mubr.bf16.mxu0 %v5464_v40  ;;  %v5542_v39 = vld [vmem:[%s7648_s1 + $0x30] ss:$52 sps:$4 sm:$0xff]  }
  0x95   :  { %1955 = vmatprep.mubr.bf16.mxu1 %v5466_v41  ;;  %v5634_v40 = vld [vmem:[%s7648_s1 + $0x4] ss:$52 sps:$4 sm:$0xff]  }
  0x96   :  { %v5543_v41 = vld [vmem:[%s7648_s1 + $0x98] ss:$52 sps:$4 sm:$0xff]  }
  0x9b   :  { %1859 = vmatmul.mubr.bf16.gmra.mrb[60].mxu0 %v5468_v46  ;;  %v5550_v46 = vld [vmem:[%s7648_s1 + $0x100] ss:$52 sps:$4 sm:$0xff]  }
  0x9c   :  { %1956 = vmatmul.mubr.bf16.gmra.mrb[60].mxu1 %v5469_v47  ;;  %1996 = vmatprep.mubr.bf16.mxu0 %v5476_v49  ;;  %v5553_v47 = vld [vmem:[%s7647_s0 + $0x468] sm:$0xff]   ;;  %v5552_v49 = vld [vmem:[%s7647_s0 + $0x3f0] sm:$0xff]  }
  0x9d   :  { %2093 = vmatprep.mubr.bf16.mxu1 %v5479_v51  ;;  %v5555_v51 = vld [vmem:[%s7647_s0 + $0x428] sm:$0xff]  }
  0xa3   :  { %1997 = vmatmul.mubr.bf16.vlgmr.msra.gmra.mrb[64].mxu0 %v5474_v53  ;;  %v5561_v53 = vld [vmem:[%s7647_s0 + $0x470] sm:$0xff]  }
  0xa4   :  { %2094 = vmatmul.mubr.bf16.vlgmr.msra.gmra.mrb[64].mxu1 %v5477_v54  ;;  %5228 = vmatpush3.bf16.msra.mxu0 %v5480_v42  ;;  %v5546_v42 = vld [vmem:[%s7647_s0 + $0x3a0] sm:$0xff]   ;;  %v5554_v54 = vld [vmem:[%s7647_s0 + $0x3b0] sm:$0xff]  }
  0xa5   :  { %4832 = vmatpush3.bf16.msra.mxu1 %v5482_v55  ;;  %2004 = vmatprep.mubr.bf16.mxu0 %v5483_v56  ;;  %v5556_v55 = vld [vmem:[%s7647_s0 + $0x3f8] sm:$0xff]   ;;  %v5558_v56 = vld [vmem:[%s7648_s1 + $0x1d0] ss:$52 sps:$4 sm:$0xff]  }
  0xa6   :  { %2101 = vmatprep.mubr.bf16.mxu1 %v5485_v57  ;;  %4833 = vmatprep.subr.bf16.mxu1 %v5489_v58  ;;  %v5563_v57 = vld [vmem:[%s7647_s0 + $0x430] sm:$0xff]   ;;  %v5569_v58 = vld [vmem:[%s7647_s0 + $0x478] sm:$0xff]  }
  0xa7   :  { %5229 = vmatprep.subr.bf16.mxu0 %v5497_v59 }
  0xa8   :  { %5230 = vmatpush3.bf16.msra.mxu0 %v5497_v59  ;;  %v5637_v59 = vld [vmem:[%s7648_s1 + $0x68] ss:$52 sps:$4 sm:$0xff]  }
  0xa9   :  { %4834 = vmatpush3.bf16.msra.mxu1 %v5490_v61  ;;  %5231 = vmatprep.subr.bf16.mxu0 %v5514_v1  ;;  %v5559_v61 = vld [vmem:[%s7648_s1 + $0x238] ss:$52 sps:$4 sm:$0xff]  }
  0xaa   :  { %4835 = vmatprep.subr.bf16.mxu1 %v5498_v0  ;;  %v5562_v0 = vld [vmem:[%s7647_s0 + $0x3c0] sm:$0xff]  }
  0xab   :  { %2005 = vmatmul.mubr.bf16.gmra.mrb[68].mxu0 %v5487_v60  ;;  %v5557_v60 = vld [vmem:[%s7647_s0 + $0x3b8] sm:$0xff]  }
  0xac   :  { %2102 = vmatmul.mubr.bf16.gmra.mrb[68].mxu1 %v5488_v62  ;;  %2012 = vmatprep.mubr.bf16.mxu0 %v5491_v63  ;;  %v5560_v62 = vld [vmem:[%s7647_s0 + $0x400] sm:$0xff]   ;;  %v5638_v63 = vld [vmem:[%s7648_s1 + $0xd4] ss:$52 sps:$4 sm:$0xff]  }
  0xad   :  { %2109 = vmatprep.mubr.bf16.mxu1 %v5493_v2  ;;  %4836 = vmatpush3.bf16.msra.mxu1 %v5499_v3  ;;  %v6545_v2 = vpop.permute.xlu0 %353  ;;  %v5574_v3 = vld [vmem:[%s7647_s0 + $0x480] sm:$0xff]  }
  0xae   :  { %4837 = vmatprep.subr.bf16.mxu1 %v5506_v4  ;;  %5232 = vmatpush3.bf16.msra.mxu0 %v5514_v1  ;;  %v5571_v1 = vld [vmem:[%s7647_s0 + $0x438] sm:$0xff]   ;;  %v5564_v4 = vld [vmem:[%s7647_s0 + $0x408] sm:$0xff]  }
  0xaf   :  { %5233 = vmatprep.subr.bf16.mxu0 %v5531_v12 }
  0xb1   :  { %4838 = vmatpush3.bf16.msra.mxu1 %v5507_v6  ;;  %v5576_v6 = vld [vmem:[%s7647_s0 + $0x440] sm:$0xff]  }
  0xb2   :  { %4839 = vmatprep.subr.bf16.mxu1 %v5515_v8  ;;  %5234 = vmatpush3.bf16.msra.mxu0 %v5531_v12  ;;  %v5639_v8 = vld [vmem:[%s7648_s1 + $0xd0] ss:$52 sps:$4 sm:$0xff]  }
  0xb3   :  { %2013 = vmatmul.mubr.bf16.gmra.mrb[72].mxu0 %v5495_v5  ;;  %4895 = vmatprep.subr.bf16.mxu0 %v5544_v22  ;;  %v5566_v5 = vld [vmem:[%s7648_s1 + $0x2a0] ss:$52 sps:$4 sm:$0xff]  }
  0xb4   :  { %2110 = vmatmul.mubr.bf16.gmra.mrb[72].mxu1 %v5496_v7  ;;  %2020 = vmatprep.mubr.bf16.mxu0 %v5500_v9  ;;  %v5578_v7 = vld [vmem:[%s7647_s0 + $0x488] sm:$0xff]   ;;  %v5568_v12 = vld [vmem:[%s7647_s0 + $0x410] sm:$0xff]  }
  0xb5   :  { %2117 = vmatprep.mubr.bf16.mxu1 %v5502_v10  ;;  %4840 = vmatpush3.bf16.msra.mxu1 %v5516_v11  ;;  %v5565_v9 = vld [vmem:[%s7647_s0 + $0x3c8] sm:$0xff]  }
  0xb6   :  { %4841 = vmatprep.subr.bf16.mxu1 %v5523_v13  ;;  %v5567_v11 = vld [vmem:[%s7648_s1 + $0x308] ss:$52 sps:$4 sm:$0xff]  }
  0xb9   :  { %4842 = vmatpush3.bf16.msra.mxu1 %v5524_v15  ;;  %v6581_v15 = vpop.permute.xlu1 %363 }
  0xba   :  { %4843 = vmatprep.subr.bf16.mxu1 %v5532_v17 }
  0xbb   :  { %2021 = vmatmul.mubr.bf16.gmra.mrb[76].mxu0 %v5504_v14  ;;  %v5640_v14 = vld [vmem:[%s7648_s1 + $0x13c] ss:$52 sps:$4 sm:$0xff]  }
  0xbc   :  { %2118 = vmatmul.mubr.bf16.gmra.mrb[76].mxu1 %v5505_v16  ;;  %2028 = vmatprep.mubr.bf16.mxu0 %v5508_v18  ;;  %v5580_v16 = vld [vmem:[%s7647_s0 + $0x448] sm:$0xff]  }
  0xbd   :  { %2125 = vmatprep.mubr.bf16.mxu1 %v5510_v19  ;;  %4844 = vmatpush3.bf16.msra.mxu1 %v5533_v20  ;;  %v5570_v19 = vld [vmem:[%s7647_s0 + $0x3d0] sm:$0xff]  }
  0xbe   :  { %4845 = vmatprep.subr.bf16.mxu1 %v5540_v21  ;;  %v6570_v10 = vpop.permute.xlu0 %358  ;;  %v5582_v20 = vld [vmem:[%s7647_s0 + $0x490] sm:$0xff]  }
  0xc1   :  { %4846 = vmatpush3.bf16.msra.mxu1 %v5541_v24 }
  0xc2   :  { %4959 = vmatprep.subr.bf16.mxu1 %v5545_v25 }
  0xc3   :  { %2029 = vmatmul.mubr.bf16.gmra.mrb[80].mxu0 %v5512_v23 }
  0xc4   :  { %2126 = vmatmul.mubr.bf16.gmra.mrb[80].mxu1 %v5513_v26  ;;  %2036 = vmatprep.mubr.bf16.mxu0 %v5517_v27  ;;  %v5572_v27 = vld [vmem:[%s7647_s0 + $0x418] sm:$0xff]  }
  0xc5   :  { %2133 = vmatprep.mubr.bf16.mxu1 %v5519_v28  ;;  %v5584_v28 = vld [vmem:[%s7647_s0 + $0x450] sm:$0xff]  }
  0xcb   :  { %2037 = vmatmul.mubr.bf16.gmra.mrb[84].mxu0 %v5521_v29 }
  0xcc   :  { %2134 = vmatmul.mubr.bf16.gmra.mrb[84].mxu1 %v5522_v30  ;;  %2044 = vmatprep.mubr.bf16.mxu0 %v5525_v31 }
  0xcd   :  { %2141 = vmatprep.mubr.bf16.mxu1 %v5527_v32  ;;  %v5586_v32 = vld [vmem:[%s7647_s0 + $0x498] sm:$0xff]  }
  0xd3   :  { %2045 = vmatmul.mubr.bf16.gmra.mrb[88].mxu0 %v5529_v33 }
  0xd4   :  { %2142 = vmatmul.mubr.bf16.gmra.mrb[88].mxu1 %v5530_v34  ;;  %2052 = vmatprep.mubr.bf16.mxu0 %v5534_v35 }
  0xd5   :  { %2149 = vmatprep.mubr.bf16.mxu1 %v5536_v36  ;;  %v5641_v36 = vld [vmem:[%s7648_s1 + $0x138] ss:$52 sps:$4 sm:$0xff]  }
  0xdb   :  { %2053 = vmatmul.mubr.bf16.gmra.mrb[92].mxu0 %v5538_v37  ;;  %v5573_v37 = vld [vmem:[%s7647_s0 + $0x3d8] sm:$0xff]  }
  0xdc   :  { %2150 = vmatmul.mubr.bf16.gmra.mrb[92].mxu1 %v5539_v38  ;;  %5235 = vmatprep.mubr.msk.bf16.mxu0 %vm1551_vm0, %v5542_v39  ;;  %v5642_v38 = vld [vmem:[%s7648_s1 + $0x1a4] ss:$52 sps:$4 sm:$0xff]  }
  0xdd   :  { %3178 = vmatprep.mubr.bf16.mxu1 %v5634_v40  ;;  %v5575_v39 = vld [vmem:[%s7647_s0 + $0x4e0] sm:$0xff]  }
  0xe3   :  { %5236 = vmatmul.mubr.msk.bf16.vlgmr.msra.gmra.mrb[96].mxu0 %vm1551_vm0, %v5543_v41 }
  0xe4   :  { %3179 = vmatmul.mubr.bf16.vlgmr.msra.gmra.mrb[96].mxu1 %v5635_v48  ;;  %4896 = vmatpush3.bf16.msra.mxu0 %v5546_v42  ;;  %v5643_v42 = vld [vmem:[%s7648_s1 + $0xc] ss:$52 sps:$4 sm:$0xff]  }
  0xe5   :  { %4960 = vmatpush3.bf16.msra.mxu1 %v5547_v43  ;;  %4897 = vmatprep.subr.bf16.mxu0 %v5548_v44  ;;  %v6623_v43 = vpop.permute.xlu1 %368  ;;  %v5588_v44 = vld [vmem:[%s7647_s0 + $0x458] sm:$0xff]   ;;  %v5591_v48 = vld [vmem:[%s7647_s0 + $0x560] sm:$0xff]  }
  0xe6   :  { %5239 = vmatprep.mubr.msk.bf16.mxu0 %vm1551_vm0, %v5550_v46  ;;  %3186 = vmatprep.mubr.bf16.mxu1 %v5636_v52 }
  0xe7   :  { %4961 = vmatprep.subr.bf16.mxu1 %v5553_v47  ;;  %v5577_v47 = vld [vmem:[%s7647_s0 + $0x4a0] sm:$0xff]  }
  0xe8   :  { %4898 = vmatpush3.bf16.msra.mxu0 %v5549_v45 }
  0xe9   :  { %4899 = vmatprep.subr.bf16.mxu0 %v5552_v49  ;;  %4962 = vmatpush3.bf16.msra.mxu1 %v5555_v51 }
  0xea   :  { %4963 = vmatprep.subr.bf16.mxu1 %v5561_v53 }
  0xeb   :  { %5240 = vmatmul.mubr.msk.bf16.gmra.mrb[100].mxu0 %vm1551_vm0, %v5551_v50 }
  0xec   :  { %3187 = vmatmul.mubr.bf16.gmra.mrb[100].mxu1 %v5637_v59  ;;  %4900 = vmatpush3.bf16.msra.mxu0 %v5554_v54 }
  0xed   :  { %4901 = vmatprep.subr.bf16.mxu0 %v5556_v55  ;;  %5243 = vmatprep.mubr.msk.bf16.mxu0 %vm1551_vm0, %v5558_v56 }
  0xee   :  { %3194 = vmatprep.mubr.bf16.mxu1 %v5638_v63  ;;  %4964 = vmatpush3.bf16.msra.mxu1 %v5563_v57  ;;  %v5645_v63 = vld [vmem:[%s7648_s1 + $0x1a0] ss:$52 sps:$4 sm:$0xff]  }
  0xef   :  { %4965 = vmatprep.subr.bf16.mxu1 %v5569_v58  ;;  %v5579_v58 = vld [vmem:[%s7647_s0 + $0x4e8] sm:$0xff]  }
  0xf0   :  { %4902 = vmatpush3.bf16.msra.mxu0 %v5557_v60  ;;  %v5644_v60 = vld [vmem:[%s7648_s1 + $0x8] ss:$52 sps:$4 sm:$0xff]  }
  0xf1   :  { %4903 = vmatprep.subr.bf16.mxu0 %v5560_v62 }
  0xf2   :  { %4966 = vmatpush3.bf16.msra.mxu1 %v5571_v1  ;;  %v6650_v1 = vpop.permute.xlu0 %373 }
  0xf3   :  { %5244 = vmatmul.mubr.msk.bf16.gmra.mrb[104].mxu0 %vm1551_vm0, %v5559_v61  ;;  %4967 = vmatprep.subr.bf16.mxu1 %v5574_v3  ;;  %v5646_v3 = vld [vmem:[%s7648_s1 + $0x20c] ss:$52 sps:$4 sm:$0xff]  }
  0xf4   :  { %3195 = vmatmul.mubr.bf16.gmra.mrb[104].mxu1 %v5639_v8  ;;  %4904 = vmatpush3.bf16.msra.mxu0 %v5562_v0  ;;  %v5581_v0 = vld [vmem:[%s7647_s0 + $0x4a8] sm:$0xff]   ;;  %v6663_v8 = vpop.permute.xlu1 %378 }
  0xf5   :  { %4905 = vmatprep.subr.bf16.mxu0 %v5564_v4  ;;  %5247 = vmatprep.mubr.msk.bf16.mxu0 %vm1551_vm0, %v5566_v5  ;;  %v5647_v4 = vld [vmem:[%s7648_s1 + $0x74] ss:$52 sps:$4 sm:$0xff]  }
  0xf6   :  { %v4451_v13 = vpop.f32.mrb[0].mxu0  ;;  %3202 = vmatprep.mubr.bf16.mxu1 %v5640_v14  ;;  %4968 = vmatpush3.bf16.msra.mxu1 %v5576_v6  ;;  %v5583_v5 = vld [vmem:[%s7647_s0 + $0x4f0] sm:$0xff]  }
  0xf7   :  { %v4515_v17 = vpop.f32.mrb[0].mxu1  ;;  %v4452_v18 = vpop.f32.mrb[1].mxu0  ;;  %4969 = vmatprep.subr.bf16.mxu1 %v5578_v7 }
  0xf8   :  { %v4453_v21 = vadd.f32 %v4452_v18, %v4451_v13  ;;  %v4516_v22 = vpop.f32.mrb[1].mxu1  ;;  %v4454_v23 = vpop.f32.mrb[2].mxu0  ;;  %4906 = vmatpush3.bf16.msra.mxu0 %v5565_v9 }
  0xf9   :  { %v4517_v24 = vadd.f32 %v4516_v22, %v4515_v17  ;;  %v4518_v25 = vpop.f32.mrb[2].mxu1  ;;  %v4455_v26 = vpop.f32.mrb[3].mxu0  ;;  %4907 = vmatprep.subr.bf16.mxu0 %v5568_v12 }
  0xfa   :  { %v1611_v29 = vadd.f32 %v4453_v21, %v6545_v2  ;;  %v4456_v30 = vadd.f32 %v4455_v26, %v4454_v23  ;;  %v4519_v31 = vpop.f32.mrb[3].mxu1  ;;  %4970 = vmatpush3.bf16.msra.mxu1 %v5580_v16  ;;  %v5587_v23 = vld [vmem:[%s7647_s0 + $0x4f8] sm:$0xff]  }
  0xfb   :  { %v4520_v33 = vadd.f32 %v4519_v31, %v4518_v25  ;;  %5248 = vmatmul.mubr.msk.bf16.gmra.mrb[108].mxu0 %vm1551_vm0, %v5567_v11  ;;  %4971 = vmatprep.subr.bf16.mxu1 %v5582_v20  ;;  %v5648_v25 = vld [vmem:[%s7648_s1 + $0x70] ss:$52 sps:$4 sm:$0xff]   ;;  %v5651_v31 = vld [vmem:[%s7648_s1 + $0x274] ss:$52 sps:$4 sm:$0xff]  }
  0xfc   :  { %v6603_v34 = vadd.f32 %v4517_v24, %v1611_v29  ;;  %v1614_v35 = vadd.f32 %v4456_v30, %v6570_v10  ;;  %3203 = vmatmul.mubr.bf16.gmra.mrb[108].mxu1 %v5641_v36  ;;  %4908 = vmatpush3.bf16.msra.mxu0 %v5570_v19  ;;  %v5585_v19 = vld [vmem:[%s7647_s0 + $0x4b0] sm:$0xff]   ;;  %v6684_v30 = vpop.permute.xlu0 %383  ;;  %v6694_v36 = vpop.permute.xlu1 %388 }
  0xfd   :  { %4909 = vmatprep.subr.bf16.mxu0 %v5572_v27  ;;  %3210 = vmatprep.mubr.bf16.mxu1 %v5642_v38  ;;  %v5650_v29 = vld [vmem:[%s7648_s1 + $0xdc] ss:$52 sps:$4 sm:$0xff]  }
  0xfe   :  { %v6618_v40 = vadd.f32 %v4520_v33, %v1614_v35  ;;  %v4457_v41 = vpop.f32.mrb[4].mxu0  ;;  %3275 = vmatprep.mubr.bf16.mxu0 %v5643_v42  ;;  %4972 = vmatpush3.bf16.msra.mxu1 %v5584_v28  ;;  %v5649_v28 = vld [vmem:[%s7648_s1 + $0x208] ss:$52 sps:$4 sm:$0xff]  }
  0xff   :  { %v4521_v45 = vpop.f32.mrb[4].mxu1  ;;  %v4458_v46 = vpop.f32.mrb[5].mxu0  ;;  %4973 = vmatprep.subr.bf16.mxu1 %v5586_v32  ;;  %v5589_v32 = vld [vmem:[%s7647_s0 + $0x4b8] sm:$0xff]  }
 0x100   :  { %v4459_v49 = vadd.f32 %v4458_v46, %v4457_v41  ;;  %v4522_v50 = vpop.f32.mrb[5].mxu1  ;;  %v4460_v51 = vpop.f32.mrb[6].mxu0  ;;  %4910 = vmatpush3.bf16.msra.mxu0 %v5573_v37  ;;  %v5590_v37 = vld [vmem:[%s7647_s0 + $0x500] sm:$0xff]  }
 0x101   :  { %v4523_v52 = vadd.f32 %v4522_v50, %v4521_v45  ;;  %v4524_v53 = vpop.f32.mrb[6].mxu1  ;;  %v4461_v54 = vpop.f32.mrb[7].mxu0  ;;  %5023 = vmatprep.subr.bf16.mxu0 %v5575_v39  ;;  %v5592_v41 = vld [vmem:[%s7647_s0 + $0x4c0] sm:$0xff]  }
 0x102   :  { %v1619_v55 = vadd.f32 %v4459_v49, %v6581_v15  ;;  %v4462_v56 = vadd.f32 %v4461_v54, %v4460_v51  ;;  %v4525_v57 = vpop.f32.mrb[7].mxu1  ;;  %4974 = vmatpush3.bf16.msra.mxu1 %v5588_v44  ;;  %v5652_v54 = vld [vmem:[%s7648_s1 + $0xd8] ss:$52 sps:$4 sm:$0xff]  }
 0x103   :  { %v4526_v59 = vadd.f32 %v4525_v57, %v4524_v53  ;;  %3276 = vmatmul.mubr.bf16.vlgmr.msra.gmra.mrb[112].mxu0 %v5644_v60  ;;  %5087 = vmatprep.subr.bf16.mxu1 %v5591_v48  ;;  %v5653_v57 = vld [vmem:[%s7648_s1 + $0x270] ss:$52 sps:$4 sm:$0xff]  }
 0x104   :  { %v6641_v61 = vadd.f32 %v4523_v52, %v1619_v55  ;;  %v1622_v62 = vadd.f32 %v4462_v56, %v6623_v43  ;;  %3211 = vmatmul.mubr.bf16.gmra.mrb[112].mxu1 %v5645_v63  ;;  %5024 = vmatpush3.bf16.msra.mxu0 %v5577_v47  ;;  %v5594_v52 = vld [vmem:[%s7647_s0 + $0x508] sm:$0xff]   ;;  %v5655_v60 = vld [vmem:[%s7648_s1 + $0x2dc] ss:$52 sps:$4 sm:$0xff]  }
 0x105   :  { %3218 = vmatprep.mubr.bf16.mxu1 %v5646_v3  ;;  %3283 = vmatprep.mubr.bf16.mxu0 %v5647_v4  ;;  %v6728_v3 = vpop.permute.xlu1 %398  ;;  %v5598_v4 = vld [vmem:[%s7647_s0 + $0x510] sm:$0xff]  }
 0x106   :  { %v6661_v6 = vadd.f32 %v4526_v59, %v1622_v62  ;;  %v4463_v7 = vpop.f32.mrb[8].mxu0  ;;  %5025 = vmatprep.subr.bf16.mxu0 %v5579_v58  ;;  %v5654_v58 = vld [vmem:[%s7648_s1 + $0x144] ss:$52 sps:$4 sm:$0xff]   ;;  %v6718_v59 = vpop.permute.xlu0 %393  ;;  %v5596_v62 = vld [vmem:[%s7647_s0 + $0x4c8] sm:$0xff]  }
 0x107   :  { %v4527_v9 = vpop.f32.mrb[8].mxu1  ;;  %v4464_v11 = vpop.f32.mrb[9].mxu0 }
 0x108   :  { %v4465_v12 = vadd.f32 %v4464_v11, %v4463_v7  ;;  %v4528_v13 = vpop.f32.mrb[9].mxu1  ;;  %v4466_v14 = vpop.f32.mrb[10].mxu0  ;;  %5026 = vmatpush3.bf16.msra.mxu0 %v5581_v0 }
 0x109   :  { %v4529_v16 = vadd.f32 %v4528_v13, %v4527_v9  ;;  %v4530_v17 = vpop.f32.mrb[10].mxu1  ;;  %v4467_v18 = vpop.f32.mrb[11].mxu0  ;;  %5027 = vmatprep.subr.bf16.mxu0 %v5583_v5 }
 0x10a   :  { %v1627_v20 = vadd.f32 %v4465_v12, %v6650_v1  ;;  %v4468_v21 = vadd.f32 %v4467_v18, %v4466_v14  ;;  %v4531_v22 = vpop.f32.mrb[11].mxu1 }
 0x10b   :  { %v4532_v24 = vadd.f32 %v4531_v22, %v4530_v17  ;;  %3284 = vmatmul.mubr.bf16.gmra.mrb[116].mxu0 %v5648_v25  ;;  %v5600_v17 = vld [vmem:[%s7647_s0 + $0x4d0] sm:$0xff]  }
 0x10c   :  { %v6675_v26 = vadd.f32 %v4529_v16, %v1627_v20  ;;  %v1630_v27 = vadd.f32 %v4468_v21, %v6663_v8  ;;  %3219 = vmatmul.mubr.bf16.gmra.mrb[116].mxu1 %v5649_v28  ;;  %3291 = vmatprep.mubr.bf16.mxu0 %v5650_v29  ;;  %v5602_v21 = vld [vmem:[%s7647_s0 + $0x518] sm:$0xff]   ;;  %v5658_v28 = vld [vmem:[%s7648_s1 + $0x1ac] ss:$52 sps:$4 sm:$0xff]   ;;  %v6752_v29 = vpop.permute.xlu0 %403 }
 0x10d   :  { %3226 = vmatprep.mubr.bf16.mxu1 %v5651_v31  ;;  %5028 = vmatpush3.bf16.msra.mxu0 %v5585_v19  ;;  %v5659_v31 = vld [vmem:[%s7648_s1 + $0x14] ss:$52 sps:$4 sm:$0xff]  }
 0x10e   :  { %v6692_v33 = vadd.f32 %v4532_v24, %v1630_v27  ;;  %v4469_v35 = vpop.f32.mrb[12].mxu0  ;;  %5029 = vmatprep.subr.bf16.mxu0 %v5587_v23  ;;  %v5656_v23 = vld [vmem:[%s7648_s1 + $0x140] ss:$52 sps:$4 sm:$0xff]   ;;  %v5657_v27 = vld [vmem:[%s7648_s1 + $0x2d8] ss:$52 sps:$4 sm:$0xff]  }
 0x10f   :  { %v4533_v38 = vpop.f32.mrb[12].mxu1  ;;  %v4470_v39 = vpop.f32.mrb[13].mxu0 }
 0x110   :  { %v4471_v42 = vadd.f32 %v4470_v39, %v4469_v35  ;;  %v4534_v44 = vpop.f32.mrb[13].mxu1  ;;  %v4472_v45 = vpop.f32.mrb[14].mxu0  ;;  %v5607_v39 = vld [vmem:[%s7647_s0 + $0x5e0] sm:$0xff]  }
 0x111   :  { %v4535_v46 = vadd.f32 %v4534_v44, %v4533_v38  ;;  %v4536_v47 = vpop.f32.mrb[14].mxu1  ;;  %v4473_v48 = vpop.f32.mrb[15].mxu0  ;;  %5030 = vmatpush3.bf16.msra.mxu0 %v5589_v32  ;;  %v5604_v32 = vld [vmem:[%s7647_s0 + $0x4d8] sm:$0xff]  }
 0x112   :  { %v1635_v49 = vadd.f32 %v4471_v42, %v6684_v30  ;;  %v4474_v50 = vadd.f32 %v4473_v48, %v4472_v45  ;;  %v4537_v51 = vpop.f32.mrb[15].mxu1  ;;  %5031 = vmatprep.subr.bf16.mxu0 %v5590_v37  ;;  %v6762_v38 = vpop.permute.xlu1 %408 }
 0x113   :  { %v4538_v53 = vadd.f32 %v4537_v51, %v4536_v47  ;;  %3292 = vmatmul.mubr.bf16.gmra.mrb[120].mxu0 %v5652_v54  ;;  %v5595_v54 = vld [vmem:[%s7647_s0 + $0x568] sm:$0xff]  }
 0x114   :  { %v6709_v55 = vadd.f32 %v4535_v46, %v1635_v49  ;;  %v1638_v56 = vadd.f32 %v4474_v50, %v6694_v36  ;;  %3227 = vmatmul.mubr.bf16.gmra.mrb[120].mxu1 %v5653_v57  ;;  %3299 = vmatprep.mubr.bf16.mxu0 %v5654_v58  ;;  %v5593_v50 = vld [vmem:[%s7647_s0 + $0x520] sm:$0xff]   ;;  %v5660_v57 = vld [vmem:[%s7648_s1 + $0x1a8] ss:$52 sps:$4 sm:$0xff]  }
 0x115   :  { %3234 = vmatprep.mubr.bf16.mxu1 %v5655_v60  ;;  %5032 = vmatpush3.bf16.msra.mxu0 %v5592_v41 }
 0x116   :  { %v6726_v63 = vadd.f32 %v4538_v53, %v1638_v56  ;;  %v4475_v0 = vpop.f32.mrb[16].mxu0  ;;  %5033 = vmatprep.subr.bf16.mxu0 %v5594_v52 }
 0x117   :  { %v4539_v5 = vpop.f32.mrb[16].mxu1  ;;  %v4476_v7 = vpop.f32.mrb[17].mxu0 }
 0x118   :  { %v4477_v9 = vadd.f32 %v4476_v7, %v4475_v0  ;;  %v4540_v11 = vpop.f32.mrb[17].mxu1  ;;  %v4478_v12 = vpop.f32.mrb[18].mxu0  ;;  %v5662_v0 = vld [vmem:[%s7648_s1 + $0x214] ss:$52 sps:$4 sm:$0xff]  }
 0x119   :  { %v4541_v13 = vadd.f32 %v4540_v11, %v4539_v5  ;;  %v4542_v14 = vpop.f32.mrb[18].mxu1  ;;  %v4479_v16 = vpop.f32.mrb[19].mxu0  ;;  %5034 = vmatpush3.bf16.msra.mxu0 %v5596_v62  ;;  %v5661_v62 = vld [vmem:[%s7648_s1 + $0x10] ss:$52 sps:$4 sm:$0xff]   ;;  %v5597_v7 = vld [vmem:[%s7647_s0 + $0x528] sm:$0xff]  }
 0x11a   :  { %v1643_v18 = vadd.f32 %v4477_v9, %v6718_v59  ;;  %v4480_v19 = vadd.f32 %v4479_v16, %v4478_v12  ;;  %v4543_v20 = vpop.f32.mrb[19].mxu1  ;;  %5035 = vmatprep.subr.bf16.mxu0 %v5598_v4  ;;  %v6786_v4 = vpop.permute.xlu0 %413  ;;  %v5663_v5 = vld [vmem:[%s7648_s1 + $0x7c] ss:$52 sps:$4 sm:$0xff]  }
 0x11b   :  { %v4544_v22 = vadd.f32 %v4543_v20, %v4542_v14  ;;  %3300 = vmatmul.mubr.bf16.gmra.mrb[124].mxu0 %v5656_v23  ;;  %v6796_v12 = vpop.permute.xlu1 %418  ;;  %v5601_v23 = vld [vmem:[%s7647_s0 + $0x530] sm:$0xff]  }
 0x11c   :  { %v6743_v24 = vadd.f32 %v4541_v13, %v1643_v18  ;;  %v1646_v25 = vadd.f32 %v4480_v19, %v6728_v3  ;;  %3235 = vmatmul.mubr.bf16.gmra.mrb[124].mxu1 %v5657_v27  ;;  %3307 = vmatprep.mubr.bf16.mxu0 %v5658_v28  ;;  %v5599_v13 = vld [vmem:[%s7647_s0 + $0x570] sm:$0xff]  }
 0x11d   :  { %3372 = vmatprep.mubr.bf16.mxu1 %v5659_v31  ;;  %5036 = vmatpush3.bf16.msra.mxu0 %v5600_v17  ;;  %v5603_v31 = vld [vmem:[%s7647_s0 + $0x578] sm:$0xff]  }
 0x11e   :  { %v6760_v35 = vadd.f32 %v4544_v22, %v1646_v25  ;;  %v4481_v37 = vpop.f32.mrb[20].mxu0  ;;  %5037 = vmatprep.subr.bf16.mxu0 %v5602_v21 }
 0x11f   :  { %v4545_v41 = vpop.f32.mrb[20].mxu1  ;;  %v4482_v42 = vpop.f32.mrb[21].mxu0 }
 0x120   :  { %v4483_v44 = vadd.f32 %v4482_v42, %v4481_v37  ;;  %v4546_v45 = vpop.f32.mrb[21].mxu1  ;;  %v4484_v46 = vpop.f32.mrb[22].mxu0  ;;  %v5664_v37 = vld [vmem:[%s7648_s1 + $0x210] ss:$52 sps:$4 sm:$0xff]   ;;  %v5665_v42 = vld [vmem:[%s7648_s1 + $0x78] ss:$52 sps:$4 sm:$0xff]  }
 0x121   :  { %v4547_v47 = vadd.f32 %v4546_v45, %v4545_v41  ;;  %v4548_v48 = vpop.f32.mrb[22].mxu1  ;;  %v4485_v49 = vpop.f32.mrb[23].mxu0  ;;  %5038 = vmatpush3.bf16.msra.mxu0 %v5604_v32 }
 0x122   :  { %v1651_v51 = vadd.f32 %v4483_v44, %v6752_v29  ;;  %v4486_v52 = vadd.f32 %v4485_v49, %v4484_v46  ;;  %v4549_v53 = vpop.f32.mrb[23].mxu1  ;;  %5151 = vmatprep.subr.bf16.mxu0 %v5607_v39  ;;  %v5666_v44 = vld [vmem:[%s7648_s1 + $0x27c] ss:$52 sps:$4 sm:$0xff]   ;;  %v6820_v45 = vpop.permute.xlu0 %423  ;;  %v5667_v46 = vld [vmem:[%s7648_s1 + $0xe4] ss:$52 sps:$4 sm:$0xff]  }
 0x123   :  { %v4550_v56 = vadd.f32 %v4549_v53, %v4548_v48  ;;  %3308 = vmatmul.mubr.bf16.gmra.mrb[128].mxu0 %v5660_v57 }
 0x124   :  { %v6777_v58 = vadd.f32 %v4547_v47, %v1651_v51  ;;  %v1654_v60 = vadd.f32 %v4486_v52, %v6762_v38  ;;  %3373 = vmatmul.mubr.bf16.vlgmr.msra.gmra.mrb[128].mxu1 %v5661_v62  ;;  %3315 = vmatprep.mubr.bf16.mxu0 %v5662_v0  ;;  %v5605_v47 = vld [vmem:[%s7647_s0 + $0x538] sm:$0xff]   ;;  %v5606_v51 = vld [vmem:[%s7647_s0 + $0x580] sm:$0xff]  }
 0x125   :  { %5088 = vmatpush3.bf16.msra.mxu1 %v5593_v50  ;;  %3380 = vmatprep.mubr.bf16.mxu1 %v5663_v5  ;;  %v6830_v50 = vpop.permute.xlu1 %428  ;;  %v5608_v5 = vld [vmem:[%s7647_s0 + $0x540] sm:$0xff]  }
 0x126   :  { %v6794_v9 = vadd.f32 %v4550_v56, %v1654_v60  ;;  %v4487_v11 = vpop.f32.mrb[24].mxu0  ;;  %5089 = vmatprep.subr.bf16.mxu1 %v5595_v54 }
 0x127   :  { %v4551_v14 = vpop.f32.mrb[24].mxu1  ;;  %v4488_v16 = vpop.f32.mrb[25].mxu0 }
 0x128   :  { %v4489_v17 = vadd.f32 %v4488_v16, %v4487_v11  ;;  %v4552_v18 = vpop.f32.mrb[25].mxu1  ;;  %v4490_v19 = vpop.f32.mrb[26].mxu0 }
 0x129   :  { %v4553_v20 = vadd.f32 %v4552_v18, %v4551_v14  ;;  %v4554_v21 = vpop.f32.mrb[26].mxu1  ;;  %v4491_v22 = vpop.f32.mrb[27].mxu0  ;;  %5090 = vmatpush3.bf16.msra.mxu1 %v5597_v7  ;;  %v5610_v14 = vld [vmem:[%s7647_s0 + $0x588] sm:$0xff]  }
 0x12a   :  { %v1659_v25 = vadd.f32 %v4489_v17, %v6786_v4  ;;  %v4492_v27 = vadd.f32 %v4491_v22, %v4490_v19  ;;  %v4555_v28 = vpop.f32.mrb[27].mxu1  ;;  %5091 = vmatprep.subr.bf16.mxu1 %v5599_v13  ;;  %v5668_v17 = vld [vmem:[%s7648_s1 + $0x278] ss:$52 sps:$4 sm:$0xff]  }
 0x12b   :  { %v4556_v32 = vadd.f32 %v4555_v28, %v4554_v21  ;;  %3316 = vmatmul.mubr.bf16.gmra.mrb[132].mxu0 %v5664_v37  ;;  %v5670_v21 = vld [vmem:[%s7648_s1 + $0x2e4] ss:$52 sps:$4 sm:$0xff]   ;;  %v5671_v22 = vld [vmem:[%s7648_s1 + $0x14c] ss:$52 sps:$4 sm:$0xff]   ;;  %v5614_v28 = vld [vmem:[%s7647_s0 + $0x590] sm:$0xff]  }
 0x12c   :  { %v6811_v39 = vadd.f32 %v4553_v20, %v1659_v25  ;;  %v1662_v41 = vadd.f32 %v4492_v27, %v6796_v12  ;;  %3381 = vmatmul.mubr.bf16.gmra.mrb[132].mxu1 %v5665_v42  ;;  %3323 = vmatprep.mubr.bf16.mxu0 %v5666_v44  ;;  %v5669_v20 = vld [vmem:[%s7648_s1 + $0xe0] ss:$52 sps:$4 sm:$0xff]  }
 0x12d   :  { %3388 = vmatprep.mubr.bf16.mxu1 %v5667_v46  ;;  %5092 = vmatpush3.bf16.msra.mxu1 %v5601_v23  ;;  %v5612_v23 = vld [vmem:[%s7647_s0 + $0x548] sm:$0xff]  }
 0x12e   :  { %v6828_v48 = vadd.f32 %v4556_v32, %v1662_v41  ;;  %v4493_v49 = vpop.f32.mrb[28].mxu0  ;;  %5093 = vmatprep.subr.bf16.mxu1 %v5603_v31 }
 0x12f   :  { %v4557_v52 = vpop.f32.mrb[28].mxu1  ;;  %v4494_v53 = vpop.f32.mrb[29].mxu0 }
 0x130   :  { %v4495_v54 = vadd.f32 %v4494_v53, %v4493_v49  ;;  %v4558_v56 = vpop.f32.mrb[29].mxu1  ;;  %v4496_v57 = vpop.f32.mrb[30].mxu0  ;;  %v5616_v49 = vld [vmem:[%s7647_s0 + $0x550] sm:$0xff]  }
 0x131   :  { %v4559_v60 = vadd.f32 %v4558_v56, %v4557_v52  ;;  %v4560_v62 = vpop.f32.mrb[30].mxu1  ;;  %v4497_v0 = vpop.f32.mrb[31].mxu0  ;;  %5094 = vmatpush3.bf16.msra.mxu1 %v5605_v47 }
 0x132   :  { %v1667_v7 = vadd.f32 %v4495_v54, %v6820_v45  ;;  %v4498_v11 = vadd.f32 %v4497_v0, %v4496_v57  ;;  %v4561_v13 = vpop.f32.mrb[31].mxu1  ;;  %5095 = vmatprep.subr.bf16.mxu1 %v5606_v51  ;;  %v5618_v54 = vld [vmem:[%s7647_s0 + $0x598] sm:$0xff]   ;;  %v5672_v57 = vld [vmem:[%s7648_s1 + $0x2e0] ss:$52 sps:$4 sm:$0xff]  }
 0x133   :  { %v4562_v16 = vadd.f32 %v4561_v13, %v4560_v62  ;;  %3324 = vmatmul.mubr.bf16.gmra.mrb[136].mxu0 %v5668_v17  ;;  %v5674_v0 = vld [vmem:[%s7648_s1 + $0x1c] ss:$52 sps:$4 sm:$0xff]   ;;  %v6895_v13 = vld [vmem:[%s7647_s0 + $0x620] sm:$0xff]  }
 0x134   :  { %v6845_v18 = vadd.f32 %v4559_v60, %v1667_v7  ;;  %v1670_v19 = vadd.f32 %v4498_v11, %v6830_v50  ;;  %3389 = vmatmul.mubr.bf16.gmra.mrb[136].mxu1 %v5669_v20  ;;  %3331 = vmatprep.mubr.bf16.mxu0 %v5670_v21  ;;  %v5609_v21 = vld [vmem:[%s7647_s0 + $0x5a0] sm:$0xff]  }
 0x135   :  { %3396 = vmatprep.mubr.bf16.mxu1 %v5671_v22  ;;  %5096 = vmatpush3.bf16.msra.mxu1 %v5608_v5  ;;  %v5675_v5 = vld [vmem:[%s7648_s1 + $0x1b4] ss:$52 sps:$4 sm:$0xff]  }
 0x136   :  { %v6860_v25 = vadd.f32 %v4562_v16, %v1670_v19  ;;  %v4579_v27 = vpop.f32.mrb[32].mxu0  ;;  %5097 = vmatprep.subr.bf16.mxu1 %v5610_v14 }
 0x137   :  { %v4643_v31 = vpop.f32.mrb[32].mxu1  ;;  %v4580_v32 = vpop.f32.mrb[33].mxu0 }
 0x138   :  { %v4581_v37 = vadd.f32 %v4580_v32, %v4579_v27  ;;  %v4644_v41 = vpop.f32.mrb[33].mxu1  ;;  %v4582_v42 = vpop.f32.mrb[34].mxu0 }
 0x139   :  { %v4645_v44 = vadd.f32 %v4644_v41, %v4643_v31  ;;  %v4646_v46 = vpop.f32.mrb[34].mxu1  ;;  %v4583_v47 = vpop.f32.mrb[35].mxu0  ;;  %5098 = vmatpush3.bf16.msra.mxu1 %v5612_v23 }
 0x13a   :  { %v1805_v51 = vadd.f32 %v4581_v37, %v6603_v34  ;;  %v4584_v52 = vadd.f32 %v4583_v47, %v4582_v42  ;;  %v4647_v53 = vpop.f32.mrb[35].mxu1  ;;  %5099 = vmatprep.subr.bf16.mxu1 %v5614_v28  ;;  %v5673_v34 = vld [vmem:[%s7648_s1 + $0x148] ss:$52 sps:$4 sm:$0xff]   ;;  %v5676_v42 = vld [vmem:[%s7648_s1 + $0x18] ss:$52 sps:$4 sm:$0xff]  }
 0x13b   :  { %v4648_v56 = vadd.f32 %v4647_v53, %v4646_v46  ;;  %3332 = vmatmul.mubr.bf16.gmra.mrb[140].mxu0 %v5672_v57  ;;  %v5611_v37 = vld [vmem:[%s7647_s0 + $0x5e8] sm:$0xff]  }
 0x13c   :  { %v6875_v60 = vadd.f32 %v4645_v44, %v1805_v51  ;;  %v1808_v62 = vadd.f32 %v4584_v52, %v6618_v40  ;;  %3397 = vmatmul.mubr.bf16.gmra.mrb[140].mxu1 %v5673_v34  ;;  %3469 = vmatprep.mubr.bf16.mxu0 %v5674_v0  ;;  %v5620_v40 = vld [vmem:[%s7647_s0 + $0x558] sm:$0xff]   ;;  %v5613_v47 = vld [vmem:[%s7647_s0 + $0x5a8] sm:$0xff]  }
 0x13d   :  { %3404 = vmatprep.mubr.bf16.mxu1 %v5675_v5  ;;  %5100 = vmatpush3.bf16.msra.mxu1 %v5616_v49  ;;  %v5678_v49 = vld [vmem:[%s7648_s1 + $0x21c] ss:$52 sps:$4 sm:$0xff]   ;;  %v5679_v51 = vld [vmem:[%s7648_s1 + $0x84] ss:$52 sps:$4 sm:$0xff]  }
 0x13e   :  { %v6890_v7 = vadd.f32 %v4648_v56, %v1808_v62  ;;  %v4585_v11 = vpop.f32.mrb[36].mxu0  ;;  %5101 = vmatprep.subr.bf16.mxu1 %v5618_v54 }
 0x13f   :  { %v4649_v14 = vpop.f32.mrb[36].mxu1  ;;  %v4586_v16 = vpop.f32.mrb[37].mxu0 }
 0x140   :  { %v4587_v17 = vadd.f32 %v4586_v16, %v4585_v11  ;;  %v4650_v19 = vpop.f32.mrb[37].mxu1  ;;  %v4588_v20 = vpop.f32.mrb[38].mxu0  ;;  %v5617_v11 = vld [vmem:[%s7647_s0 + $0x5b0] sm:$0xff]  }
 0x141   :  { %v4651_v22 = vadd.f32 %v4650_v19, %v4649_v14  ;;  %v4652_v23 = vpop.f32.mrb[38].mxu1  ;;  %v4589_v27 = vpop.f32.mrb[39].mxu0  ;;  %5102 = vmatpush3.bf16.msra.mxu1 %v5620_v40  ;;  %v5619_v19 = vld [vmem:[%s7647_s0 + $0x5f8] sm:$0xff]  }
 0x142   :  { %v1813_v28 = vadd.f32 %v4587_v17, %v6641_v61  ;;  %v4590_v31 = vadd.f32 %v4589_v27, %v4588_v20  ;;  %v4653_v32 = vpop.f32.mrb[39].mxu1  ;;  %5251 = vmatprep.subr.bf16.mxu1 %v6895_v13  ;;  %v5677_v61 = vld [vmem:[%s7648_s1 + $0x1b0] ss:$52 sps:$4 sm:$0xff]   ;;  %v5682_v27 = vld [vmem:[%s7648_s1 + $0xec] ss:$52 sps:$4 sm:$0xff]  }
 0x143   :  { %v4654_v41 = vadd.f32 %v4653_v32, %v4652_v23  ;;  %3470 = vmatmul.mubr.bf16.vlgmr.msra.gmra.mrb[144].mxu0 %v5676_v42 }
 0x144   :  { %v6908_v44 = vadd.f32 %v4651_v22, %v1813_v28  ;;  %v1816_v46 = vadd.f32 %v4590_v31, %v6661_v6  ;;  %3405 = vmatmul.mubr.bf16.gmra.mrb[144].mxu1 %v5677_v61  ;;  %5152 = vmatpush3.bf16.msra.mxu0 %v5609_v21  ;;  %v5615_v6 = vld [vmem:[%s7647_s0 + $0x5f0] sm:$0xff]   ;;  %v5683_v28 = vld [vmem:[%s7648_s1 + $0x284] ss:$52 sps:$4 sm:$0xff]  }
 0x145   :  { %3412 = vmatprep.mubr.bf16.mxu1 %v5678_v49  ;;  %3477 = vmatprep.mubr.bf16.mxu0 %v5679_v51  ;;  %v5680_v21 = vld [vmem:[%s7648_s1 + $0x80] ss:$52 sps:$4 sm:$0xff]  }
 0x146   :  { %v6926_v52 = vadd.f32 %v4654_v41, %v1816_v46  ;;  %v4591_v53 = vpop.f32.mrb[40].mxu0  ;;  %5153 = vmatprep.subr.bf16.mxu0 %v5611_v37  ;;  %v5622_v37 = vld [vmem:[%s7647_s0 + $0x600] sm:$0xff]  }
 0x147   :  { %v4655_v54 = vpop.f32.mrb[40].mxu1  ;;  %v4592_v56 = vpop.f32.mrb[41].mxu0 }
 0x148   :  { %v4593_v57 = vadd.f32 %v4592_v56, %v4591_v53  ;;  %v4656_v62 = vpop.f32.mrb[41].mxu1  ;;  %v4594_v34 = vpop.f32.mrb[42].mxu0  ;;  %5154 = vmatpush3.bf16.msra.mxu0 %v5613_v47  ;;  %v5624_v53 = vld [vmem:[%s7647_s0 + $0x5c0] sm:$0xff]  }
 0x149   :  { %v4657_v0 = vadd.f32 %v4656_v62, %v4655_v54  ;;  %v4658_v5 = vpop.f32.mrb[42].mxu1  ;;  %v4595_v40 = vpop.f32.mrb[43].mxu0  ;;  %5155 = vmatprep.subr.bf16.mxu0 %v5615_v6  ;;  %v5625_v62 = vld [vmem:[%s7647_s0 + $0x608] sm:$0xff]  }
 0x14a   :  { %v1821_v14 = vadd.f32 %v4593_v57, %v6675_v26  ;;  %v4596_v16 = vadd.f32 %v4595_v40, %v4594_v34  ;;  %v4659_v17 = vpop.f32.mrb[43].mxu1  ;;  %v5681_v26 = vld [vmem:[%s7648_s1 + $0x218] ss:$52 sps:$4 sm:$0xff]  }
 0x14b   :  { %v4660_v20 = vadd.f32 %v4659_v17, %v4658_v5  ;;  %3478 = vmatmul.mubr.bf16.gmra.mrb[148].mxu0 %v5680_v21 }
 0x14c   :  { %v6938_v22 = vadd.f32 %v4657_v0, %v1821_v14  ;;  %v1824_v23 = vadd.f32 %v4596_v16, %v6692_v33  ;;  %3413 = vmatmul.mubr.bf16.gmra.mrb[148].mxu1 %v5681_v26  ;;  %3485 = vmatprep.mubr.bf16.mxu0 %v5682_v27  ;;  %v5621_v33 = vld [vmem:[%s7647_s0 + $0x5b8] sm:$0xff]   ;;  %v5687_v14 = vld [vmem:[%s7648_s1 + $0x2ec] ss:$52 sps:$4 sm:$0xff]  }
 0x14d   :  { %3420 = vmatprep.mubr.bf16.mxu1 %v5683_v28  ;;  %5156 = vmatpush3.bf16.msra.mxu0 %v5617_v11  ;;  %v5684_v0 = vld [vmem:[%s7648_s1 + $0xe8] ss:$52 sps:$4 sm:$0xff]  }
 0x14e   :  { %v6953_v31 = vadd.f32 %v4660_v20, %v1824_v23  ;;  %v4597_v32 = vpop.f32.mrb[44].mxu0  ;;  %5157 = vmatprep.subr.bf16.mxu0 %v5619_v19  ;;  %v5686_v11 = vld [vmem:[%s7648_s1 + $0x154] ss:$52 sps:$4 sm:$0xff]  }
 0x14f   :  { %v4661_v41 = vpop.f32.mrb[44].mxu1  ;;  %v4598_v42 = vpop.f32.mrb[45].mxu0  ;;  %v5627_v19 = vld [vmem:[%s7647_s0 + $0x610] sm:$0xff]  }
 0x150   :  { %v4599_v46 = vadd.f32 %v4598_v42, %v4597_v32  ;;  %v4662_v61 = vpop.f32.mrb[45].mxu1  ;;  %v4600_v47 = vpop.f32.mrb[46].mxu0 }
 0x151   :  { %v4663_v49 = vadd.f32 %v4662_v61, %v4661_v41  ;;  %v4664_v51 = vpop.f32.mrb[46].mxu1  ;;  %v4601_v6 = vpop.f32.mrb[47].mxu0  ;;  %5158 = vmatpush3.bf16.msra.mxu0 %v5621_v33  ;;  %v5630_v61 = vld [vmem:[%s7647_s0 + $0x618] sm:$0xff]  }
 0x152   :  { %v1829_v54 = vadd.f32 %v4599_v46, %v6709_v55  ;;  %v4602_v56 = vadd.f32 %v4601_v6, %v4600_v47  ;;  %v4665_v57 = vpop.f32.mrb[47].mxu1  ;;  %5159 = vmatprep.subr.bf16.mxu0 %v5622_v37  ;;  %v5685_v55 = vld [vmem:[%s7648_s1 + $0x280] ss:$52 sps:$4 sm:$0xff]  }
 0x153   :  { %v4666_v34 = vadd.f32 %v4665_v57, %v4664_v51  ;;  %3486 = vmatmul.mubr.bf16.gmra.mrb[152].mxu0 %v5684_v0  ;;  %v5629_v37 = vld [vmem:[%s7647_s0 + $0x5d0] sm:$0xff]  }
 0x154   :  { %v6968_v5 = vadd.f32 %v4663_v49, %v1829_v54  ;;  %v1832_v40 = vadd.f32 %v4602_v56, %v6726_v63  ;;  %3421 = vmatmul.mubr.bf16.gmra.mrb[152].mxu1 %v5685_v55  ;;  %3493 = vmatprep.mubr.bf16.mxu0 %v5686_v11  ;;  %v5626_v63 = vld [vmem:[%s7647_s0 + $0x5c8] sm:$0xff]   ;;  %v5688_v49 = vld [vmem:[%s7648_s1 + $0x150] ss:$52 sps:$4 sm:$0xff]  }
 0x155   :  { %3428 = vmatprep.mubr.bf16.mxu1 %v5687_v14  ;;  %5160 = vmatpush3.bf16.msra.mxu0 %v5624_v53  ;;  %v5690_v53 = vld [vmem:[%s7648_s1 + $0x1bc] ss:$52 sps:$4 sm:$0xff]   ;;  %v5691_v54 = vld [vmem:[%s7648_s1 + $0x24] ss:$52 sps:$4 sm:$0xff]  }
 0x156   :  { %v6983_v16 = vadd.f32 %v4666_v34, %v1832_v40  ;;  %v4603_v17 = vpop.f32.mrb[48].mxu0  ;;  %5161 = vmatprep.subr.bf16.mxu0 %v5625_v62 }
 0x157   :  { %v4667_v20 = vpop.f32.mrb[48].mxu1  ;;  %v4604_v21 = vpop.f32.mrb[49].mxu0 }
 0x158   :  { %v4605_v23 = vadd.f32 %v4604_v21, %v4603_v17  ;;  %v4668_v26 = vpop.f32.mrb[49].mxu1  ;;  %v4606_v27 = vpop.f32.mrb[50].mxu0  ;;  %v5628_v21 = vld [vmem:[%s7647_s0 + $0x628] sm:$0xff]  }
 0x159   :  { %v4669_v28 = vadd.f32 %v4668_v26, %v4667_v20  ;;  %v4670_v33 = vpop.f32.mrb[50].mxu1  ;;  %v4607_v32 = vpop.f32.mrb[51].mxu0  ;;  %5162 = vmatpush3.bf16.msra.mxu0 %v5626_v63  ;;  %v5692_v26 = vld [vmem:[%s7648_s1 + $0x1b8] ss:$52 sps:$4 sm:$0xff]  }
 0x15a   :  { %v1837_v41 = vadd.f32 %v4605_v23, %v6743_v24  ;;  %v4608_v42 = vadd.f32 %v4607_v32, %v4606_v27  ;;  %v4671_v46 = vpop.f32.mrb[51].mxu1  ;;  %5163 = vmatprep.subr.bf16.mxu0 %v5627_v19  ;;  %v5689_v24 = vld [vmem:[%s7648_s1 + $0x2e8] ss:$52 sps:$4 sm:$0xff]   ;;  %v5695_v32 = vld [vmem:[%s7648_s1 + $0x8c] ss:$52 sps:$4 sm:$0xff]  }
 0x15b   :  { %v4672_v47 = vadd.f32 %v4671_v46, %v4670_v33  ;;  %3494 = vmatmul.mubr.bf16.gmra.mrb[156].mxu0 %v5688_v49  ;;  %v5694_v33 = vld [vmem:[%s7648_s1 + $0x224] ss:$52 sps:$4 sm:$0xff]  }
 0x15c   :  { %v6998_v51 = vadd.f32 %v4669_v28, %v1837_v41  ;;  %v1840_v6 = vadd.f32 %v4608_v42, %v6760_v35  ;;  %3429 = vmatmul.mubr.bf16.gmra.mrb[156].mxu1 %v5689_v24  ;;  %3501 = vmatprep.mubr.bf16.mxu0 %v5690_v53  ;;  %v5631_v35 = vld [vmem:[%s7647_s0 + $0x5d8] sm:$0xff]   ;;  %v5632_v41 = vld [vmem:[%s7647_s0 + $0x630] sm:$0xff]  }
 0x15d   :  { %3566 = vmatprep.mubr.bf16.mxu1 %v5691_v54  ;;  %5164 = vmatpush3.bf16.msra.mxu0 %v5629_v37 }
 0x15e   :  { %v7013_v56 = vadd.f32 %v4672_v47, %v1840_v6  ;;  %v4609_v57 = vpop.f32.mrb[52].mxu0  ;;  %5165 = vmatprep.subr.bf16.mxu0 %v5630_v61 }
 0x15f   :  { %v4673_v62 = vpop.f32.mrb[52].mxu1  ;;  %v4610_v34 = vpop.f32.mrb[53].mxu0 }
 0x160   :  { %v4611_v0 = vadd.f32 %v4610_v34, %v4609_v57  ;;  %v4674_v40 = vpop.f32.mrb[53].mxu1  ;;  %v4612_v55 = vpop.f32.mrb[54].mxu0  ;;  %v5633_v57 = vld [vmem:[%s7647_s0 + $0x638] sm:$0xff]   ;;  %v5696_v34 = vld [vmem:[%s7648_s1 + $0x220] ss:$52 sps:$4 sm:$0xff]  }
 0x161   :  { %v4675_v11 = vadd.f32 %v4674_v40, %v4673_v62  ;;  %v4676_v14 = vpop.f32.mrb[54].mxu1  ;;  %v4613_v63 = vpop.f32.mrb[55].mxu0  ;;  %5166 = vmatpush3.bf16.msra.mxu0 %v5631_v35 }
 0x162   :  { %v1845_v17 = vadd.f32 %v4611_v0, %v6777_v58  ;;  %v4614_v19 = vadd.f32 %v4613_v63, %v4612_v55  ;;  %v4677_v20 = vpop.f32.mrb[55].mxu1  ;;  %v5693_v58 = vld [vmem:[%s7648_s1 + $0x20] ss:$52 sps:$4 sm:$0xff]  }
 0x163   :  { %v4678_v23 = vadd.f32 %v4677_v20, %v4676_v14  ;;  %3502 = vmatmul.mubr.bf16.gmra.mrb[160].mxu0 %v5692_v26  ;;  %v5698_v55 = vld [vmem:[%s7648_s1 + $0x28c] ss:$52 sps:$4 sm:$0xff]  }
 0x164   :  { %v7022_v27 = vadd.f32 %v4675_v11, %v1845_v17  ;;  %v1848_v28 = vadd.f32 %v4614_v19, %v6794_v9  ;;  %3567 = vmatmul.mubr.bf16.vlgmr.msra.gmra.mrb[160].mxu1 %v5693_v58  ;;  %3509 = vmatprep.mubr.bf16.mxu0 %v5694_v33  ;;  %v5699_v11 = vld [vmem:[%s7648_s1 + $0xf4] ss:$52 sps:$4 sm:$0xff]  }
 0x165   :  { %5252 = vmatpush3.bf16.msra.mxu1 %v6895_v13  ;;  %3574 = vmatprep.mubr.bf16.mxu1 %v5695_v32 }
 0x166   :  { %v7035_v37 = vadd.f32 %v4678_v23, %v1848_v28  ;;  %v4615_v9 = vpop.f32.mrb[56].mxu0  ;;  %5253 = vmatprep.subr.bf16.mxu1 %v5628_v21 }
 0x167   :  { %v4679_v42 = vpop.f32.mrb[56].mxu1  ;;  %v4616_v46 = vpop.f32.mrb[57].mxu0 }
 0x168   :  { %v4617_v61 = vadd.f32 %v4616_v46, %v4615_v9  ;;  %v4680_v47 = vpop.f32.mrb[57].mxu1  ;;  %v4618_v49 = vpop.f32.mrb[58].mxu0 }
 0x169   :  { %v4681_v6 = vadd.f32 %v4680_v47, %v4679_v42  ;;  %v4682_v13 = vpop.f32.mrb[58].mxu1  ;;  %v4619_v24 = vpop.f32.mrb[59].mxu0  ;;  %5254 = vmatpush3.bf16.msra.mxu1 %v5628_v21  ;;  %v5703_v47 = vld [vmem:[%s7648_s1 + $0x15c] ss:$52 sps:$4 sm:$0xff]  }
 0x16a   :  { %v1853_v53 = vadd.f32 %v4617_v61, %v6811_v39  ;;  %v4620_v54 = vadd.f32 %v4619_v24, %v4618_v49  ;;  %v4683_v35 = vpop.f32.mrb[59].mxu1  ;;  %5255 = vmatprep.subr.bf16.mxu1 %v5632_v41  ;;  %v5697_v39 = vld [vmem:[%s7648_s1 + $0x88] ss:$52 sps:$4 sm:$0xff]   ;;  %v5701_v61 = vld [vmem:[%s7648_s1 + $0xf0] ss:$52 sps:$4 sm:$0xff]  }
 0x16b   :  { %v4684_v62 = vadd.f32 %v4683_v35, %v4682_v13  ;;  %3510 = vmatmul.mubr.bf16.gmra.mrb[164].mxu0 %v5696_v34 }
 0x16c   :  { %v7047_v0 = vadd.f32 %v4681_v6, %v1853_v53  ;;  %v1856_v40 = vadd.f32 %v4620_v54, %v6828_v48  ;;  %3575 = vmatmul.mubr.bf16.gmra.mrb[164].mxu1 %v5697_v39  ;;  %3517 = vmatprep.mubr.bf16.mxu0 %v5698_v55 }
 0x16d   :  { %3582 = vmatprep.mubr.bf16.mxu1 %v5699_v11  ;;  %5256 = vmatpush3.bf16.msra.mxu1 %v5632_v41  ;;  %v5700_v41 = vld [vmem:[%s7648_s1 + $0x288] ss:$52 sps:$4 sm:$0xff]   ;;  %v5704_v11 = vld [vmem:[%s7648_s1 + $0x2f0] ss:$52 sps:$4 sm:$0xff]  }
 0x16e   :  { %v7059_v14 = vadd.f32 %v4684_v62, %v1856_v40  ;;  %v4621_v63 = vpop.f32.mrb[60].mxu0  ;;  %5257 = vmatprep.subr.bf16.mxu1 %v5633_v57 }
 0x16f   :  { %v4685_v48 = vpop.f32.mrb[60].mxu1  ;;  %v4622_v17 = vpop.f32.mrb[61].mxu0 }
 0x170   :  { %v4623_v19 = vadd.f32 %v4622_v17, %v4621_v63  ;;  %v4686_v20 = vpop.f32.mrb[61].mxu1  ;;  %v4624_v21 = vpop.f32.mrb[62].mxu0  ;;  %v5706_v17 = vld [vmem:[%s7648_s1 + $0x2c] ss:$52 sps:$4 sm:$0xff]  }
 0x171   :  { %v4687_v23 = vadd.f32 %v4686_v20, %v4685_v48  ;;  %v4688_v26 = vpop.f32.mrb[62].mxu1  ;;  %v4625_v28 = vpop.f32.mrb[63].mxu0  ;;  %5258 = vmatpush3.bf16.msra.mxu1 %v5633_v57  ;;  %v5705_v48 = vld [vmem:[%s7648_s1 + $0x158] ss:$52 sps:$4 sm:$0xff]  }
 0x172   :  { %v1861_v58 = vadd.f32 %v4623_v19, %v6845_v18  ;;  %v4626_v33 = vadd.f32 %v4625_v28, %v4624_v21  ;;  %v4689_v32 = vpop.f32.mrb[63].mxu1  ;;  %v5702_v18 = vld [vmem:[%s7648_s1 + $0x2f4] ss:$52 sps:$4 sm:$0xff]   ;;  %v5707_v19 = vld [vmem:[%s7648_s1 + $0x1c4] ss:$52 sps:$4 sm:$0xff]  }
 0x173   :  { %v4690_v9 = vadd.f32 %v4689_v32, %v4688_v26  ;;  %3518 = vmatmul.mubr.bf16.gmra.mrb[168].mxu0 %v5700_v41 }
 0x174   :  { %v7065_v42 = vadd.f32 %v4687_v23, %v1861_v58  ;;  %v1864_v46 = vadd.f32 %v4626_v33, %v6860_v25  ;;  %3583 = vmatmul.mubr.bf16.gmra.mrb[168].mxu1 %v5701_v61  ;;  %3525 = vmatprep.mubr.bf16.mxu0 %v5702_v18 }
 0x175   :  { %3590 = vmatprep.mubr.bf16.mxu1 %v5703_v47  ;;  %v5708_v47 = vld [vmem:[%s7648_s1 + $0x28] ss:$52 sps:$4 sm:$0xff]  }
 0x176   :  { %v7077_v49 = vadd.f32 %v4690_v9, %v1864_v46  ;;  %v4707_v6 = vpop.f32.mrb[64].mxu0 }
 0x177   :  { %v4771_v13 = vpop.f32.mrb[64].mxu1  ;;  %v4708_v25 = vpop.f32.mrb[65].mxu0 }
 0x178   :  { %v4709_v24 = vadd.f32 %v4708_v25, %v4707_v6  ;;  %v4772_v53 = vpop.f32.mrb[65].mxu1  ;;  %v4710_v54 = vpop.f32.mrb[66].mxu0  ;;  %v5710_v25 = vld [vmem:[%s7648_s1 + $0x94] ss:$52 sps:$4 sm:$0xff]  }
 0x179   :  { %v4773_v35 = vadd.f32 %v4772_v53, %v4771_v13  ;;  %v4774_v57 = vpop.f32.mrb[66].mxu1  ;;  %v4711_v62 = vpop.f32.mrb[67].mxu0  ;;  %v5709_v13 = vld [vmem:[%s7648_s1 + $0x1c0] ss:$52 sps:$4 sm:$0xff]  }
 0x17a   :  { %v1999_v34 = vadd.f32 %v4709_v24, %v6875_v60  ;;  %v4712_v40 = vadd.f32 %v4711_v62, %v4710_v54  ;;  %v4775_v39 = vpop.f32.mrb[67].mxu1  ;;  %v5711_v24 = vld [vmem:[%s7648_s1 + $0x22c] ss:$52 sps:$4 sm:$0xff]  }
 0x17b   :  { %v4776_v55 = vadd.f32 %v4775_v39, %v4774_v57  ;;  %3526 = vmatmul.mubr.bf16.gmra.mrb[172].mxu0 %v5704_v11 }
 0x17c   :  { %v2002_v63 = vadd.f32 %v4712_v40, %v6890_v7  ;;  %3591 = vmatmul.mubr.bf16.gmra.mrb[172].mxu1 %v5705_v48  ;;  %3663 = vmatprep.mubr.bf16.mxu0 %v5706_v17  ;;  %v7090_v60 = vadd.f32 %v4773_v35, %v1999_v34 }
 0x17d   :  { %3598 = vmatprep.mubr.bf16.mxu1 %v5707_v19  ;;  %v5712_v19 = vld [vmem:[%s7648_s1 + $0x90] ss:$52 sps:$4 sm:$0xff]  }
 0x17e   :  { %v4713_v20 = vpop.f32.mrb[68].mxu0  ;;  %v7095_v21 = vadd.f32 %v4776_v55, %v2002_v63 }
 0x17f   :  { %v4777_v7 = vpop.f32.mrb[68].mxu1  ;;  %v4714_v23 = vpop.f32.mrb[69].mxu0 }
 0x180   :  { %v4715_v26 = vadd.f32 %v4714_v23, %v4713_v20  ;;  %v4778_v28 = vpop.f32.mrb[69].mxu1  ;;  %v4716_v58 = vpop.f32.mrb[70].mxu0  ;;  %v5714_v23 = vld [vmem:[%s7648_s1 + $0xfc] ss:$52 sps:$4 sm:$0xff]  }
 0x181   :  { %v4779_v33 = vadd.f32 %v4778_v28, %v4777_v7  ;;  %v4780_v32 = vpop.f32.mrb[70].mxu1  ;;  %v4717_v9 = vpop.f32.mrb[71].mxu0  ;;  %v5713_v7 = vld [vmem:[%s7648_s1 + $0x228] ss:$52 sps:$4 sm:$0xff]  }
 0x182   :  { %v2007_v41 = vadd.f32 %v4715_v26, %v6908_v44  ;;  %v4718_v46 = vadd.f32 %v4717_v9, %v4716_v58  ;;  %v4781_v61 = vpop.f32.mrb[71].mxu1  ;;  %v5715_v26 = vld [vmem:[%s7648_s1 + $0x294] ss:$52 sps:$4 sm:$0xff]  }
 0x183   :  { %v4782_v18 = vadd.f32 %v4781_v61, %v4780_v32  ;;  %3664 = vmatmul.mubr.bf16.vlgmr.msra.gmra.mrb[176].mxu0 %v5708_v47 }
 0x184   :  { %v2010_v6 = vadd.f32 %v4718_v46, %v6926_v52  ;;  %3599 = vmatmul.mubr.bf16.gmra.mrb[176].mxu1 %v5709_v13  ;;  %3671 = vmatprep.mubr.bf16.mxu0 %v5710_v25  ;;  %v7108_v44 = vadd.f32 %v4779_v33, %v2007_v41 }
 0x185   :  { %3606 = vmatprep.mubr.bf16.mxu1 %v5711_v24  ;;  %v5716_v24 = vld [vmem:[%s7648_s1 + $0xf8] ss:$52 sps:$4 sm:$0xff]  }
 0x186   :  { %v4719_v53 = vpop.f32.mrb[72].mxu0  ;;  %v7113_v54 = vadd.f32 %v4782_v18, %v2010_v6 }
 0x187   :  { %v4783_v52 = vpop.f32.mrb[72].mxu1  ;;  %v4720_v35 = vpop.f32.mrb[73].mxu0 }
 0x188   :  { %v4721_v57 = vadd.f32 %v4720_v35, %v4719_v53  ;;  %v4784_v62 = vpop.f32.mrb[73].mxu1  ;;  %v4722_v34 = vpop.f32.mrb[74].mxu0  ;;  %v5718_v35 = vld [vmem:[%s7648_s1 + $0x164] ss:$52 sps:$4 sm:$0xff]  }
 0x189   :  { %v4785_v40 = vadd.f32 %v4784_v62, %v4783_v52  ;;  %v4786_v39 = vpop.f32.mrb[74].mxu1  ;;  %v4723_v55 = vpop.f32.mrb[75].mxu0  ;;  %v5717_v52 = vld [vmem:[%s7648_s1 + $0x290] ss:$52 sps:$4 sm:$0xff]  }
 0x18a   :  { %v2015_v11 = vadd.f32 %v4721_v57, %v6938_v22  ;;  %v4724_v63 = vadd.f32 %v4723_v55, %v4722_v34  ;;  %v4787_v48 = vpop.f32.mrb[75].mxu1  ;;  %v5719_v57 = vld [vmem:[%s7648_s1 + $0x2fc] ss:$52 sps:$4 sm:$0xff]  }
 0x18b   :  { %v4788_v17 = vadd.f32 %v4787_v48, %v4786_v39  ;;  %3672 = vmatmul.mubr.bf16.gmra.mrb[180].mxu0 %v5712_v19 }
 0x18c   :  { %v2018_v20 = vadd.f32 %v4724_v63, %v6953_v31  ;;  %3607 = vmatmul.mubr.bf16.gmra.mrb[180].mxu1 %v5713_v7  ;;  %3679 = vmatprep.mubr.bf16.mxu0 %v5714_v23  ;;  %v7126_v22 = vadd.f32 %v4785_v40, %v2015_v11 }
 0x18d   :  { %3614 = vmatprep.mubr.bf16.mxu1 %v5715_v26  ;;  %v5720_v26 = vld [vmem:[%s7648_s1 + $0x160] ss:$52 sps:$4 sm:$0xff]  }
 0x18e   :  { %v4725_v28 = vpop.f32.mrb[76].mxu0  ;;  %v7131_v58 = vadd.f32 %v4788_v17, %v2018_v20 }
 0x18f   :  { %v4789_v31 = vpop.f32.mrb[76].mxu1  ;;  %v4726_v33 = vpop.f32.mrb[77].mxu0 }
 0x190   :  { %v4727_v32 = vadd.f32 %v4726_v33, %v4725_v28  ;;  %v4790_v9 = vpop.f32.mrb[77].mxu1  ;;  %v4728_v41 = vpop.f32.mrb[78].mxu0  ;;  %v5722_v33 = vld [vmem:[%s7648_s1 + $0x1cc] ss:$52 sps:$4 sm:$0xff]  }
 0x191   :  { %v4791_v46 = vadd.f32 %v4790_v9, %v4789_v31  ;;  %v4792_v61 = vpop.f32.mrb[78].mxu1  ;;  %v4729_v18 = vpop.f32.mrb[79].mxu0  ;;  %v5721_v31 = vld [vmem:[%s7648_s1 + $0x2f8] ss:$52 sps:$4 sm:$0xff]  }
 0x192   :  { %v2023_v47 = vadd.f32 %v4727_v32, %v6968_v5  ;;  %v4730_v6 = vadd.f32 %v4729_v18, %v4728_v41  ;;  %v4793_v13 = vpop.f32.mrb[79].mxu1  ;;  %v5723_v32 = vld [vmem:[%s7648_s1 + $0x30] ss:$52 sps:$4 sm:$0xff]  }
 0x193   :  { %v4794_v25 = vadd.f32 %v4793_v13, %v4792_v61  ;;  %3680 = vmatmul.mubr.bf16.gmra.mrb[184].mxu0 %v5716_v24 }
 0x194   :  { %v2026_v53 = vadd.f32 %v4730_v6, %v6983_v16  ;;  %3615 = vmatmul.mubr.bf16.gmra.mrb[184].mxu1 %v5717_v52  ;;  %3687 = vmatprep.mubr.bf16.mxu0 %v5718_v35  ;;  %v7144_v5 = vadd.f32 %v4791_v46, %v2023_v47 }
 0x195   :  { %3622 = vmatprep.mubr.bf16.mxu1 %v5719_v57  ;;  %v5724_v57 = vld [vmem:[%s7648_s1 + $0x1c8] ss:$52 sps:$4 sm:$0xff]  }
 0x196   :  { %v4731_v62 = vpop.f32.mrb[80].mxu0  ;;  %v7149_v34 = vadd.f32 %v4794_v25, %v2026_v53 }
 0x197   :  { %v4795_v16 = vpop.f32.mrb[80].mxu1  ;;  %v4732_v40 = vpop.f32.mrb[81].mxu0 }
 0x198   :  { %v4733_v39 = vadd.f32 %v4732_v40, %v4731_v62  ;;  %v4796_v55 = vpop.f32.mrb[81].mxu1  ;;  %v4734_v11 = vpop.f32.mrb[82].mxu0 }
 0x199   :  { %v4797_v63 = vadd.f32 %v4796_v55, %v4795_v16  ;;  %v4798_v48 = vpop.f32.mrb[82].mxu1  ;;  %v4735_v17 = vpop.f32.mrb[83].mxu0  ;;  %v5725_v16 = vld [vmem:[%s7648_s1 + $0x98] ss:$52 sps:$4 sm:$0xff]  }
 0x19a   :  { %v2031_v19 = vadd.f32 %v4733_v39, %v6998_v51  ;;  %v4736_v20 = vadd.f32 %v4735_v17, %v4734_v11  ;;  %v4799_v7 = vpop.f32.mrb[83].mxu1  ;;  %v5727_v39 = vld [vmem:[%s7648_s1 + $0x100] ss:$52 sps:$4 sm:$0xff]  }
 0x19b   :  { %v4800_v23 = vadd.f32 %v4799_v7, %v4798_v48  ;;  %3688 = vmatmul.mubr.bf16.gmra.mrb[188].mxu0 %v5720_v26 }
 0x19c   :  { %v2034_v28 = vadd.f32 %v4736_v20, %v7013_v56  ;;  %3623 = vmatmul.mubr.bf16.gmra.mrb[188].mxu1 %v5721_v31  ;;  %3695 = vmatprep.mubr.bf16.mxu0 %v5722_v33  ;;  %v7162_v51 = vadd.f32 %v4797_v63, %v2031_v19 }
 0x19d   :  { %5259 = vmatprep.mubr.msk.bf16.mxu1 %vm1551_vm0, %v5723_v32  ;;  %v5728_v32 = vld [vmem:[%s7648_s1 + $0x230] ss:$52 sps:$4 sm:$0xff]  }
 0x19e   :  { %v4737_v9 = vpop.f32.mrb[84].mxu0  ;;  %v7168_v56 = vadd.f32 %v4800_v23, %v2034_v28 }
 0x19f   :  { %v4801_v41 = vpop.f32.mrb[84].mxu1  ;;  %v4738_v46 = vpop.f32.mrb[85].mxu0 }
 0x1a0   :  { %v4739_v61 = vadd.f32 %v4738_v46, %v4737_v9  ;;  %v4802_v18 = vpop.f32.mrb[85].mxu1  ;;  %v4740_v47 = vpop.f32.mrb[86].mxu0 }
 0x1a1   :  { %v4803_v6 = vadd.f32 %v4802_v18, %v4801_v41  ;;  %v4804_v13 = vpop.f32.mrb[86].mxu1  ;;  %v4741_v25 = vpop.f32.mrb[87].mxu0  ;;  %v5729_v41 = vld [vmem:[%s7648_s1 + $0x168] ss:$52 sps:$4 sm:$0xff]  }
 0x1a2   :  { %v2039_v24 = vadd.f32 %v4739_v61, %v7022_v27  ;;  %v4742_v53 = vadd.f32 %v4741_v25, %v4740_v47  ;;  %v4805_v52 = vpop.f32.mrb[87].mxu1  ;;  %v5726_v27 = vld [vmem:[%s7648_s1 + $0x234] ss:$52 sps:$4 sm:$0xff]   ;;  %v5731_v61 = vld [vmem:[%s7648_s1 + $0x1d0] ss:$52 sps:$4 sm:$0xff]  }
 0x1a3   :  { %v4806_v35 = vadd.f32 %v4805_v52, %v4804_v13  ;;  %3696 = vmatmul.mubr.bf16.gmra.mrb[192].mxu0 %v5724_v57 }
 0x1a4   :  { %v2042_v62 = vadd.f32 %v4742_v53, %v7035_v37  ;;  %5260 = vmatmul.mubr.msk.bf16.vlgmr.msra.gmra.mrb[192].mxu1 %vm1551_vm0, %v5725_v16  ;;  %3703 = vmatprep.mubr.bf16.mxu0 %v5726_v27  ;;  %v7182_v40 = vadd.f32 %v4803_v6, %v2039_v24 }
 0x1a5   :  { %5263 = vmatprep.mubr.msk.bf16.mxu1 %vm1551_vm0, %v5727_v39  ;;  %v5732_v39 = vld [vmem:[%s7648_s1 + $0x298] ss:$52 sps:$4 sm:$0xff]  }
 0x1a6   :  { %v4743_v37 = vpop.f32.mrb[88].mxu0  ;;  %v7188_v55 = vadd.f32 %v4806_v35, %v2042_v62 }
 0x1a7   :  { %v4807_v11 = vpop.f32.mrb[88].mxu1  ;;  %v4744_v63 = vpop.f32.mrb[89].mxu0 }
 0x1a8   :  { %v4745_v48 = vadd.f32 %v4744_v63, %v4743_v37  ;;  %v4808_v17 = vpop.f32.mrb[89].mxu1  ;;  %v4746_v19 = vpop.f32.mrb[90].mxu0 }
 0x1a9   :  { %v4809_v20 = vadd.f32 %v4808_v17, %v4807_v11  ;;  %v4810_v7 = vpop.f32.mrb[90].mxu1  ;;  %v4747_v23 = vpop.f32.mrb[91].mxu0  ;;  %v5733_v11 = vld [vmem:[%s7648_s1 + $0x238] ss:$52 sps:$4 sm:$0xff]  }
 0x1aa   :  { %v2047_v26 = vadd.f32 %v4745_v48, %v7047_v0  ;;  %v4748_v28 = vadd.f32 %v4747_v23, %v4746_v19  ;;  %v4811_v31 = vpop.f32.mrb[91].mxu1  ;;  %v5730_v0 = vld [vmem:[%s7648_s1 + $0x29c] ss:$52 sps:$4 sm:$0xff]   ;;  %v5735_v48 = vld [vmem:[%s7648_s1 + $0x2a0] ss:$52 sps:$4 sm:$0xff]  }
 0x1ab   :  { %v4812_v33 = vadd.f32 %v4811_v31, %v4810_v7  ;;  %3704 = vmatmul.mubr.bf16.gmra.mrb[196].mxu0 %v5728_v32  ;;  %v7235_v31 = vld [vmem:[%s7650_s3] sm:$0xff] }
 0x1ac   :  { %v2050_v9 = vadd.f32 %v4748_v28, %v7059_v14  ;;  %5264 = vmatmul.mubr.msk.bf16.gmra.mrb[196].mxu1 %vm1551_vm0, %v5729_v41  ;;  %3711 = vmatprep.mubr.bf16.mxu0 %v5730_v0  ;;  %v7202_v46 = vadd.f32 %v4809_v20, %v2047_v26 }
 0x1ad   :  { %5267 = vmatprep.mubr.msk.bf16.mxu1 %vm1551_vm0, %v5731_v61 }
 0x1ae   :  { %v4749_v14 = vpop.f32.mrb[92].mxu0  ;;  %v7208_v18 = vadd.f32 %v4812_v33, %v2050_v9 }
 0x1af   :  { %v4813_v47 = vpop.f32.mrb[92].mxu1  ;;  %v4750_v6 = vpop.f32.mrb[93].mxu0 }
 0x1b0   :  { %v4751_v13 = vadd.f32 %v4750_v6, %v4749_v14  ;;  %v4814_v25 = vpop.f32.mrb[93].mxu1  ;;  %v4752_v24 = vpop.f32.mrb[94].mxu0  ;;  %v7249_v6 = vld [vmem:[%s7650_s3 + $0x8] sm:$0xff] }
 0x1b1   :  { %v4815_v53 = vadd.f32 %v4814_v25, %v4813_v47  ;;  %v4816_v52 = vpop.f32.mrb[94].mxu1  ;;  %v4753_v35 = vpop.f32.mrb[95].mxu0  ;;  %v7260_v25 = vld [vmem:[%s7650_s3 + $0x18] sm:$0xff] }
 0x1b2   :  { %v2055_v57 = vadd.f32 %v4751_v13, %v7065_v42  ;;  %v4754_v62 = vadd.f32 %v4753_v35, %v4752_v24  ;;  %v4817_v16 = vpop.f32.mrb[95].mxu1  ;;  %v5734_v42 = vld [vmem:[%s7648_s1 + $0x304] ss:$52 sps:$4 sm:$0xff]  }
 0x1b3   :  { %v4818_v27 = vadd.f32 %v4817_v16, %v4816_v52  ;;  %3712 = vmatmul.mubr.bf16.gmra.mrb[200].mxu0 %v5732_v39 }
 0x1b4   :  { %v2058_v37 = vadd.f32 %v4754_v62, %v7077_v49  ;;  %5268 = vmatmul.mubr.msk.bf16.gmra.mrb[200].mxu1 %vm1551_vm0, %v5733_v11  ;;  %3719 = vmatprep.mubr.bf16.mxu0 %v5734_v42  ;;  %v7222_v63 = vadd.f32 %v4815_v53, %v2055_v57  ;;  %v5737_v53 = vld [vmem:[%s7648_s1 + $0x308] ss:$52 sps:$4 sm:$0xff]  }
 0x1b5   :  { %5271 = vmatprep.mubr.msk.bf16.mxu1 %vm1551_vm0, %v5735_v48 }
 0x1b6   :  { %v5237_v49 = vpop.f32.mrb[96].mxu0  ;;  %v7228_v17 = vadd.f32 %v4818_v27, %v2058_v37 }
 0x1b7   :  { %v2201_v19 = vadd.f32 %v5237_v49, %v7108_v44  ;;  %v4847_v20 = vpop.f32.mrb[96].mxu1  ;;  %v2192_v7 = vpop.f32.mrb[97].mxu0 }
 0x1b8   :  { %v2193_v23 = vadd.f32 %v2192_v7, %v7090_v60  ;;  %v4848_v26 = vpop.f32.mrb[97].mxu1  ;;  %v5238_v28 = vpop.f32.mrb[98].mxu0  ;;  %v7244_v60 = vld [vmem:[%s7650_s3 + $0x10] sm:$0xff] }
 0x1b9   :  { %v7237_v33 = vadd.f32 %v4848_v26, %v4847_v20  ;;  %v2204_v32 = vadd.f32 %v5238_v28, %v7113_v54  ;;  %v4850_v9 = vpop.f32.mrb[98].mxu1  ;;  %v2195_v41 = vpop.f32.mrb[99].mxu0  ;;  %v2257_v0 = vmax.f32 %v2201_v19, 0.0  ;;  %v5736_v54 = vld [vmem:[%s7648_s1 + $0x300] ss:$52 sps:$4 sm:$0xff]  }
 0x1ba   :  { %v2255_v61 = vmax.f32 %v2193_v23, 0.0  ;;  %v2196_v44 = vadd.f32 %v2195_v41, %v7095_v21  ;;  %v4851_v14 = vpop.f32.mrb[99].mxu1  ;;  %v7276_v20 = vld [vmem:[%s7650_s3 + $0x20] sm:$0xff] }
 0x1bb   :  { %v2258_v47 = vmax.f32 %v2204_v32, 0.0  ;;  %v7251_v13 = vadd.f32 %v4851_v14, %v4850_v9  ;;  %3720 = vmatmul.mubr.bf16.gmra.mrb[204].mxu0 %v5736_v54  ;;  %v2289_v52 = vmul.f32 %v7244_v60, %v2257_v0 }
 0x1bc   :  { %v2287_v21 = vmul.f32 %v7235_v31, %v2255_v61  ;;  %v2256_v24 = vmax.f32 %v2196_v44, 0.0  ;;  %5272 = vmatmul.mubr.msk.bf16.gmra.mrb[204].mxu1 %vm1551_vm0, %v5737_v53  ;;  %v7287_v44 = vld [vmem:[%s7650_s3 + $0x30] sm:$0xff] }
 0x1bd   :  { %v2290_v62 = vmul.f32 %v7260_v25, %v2258_v47  ;;  %v2307_v28 = vsel %vm2303_vm1, %v2289_v52, 0.0 }
 0x1be   :  { %v2288_v35 = vmul.f32 %v7249_v6, %v2256_v24  ;;  %v5241_v57 = vpop.f32.mrb[100].mxu0  ;;  %v2304_v37 = vsel %vm2303_vm1, %v2287_v21, 0.0  ;;  %v7300_v24 = vld [vmem:[%s7650_s3 + $0x38] sm:$0xff] }
 0x1bf   :  { %v2217_v16 = vadd.f32 %v5241_v57, %v7144_v5  ;;  %v4853_v27 = vpop.f32.mrb[100].mxu1  ;;  %v2208_v39 = vpop.f32.mrb[101].mxu0  ;;  %v2309_v0 = vsel %vm2303_vm1, %v2290_v62, 0.0 }
 0x1c0   :  { %v2305_v11 = vsel %vm2303_vm1, %v2288_v35, 0.0  ;;  %v2209_v42 = vadd.f32 %v2208_v39, %v7126_v22  ;;  %v4854_v48 = vpop.f32.mrb[101].mxu1  ;;  %v5242_v49 = vpop.f32.mrb[102].mxu0 }
 0x1c1   :  { %v2306_v19 = vadd.f32 %v2305_v11, %v2304_v37  ;;  %v7278_v7 = vadd.f32 %v4854_v48, %v4853_v27  ;;  %v2220_v5 = vadd.f32 %v5242_v49, %v7149_v34  ;;  %v4856_v23 = vpop.f32.mrb[102].mxu1  ;;  %v2211_v26 = vpop.f32.mrb[103].mxu0  ;;  %v2261_v32 = vmax.f32 %v2217_v16, 0.0  ;;  %v7292_v34 = vld [vmem:[%s7650_s3 + $0x28] sm:$0xff] }
 0x1c2   :  { %v2259_v9 = vmax.f32 %v2209_v42, 0.0  ;;  %v2212_v22 = vadd.f32 %v2211_v26, %v7131_v58  ;;  %v4857_v41 = vpop.f32.mrb[103].mxu1 }
 0x1c3   :  { %v2308_v61 = vadd.f32 %v2307_v28, %v2306_v19  ;;  %v2262_v47 = vmax.f32 %v2220_v5, 0.0  ;;  %v7295_v21 = vadd.f32 %v4857_v41, %v4856_v23  ;;  %v2293_v53 = vmul.f32 %v7287_v44, %v2261_v32  ;;  %v7312_v5 = vld [vmem:[%s7650_s3 + $0x40] sm:$0xff] }
 0x1c4   :  { %v2291_v14 = vmul.f32 %v7276_v20, %v2259_v9  ;;  %v2260_v54 = vmax.f32 %v2212_v22, 0.0 }
 0x1c5   :  { %v2310_v58 = vadd.f32 %v2309_v0, %v2308_v61  ;;  %v2294_v37 = vmul.f32 %v7300_v24, %v2262_v47  ;;  %v2315_v32 = vsel %vm2303_vm1, %v2293_v53, 0.0  ;;  %v7322_v61 = vld [vmem:[%s7650_s3 + $0x50] sm:$0xff] }
 0x1c6   :  { %v2311_v52 = vsel %vm2303_vm1, %v2291_v14, 0.0  ;;  %v2292_v35 = vmul.f32 %v7292_v34, %v2260_v54  ;;  %v5245_v57 = vpop.f32.mrb[104].mxu0 }
 0x1c7   :  { %v2312_v62 = vadd.f32 %v2311_v52, %v2310_v58  ;;  %v2233_v16 = vadd.f32 %v5245_v57, %v7182_v40  ;;  %v4859_v27 = vpop.f32.mrb[104].mxu1  ;;  %v2224_v39 = vpop.f32.mrb[105].mxu0  ;;  %v2317_v47 = vsel %vm2303_vm1, %v2294_v37, 0.0 }
 0x1c8   :  { %v2313_v11 = vsel %vm2303_vm1, %v2292_v35, 0.0  ;;  %v2225_v42 = vadd.f32 %v2224_v39, %v7162_v51  ;;  %v4860_v48 = vpop.f32.mrb[105].mxu1  ;;  %v5246_v49 = vpop.f32.mrb[106].mxu0 }
 0x1c9   :  { %v2314_v19 = vadd.f32 %v2313_v11, %v2312_v62  ;;  %v7314_v23 = vadd.f32 %v4860_v48, %v4859_v27  ;;  %v2236_v40 = vadd.f32 %v5246_v49, %v7188_v55  ;;  %v4862_v26 = vpop.f32.mrb[106].mxu1  ;;  %v2227_v28 = vpop.f32.mrb[107].mxu0  ;;  %v2265_v9 = vmax.f32 %v2233_v16, 0.0  ;;  %v7327_v55 = vld [vmem:[%s7650_s3 + $0x48] sm:$0xff] }
 0x1ca   :  { %v2263_v22 = vmax.f32 %v2225_v42, 0.0  ;;  %v2228_v51 = vadd.f32 %v2227_v28, %v7168_v56  ;;  %v4863_v41 = vpop.f32.mrb[107].mxu1  ;;  %v7334_v56 = vld [vmem:[%s7650_s3 + $0x58] sm:$0xff]  ;;  %v7348_v28 = vld [vmem:[%s7650_s3 + $0x60] sm:$0xff] }
 0x1cb   :  { %v2316_v0 = vadd.f32 %v2315_v32, %v2314_v19  ;;  %v2266_v14 = vmax.f32 %v2236_v40, 0.0  ;;  %v7336_v53 = vadd.f32 %v4863_v41, %v4862_v26  ;;  %v2297_v35 = vmul.f32 %v7322_v61, %v2265_v9 }
 0x1cc   :  { %v2295_v54 = vmul.f32 %v7312_v5, %v2263_v22  ;;  %v2264_v58 = vmax.f32 %v2228_v51, 0.0 }
 0x1cd   :  { %v2318_v52 = vadd.f32 %v2317_v47, %v2316_v0  ;;  %v2298_v39 = vmul.f32 %v7334_v56, %v2266_v14  ;;  %v2323_v51 = vsel %vm2303_vm1, %v2297_v35, 0.0 }
 0x1ce   :  { %v2319_v57 = vsel %vm2303_vm1, %v2295_v54, 0.0  ;;  %v2296_v62 = vmul.f32 %v7327_v55, %v2264_v58  ;;  %v5249_v16 = vpop.f32.mrb[108].mxu0  ;;  %v7359_v58 = vld [vmem:[%s7650_s3 + $0x70] sm:$0xff] }
 0x1cf   :  { %v2320_v27 = vadd.f32 %v2319_v57, %v2318_v52  ;;  %v2249_v37 = vadd.f32 %v5249_v16, %v7222_v63  ;;  %v4865_v11 = vpop.f32.mrb[108].mxu1  ;;  %v2240_v42 = vpop.f32.mrb[109].mxu0  ;;  %v2325_v47 = vsel %vm2303_vm1, %v2298_v39, 0.0  ;;  %v7372_v16 = vld [vmem:[%s7650_s3 + $0x78] sm:$0xff] }
 0x1d0   :  { %v2321_v48 = vsel %vm2303_vm1, %v2296_v62, 0.0  ;;  %v2241_v49 = vadd.f32 %v2240_v42, %v7202_v46  ;;  %v4866_v19 = vpop.f32.mrb[109].mxu1  ;;  %v5250_v40 = vpop.f32.mrb[110].mxu0 }
 0x1d1   :  { %v2322_v26 = vadd.f32 %v2321_v48, %v2320_v27  ;;  %v7350_v32 = vadd.f32 %v4866_v19, %v4865_v11  ;;  %v2252_v9 = vadd.f32 %v5250_v40, %v7228_v17  ;;  %v4868_v22 = vpop.f32.mrb[110].mxu1  ;;  %v2243_v63 = vpop.f32.mrb[111].mxu0  ;;  %v2269_v41 = vmax.f32 %v2249_v37, 0.0  ;;  %v7364_v17 = vld [vmem:[%s7650_s3 + $0x68] sm:$0xff] }
 0x1d2   :  { %v2267_v0 = vmax.f32 %v2241_v49, 0.0  ;;  %v2244_v46 = vadd.f32 %v2243_v63, %v7208_v18  ;;  %v4869_v14 = vpop.f32.mrb[111].mxu1  ;;  %v3181_v19 = vadd.f32 %v7237_v33, %v6545_v2 }
 0x1d3   :  { %v2324_v54 = vadd.f32 %v2323_v51, %v2322_v26  ;;  %v2270_v35 = vmax.f32 %v2252_v9, 0.0  ;;  %v7367_v62 = vadd.f32 %v4869_v14, %v4868_v22  ;;  %v2301_v27 = vmul.f32 %v7359_v58, %v2269_v41 }
 0x1d4   :  { %v2299_v52 = vmul.f32 %v7348_v28, %v2267_v0  ;;  %v2268_v57 = vmax.f32 %v2244_v46, 0.0  ;;  %v3184_v14 = vadd.f32 %v7251_v13, %v6570_v10  ;;  %v3189_v10 = vadd.f32 %v7278_v7, %v6581_v15 }
 0x1d5   :  { %v2326_v18 = vadd.f32 %v2325_v47, %v2324_v54  ;;  %v2302_v40 = vmul.f32 %v7372_v16, %v2270_v35  ;;  %v2331_v2 = vsel %vm2303_vm1, %v2301_v27, 0.0  ;;  %v3197_v15 = vadd.f32 %v7314_v23, %v6650_v1 }
 0x1d6   :  { %v2327_v39 = vsel %vm2303_vm1, %v2299_v52, 0.0  ;;  %v2300_v37 = vmul.f32 %v7364_v17, %v2268_v57  ;;  %v4911_v11 = vpop.f32.mrb[112].mxu0 }
 0x1d7   :  { %v2328_v42 = vadd.f32 %v2327_v39, %v2326_v18  ;;  %v4871_v48 = vpop.f32.mrb[112].mxu1  ;;  %v4912_v49 = vpop.f32.mrb[113].mxu0  ;;  %v2333_v18 = vsel %vm2303_vm1, %v2302_v40, 0.0 }
 0x1d8   :  { %v2329_v26 = vsel %vm2303_vm1, %v2300_v37, 0.0  ;;  %v4872_v9 = vpop.f32.mrb[113].mxu1  ;;  %v4913_v22 = vadd.f32 %v4912_v49, %v4911_v11  ;;  %v4914_v63 = vpop.f32.mrb[114].mxu0 }
 0x1d9   :  { %v7381_v51 = vadd.f32 %v4872_v9, %v4871_v48  ;;  %v4874_v41 = vpop.f32.mrb[114].mxu1  ;;  %v4915_v0 = vpop.f32.mrb[115].mxu0  ;;  %v2330_v46 = vadd.f32 %v2329_v26, %v2328_v42  ;;  %v3192_v9 = vadd.f32 %v7295_v21, %v6623_v43  ;;  %v3200_v21 = vadd.f32 %v7336_v53, %v6663_v8 }
 0x1da   :  { %v7385_v47 = vadd.f32 %v4913_v22, %v3181_v19  ;;  %v4875_v54 = vpop.f32.mrb[115].mxu1  ;;  %v4916_v52 = vadd.f32 %v4915_v0, %v4914_v63 }
 0x1db   :  { %v7388_v33 = vadd.f32 %v4875_v54, %v4874_v41  ;;  %v2332_v35 = vadd.f32 %v2331_v2, %v2330_v46 }
 0x1dc   :  { %v7390_v57 = vadd.f32 %v4916_v52, %v3184_v14 }
 0x1dd   :  { %v2334_v39 = vadd.f32 %v2333_v18, %v2332_v35 }
 0x1de   :  { %v4917_v37 = vpop.f32.mrb[116].mxu0 }
 0x1df   :  { %v4877_v11 = vpop.f32.mrb[116].mxu1  ;;  %v4918_v42 = vpop.f32.mrb[117].mxu0  ;;  %2335 = vadd.xlane.f32.xlu0 %v2334_v39 }
 0x1e0   :  { %v4878_v13 = vpop.f32.mrb[117].mxu1  ;;  %v4919_v48 = vadd.f32 %v4918_v42, %v4917_v37  ;;  %v4920_v49 = vpop.f32.mrb[118].mxu0 }
 0x1e1   :  { %v4879_v19 = vadd.f32 %v4878_v13, %v4877_v11  ;;  %v4880_v27 = vpop.f32.mrb[118].mxu1  ;;  %v4921_v26 = vpop.f32.mrb[119].mxu0 }
 0x1e2   :  { %v7397_v22 = vadd.f32 %v4919_v48, %v3189_v10  ;;  %v4881_v40 = vpop.f32.mrb[119].mxu1  ;;  %v4922_v63 = vadd.f32 %v4921_v26, %v4920_v49  ;;  %v3205_v48 = vadd.f32 %v7350_v32, %v6684_v30 }
 0x1e3   :  { %v4882_v41 = vadd.f32 %v4881_v40, %v4880_v27  ;;  %v3208_v40 = vadd.f32 %v7367_v62, %v6694_v36  ;;  %v3216_v62 = vadd.f32 %v7388_v33, %v6728_v3 }
 0x1e4   :  { %v7399_v0 = vadd.f32 %v4922_v63, %v3192_v9 }
 0x1e6   :  { %v4923_v46 = vpop.f32.mrb[120].mxu0 }
 0x1e7   :  { %v4883_v14 = vpop.f32.mrb[120].mxu1  ;;  %v4924_v54 = vpop.f32.mrb[121].mxu0 }
 0x1e8   :  { %v4884_v7 = vpop.f32.mrb[121].mxu1  ;;  %v4925_v52 = vadd.f32 %v4924_v54, %v4923_v46  ;;  %v4926_v2 = vpop.f32.mrb[122].mxu0 }
 0x1e9   :  { %v7403_v35 = vadd.f32 %v4884_v7, %v4883_v14  ;;  %v4886_v18 = vpop.f32.mrb[122].mxu1  ;;  %v4927_v43 = vpop.f32.mrb[123].mxu0 }
 0x1ea   :  { %v7407_v39 = vadd.f32 %v4925_v52, %v3197_v15  ;;  %v4887_v37 = vpop.f32.mrb[123].mxu1  ;;  %v4928_v11 = vadd.f32 %v4927_v43, %v4926_v2  ;;  %v3213_v52 = vadd.f32 %v7381_v51, %v6718_v59 }
 0x1eb   :  { %v7409_v42 = vadd.f32 %v4887_v37, %v4886_v18 }
 0x1ec   :  { %v7411_v10 = vadd.f32 %v4928_v11, %v3200_v21 }
 0x1ee   :  { %v4929_v13 = vpop.f32.mrb[124].mxu0 }
 0x1ef   :  { %v4889_v1 = vpop.f32.mrb[124].mxu1  ;;  %v4930_v23 = vpop.f32.mrb[125].mxu0 }
 0x1f0   :  { %v4890_v49 = vpop.f32.mrb[125].mxu1  ;;  %v4931_v27 = vadd.f32 %v4930_v23, %v4929_v13  ;;  %v4932_v26 = vpop.f32.mrb[126].mxu0 }
 0x1f1   :  { %v7415_v9 = vadd.f32 %v4890_v49, %v4889_v1  ;;  %v4892_v8 = vpop.f32.mrb[126].mxu1  ;;  %v4933_v53 = vpop.f32.mrb[127].mxu0 }
 0x1f2   :  { %v7419_v63 = vadd.f32 %v4931_v27, %v3205_v48  ;;  %v4893_v46 = vpop.f32.mrb[127].mxu1  ;;  %v4934_v14 = vadd.f32 %v4933_v53, %v4932_v26 }
 0x1f3   :  { %v7421_v54 = vadd.f32 %v4893_v46, %v4892_v8  ;;  %v3221_v8 = vadd.f32 %v4879_v19, %v6752_v29 }
 0x1f4   :  { %v7423_v15 = vadd.f32 %v4934_v14, %v3208_v40 }
 0x1f6   :  { %v4935_v7 = vpop.f32.mrb[128].mxu0 }
 0x1f7   :  { %v4975_v30 = vpop.f32.mrb[128].mxu1  ;;  %v4936_v32 = vpop.f32.mrb[129].mxu0 }
 0x1f8   :  { %v4937_v2 = vadd.f32 %v4936_v32, %v4935_v7  ;;  %v4976_v18 = vpop.f32.mrb[129].mxu1  ;;  %v4938_v43 = vpop.f32.mrb[130].mxu0 }
 0x1f9   :  { %v4977_v21 = vadd.f32 %v4976_v18, %v4975_v30  ;;  %v4978_v37 = vpop.f32.mrb[130].mxu1  ;;  %v4939_v36 = vpop.f32.mrb[131].mxu0 }
 0x1fa   :  { %v7429_v11 = vadd.f32 %v4937_v2, %v3213_v52  ;;  %v4940_v13 = vadd.f32 %v4939_v36, %v4938_v43  ;;  %v4979_v1 = vpop.f32.mrb[131].mxu1 }
 0x1fb   :  { %v7432_v23 = vadd.f32 %v4977_v21, %v7385_v47  ;;  %v4980_v48 = vadd.f32 %v4979_v1, %v4978_v37  ;;  %v3224_v47 = vadd.f32 %v4882_v41, %v6762_v38  ;;  %v3229_v21 = vadd.f32 %v7403_v35, %v6786_v4 }
 0x1fc   :  { %v7434_v49 = vadd.f32 %v4940_v13, %v3216_v62 }
 0x1fd   :  { %v7437_v59 = vadd.f32 %v4980_v48, %v7390_v57 }
 0x1fe   :  { %v4941_v51 = vpop.f32.mrb[132].mxu0 }
 0x1ff   :  { %v4981_v27 = vpop.f32.mrb[132].mxu1  ;;  %v4942_v26 = vpop.f32.mrb[133].mxu0 }
 0x200   :  { %v4943_v53 = vadd.f32 %v4942_v26, %v4941_v51  ;;  %v4982_v3 = vpop.f32.mrb[133].mxu1  ;;  %v4944_v33 = vpop.f32.mrb[134].mxu0 }
 0x201   :  { %v4983_v40 = vadd.f32 %v4982_v3, %v4981_v27  ;;  %v4984_v46 = vpop.f32.mrb[134].mxu1  ;;  %v4945_v14 = vpop.f32.mrb[135].mxu0  ;;  %v3237_v3 = vadd.f32 %v7415_v9, %v6820_v45 }
 0x202   :  { %v7441_v7 = vadd.f32 %v4943_v53, %v3221_v8  ;;  %v4946_v30 = vadd.f32 %v4945_v14, %v4944_v33  ;;  %v4985_v32 = vpop.f32.mrb[135].mxu1 }
 0x203   :  { %v7444_v57 = vadd.f32 %v4983_v40, %v7397_v22  ;;  %v4986_v52 = vadd.f32 %v4985_v32, %v4984_v46  ;;  %v3232_v22 = vadd.f32 %v7409_v42, %v6796_v12 }
 0x204   :  { %v7446_v2 = vadd.f32 %v4946_v30, %v3224_v47 }
 0x205   :  { %v7449_v29 = vadd.f32 %v4986_v52, %v7399_v0 }
 0x206   :  { %v4947_v19 = vpop.f32.mrb[136].mxu0 }
 0x207   :  { %v4987_v18 = vpop.f32.mrb[136].mxu1  ;;  %v4948_v43 = vpop.f32.mrb[137].mxu0 }
 0x208   :  { %v4949_v38 = vadd.f32 %v4948_v43, %v4947_v19  ;;  %v4988_v41 = vpop.f32.mrb[137].mxu1  ;;  %v4950_v37 = vpop.f32.mrb[138].mxu0 }
 0x209   :  { %v4989_v36 = vadd.f32 %v4988_v41, %v4987_v18  ;;  %v4990_v62 = vpop.f32.mrb[138].mxu1  ;;  %v4951_v13 = vpop.f32.mrb[139].mxu0 }
 0x20a   :  { %v7455_v1 = vadd.f32 %v4949_v38, %v3229_v21  ;;  %v4952_v48 = vadd.f32 %v4951_v13, %v4950_v37  ;;  %v4991_v0 = vpop.f32.mrb[139].mxu1 }
 0x20b   :  { %v7458_v51 = vadd.f32 %v4989_v36, %v7407_v39  ;;  %v4992_v27 = vadd.f32 %v4991_v0, %v4990_v62  ;;  %v3240_v39 = vadd.f32 %v7421_v54, %v6830_v50 }
 0x20c   :  { %v7460_v26 = vadd.f32 %v4952_v48, %v3232_v22 }
 0x20d   :  { %v7463_v4 = vadd.f32 %v4992_v27, %v7411_v10 }
 0x20e   :  { %v4953_v35 = vpop.f32.mrb[140].mxu0 }
 0x20f   :  { %v4993_v8 = vpop.f32.mrb[140].mxu1  ;;  %v4954_v53 = vpop.f32.mrb[141].mxu0 }
 0x210   :  { %v4955_v12 = vadd.f32 %v4954_v53, %v4953_v35  ;;  %v4994_v42 = vpop.f32.mrb[141].mxu1  ;;  %v4956_v33 = vpop.f32.mrb[142].mxu0 }
 0x211   :  { %v4995_v40 = vadd.f32 %v4994_v42, %v4993_v8  ;;  %v4996_v46 = vpop.f32.mrb[142].mxu1  ;;  %v4957_v14 = vpop.f32.mrb[143].mxu0 }
 0x212   :  { %v7469_v47 = vadd.f32 %v4955_v12, %v3237_v3  ;;  %v4958_v30 = vadd.f32 %v4957_v14, %v4956_v33  ;;  %v4997_v10 = vpop.f32.mrb[143].mxu1 }
 0x213   :  { %v3399_v32 = vadd.f32 %v4995_v40, %v7419_v63  ;;  %v4998_v52 = vadd.f32 %v4997_v10, %v4996_v46 }
 0x214   :  { %v7472_v19 = vadd.f32 %v4958_v30, %v3240_v39 }
 0x215   :  { %v7475_v45 = vadd.f32 %v4998_v52, %v7423_v15 }
 0x216   :  { %v5039_v9 = vpop.f32.mrb[144].mxu0 }
 0x217   :  { %v4999_v18 = vpop.f32.mrb[144].mxu1  ;;  %v5040_v43 = vpop.f32.mrb[145].mxu0 }
 0x218   :  { %v5000_v21 = vpop.f32.mrb[145].mxu1  ;;  %v5041_v38 = vadd.f32 %v5040_v43, %v5039_v9  ;;  %v5042_v41 = vpop.f32.mrb[146].mxu0 }
 0x219   :  { %v5001_v37 = vadd.f32 %v5000_v21, %v4999_v18  ;;  %v5002_v50 = vpop.f32.mrb[146].mxu1  ;;  %v5043_v54 = vpop.f32.mrb[147].mxu0 }
 0x21a   :  { %v7478_v36 = vadd.f32 %v5041_v38, %v7432_v23  ;;  %v5003_v62 = vpop.f32.mrb[147].mxu1  ;;  %v5044_v63 = vadd.f32 %v5043_v54, %v5042_v41 }
 0x21b   :  { %v3407_v13 = vadd.f32 %v5001_v37, %v7429_v11  ;;  %v5004_v22 = vadd.f32 %v5003_v62, %v5002_v50 }
 0x21c   :  { %v7482_v15 = vadd.f32 %v5044_v63, %v7437_v59 }
 0x21d   :  { %v7485_v48 = vadd.f32 %v5004_v22, %v7434_v49 }
 0x21e   :  { %v5045_v0 = vpop.f32.mrb[148].mxu0 }
 0x21f   :  { %v5005_v27 = vpop.f32.mrb[148].mxu1  ;;  %v5046_v35 = vpop.f32.mrb[149].mxu0 }
 0x220   :  { %v5006_v8 = vpop.f32.mrb[149].mxu1  ;;  %v5047_v53 = vadd.f32 %v5046_v35, %v5045_v0  ;;  %v5048_v3 = vpop.f32.mrb[150].mxu0 }
 0x221   :  { %v5007_v12 = vadd.f32 %v5006_v8, %v5005_v27  ;;  %v5008_v23 = vpop.f32.mrb[150].mxu1  ;;  %v5049_v42 = vpop.f32.mrb[151].mxu0 }
 0x222   :  { %v7488_v33 = vadd.f32 %v5047_v53, %v7444_v57  ;;  %v5009_v11 = vpop.f32.mrb[151].mxu1  ;;  %v5050_v40 = vadd.f32 %v5049_v42, %v5048_v3 }
 0x223   :  { %v3415_v59 = vadd.f32 %v5007_v12, %v7441_v7  ;;  %v5010_v46 = vadd.f32 %v5009_v11, %v5008_v23 }
 0x224   :  { %v7492_v49 = vadd.f32 %v5050_v40, %v7449_v29 }
 0x225   :  { %v7495_v14 = vadd.f32 %v5010_v46, %v7446_v2 }
 0x226   :  { %v5051_v39 = vpop.f32.mrb[152].mxu0 }
 0x227   :  { %v5011_v30 = vpop.f32.mrb[152].mxu1  ;;  %v5052_v10 = vpop.f32.mrb[153].mxu0 }
 0x228   :  { %v5012_v52 = vpop.f32.mrb[153].mxu1  ;;  %v5053_v9 = vadd.f32 %v5052_v10, %v5051_v39  ;;  %v5054_v18 = vpop.f32.mrb[154].mxu0 }
 0x229   :  { %v5013_v43 = vadd.f32 %v5012_v52, %v5011_v30  ;;  %v5014_v57 = vpop.f32.mrb[154].mxu1  ;;  %v5055_v21 = vpop.f32.mrb[155].mxu0 }
 0x22a   :  { %v7498_v38 = vadd.f32 %v5053_v9, %v7458_v51  ;;  %v5015_v7 = vpop.f32.mrb[155].mxu1  ;;  %v5056_v41 = vadd.f32 %v5055_v21, %v5054_v18 }
 0x22b   :  { %v3423_v29 = vadd.f32 %v5013_v43, %v7455_v1  ;;  %v5016_v37 = vadd.f32 %v5015_v7, %v5014_v57 }
 0x22c   :  { %v7502_v2 = vadd.f32 %v5056_v41, %v7463_v4 }
 0x22d   :  { %v7505_v50 = vadd.f32 %v5016_v37, %v7460_v26 }
 0x22e   :  { %v5057_v54 = vpop.f32.mrb[156].mxu0 }
 0x22f   :  { %v5017_v62 = vpop.f32.mrb[156].mxu1  ;;  %v5058_v63 = vpop.f32.mrb[157].mxu0 }
 0x230   :  { %v5018_v22 = vpop.f32.mrb[157].mxu1  ;;  %v5059_v0 = vadd.f32 %v5058_v63, %v5057_v54  ;;  %v5060_v27 = vpop.f32.mrb[158].mxu0 }
 0x231   :  { %v5019_v35 = vadd.f32 %v5018_v22, %v5017_v62  ;;  %v5020_v51 = vpop.f32.mrb[158].mxu1  ;;  %v5061_v8 = vpop.f32.mrb[159].mxu0 }
 0x232   :  { %v7507_v53 = vadd.f32 %v5059_v0, %v3399_v32  ;;  %v5021_v3 = vpop.f32.mrb[159].mxu1  ;;  %v5062_v1 = vadd.f32 %v5061_v8, %v5060_v27 }
 0x233   :  { %v3431_v12 = vadd.f32 %v5019_v35, %v7469_v47  ;;  %v5022_v4 = vadd.f32 %v5021_v3, %v5020_v51 }
 0x234   :  { %v7511_v23 = vadd.f32 %v5062_v1, %v7475_v45 }
 0x235   :  { %v7514_v26 = vadd.f32 %v5022_v4, %v7472_v19 }
 0x236   :  { %v5063_v42 = vpop.f32.mrb[160].mxu0 }
 0x237   :  { %v5103_v11 = vpop.f32.mrb[160].mxu1  ;;  %v5064_v40 = vpop.f32.mrb[161].mxu0 }
 0x238   :  { %v5065_v46 = vadd.f32 %v5064_v40, %v5063_v42  ;;  %v5104_v39 = vpop.f32.mrb[161].mxu1  ;;  %v5066_v30 = vpop.f32.mrb[162].mxu0 }
 0x239   :  { %v5105_v10 = vadd.f32 %v5104_v39, %v5103_v11  ;;  %v5106_v32 = vpop.f32.mrb[162].mxu1  ;;  %v5067_v52 = vpop.f32.mrb[163].mxu0 }
 0x23a   :  { %v7516_v9 = vadd.f32 %v5065_v46, %v3407_v13  ;;  %v5068_v18 = vadd.f32 %v5067_v52, %v5066_v30  ;;  %v5107_v47 = vpop.f32.mrb[163].mxu1 }
 0x23b   :  { %v7519_v43 = vadd.f32 %v5105_v10, %v7478_v36  ;;  %v5108_v45 = vadd.f32 %v5107_v47, %v5106_v32 }
 0x23c   :  { %v7522_v19 = vadd.f32 %v5068_v18, %v7485_v48 }
 0x23d   :  { %v7525_v57 = vadd.f32 %v5108_v45, %v7482_v15 }
 0x23e   :  { %v5069_v21 = vpop.f32.mrb[164].mxu0 }
 0x23f   :  { %v5109_v7 = vpop.f32.mrb[164].mxu1  ;;  %v5070_v41 = vpop.f32.mrb[165].mxu0 }
 0x240   :  { %v5071_v37 = vadd.f32 %v5070_v41, %v5069_v21  ;;  %v5110_v54 = vpop.f32.mrb[165].mxu1  ;;  %v5072_v62 = vpop.f32.mrb[166].mxu0 }
 0x241   :  { %v5111_v13 = vadd.f32 %v5110_v54, %v5109_v7  ;;  %v5112_v63 = vpop.f32.mrb[166].mxu1  ;;  %v5073_v22 = vpop.f32.mrb[167].mxu0 }
 0x242   :  { %v7527_v0 = vadd.f32 %v5071_v37, %v3415_v59  ;;  %v5074_v36 = vadd.f32 %v5073_v22, %v5072_v62  ;;  %v5113_v27 = vpop.f32.mrb[167].mxu1 }
 0x243   :  { %v7530_v35 = vadd.f32 %v5111_v13, %v7488_v33  ;;  %v5114_v48 = vadd.f32 %v5113_v27, %v5112_v63 }
 0x244   :  { %v7533_v15 = vadd.f32 %v5074_v36, %v7495_v14 }
 0x245   :  { %v7536_v51 = vadd.f32 %v5114_v48, %v7492_v49 }
 0x246   :  { %v5075_v8 = vpop.f32.mrb[168].mxu0 }
 0x247   :  { %v5115_v3 = vpop.f32.mrb[168].mxu1  ;;  %v5076_v1 = vpop.f32.mrb[169].mxu0 }
 0x248   :  { %v5077_v4 = vadd.f32 %v5076_v1, %v5075_v8  ;;  %v5116_v42 = vpop.f32.mrb[169].mxu1  ;;  %v5078_v11 = vpop.f32.mrb[170].mxu0 }
 0x249   :  { %v5117_v59 = vadd.f32 %v5116_v42, %v5115_v3  ;;  %v5118_v40 = vpop.f32.mrb[170].mxu1  ;;  %v5079_v46 = vpop.f32.mrb[171].mxu0 }
 0x24a   :  { %v7538_v39 = vadd.f32 %v5077_v4, %v3423_v29  ;;  %v5080_v33 = vadd.f32 %v5079_v46, %v5078_v11  ;;  %v5119_v30 = vpop.f32.mrb[171].mxu1 }
 0x24b   :  { %v7541_v10 = vadd.f32 %v5117_v59, %v7498_v38  ;;  %v5120_v14 = vadd.f32 %v5119_v30, %v5118_v40 }
 0x24c   :  { %v7544_v49 = vadd.f32 %v5080_v33, %v7505_v50 }
 0x24d   :  { %v7547_v32 = vadd.f32 %v5120_v14, %v7502_v2 }
 0x24e   :  { %v5081_v52 = vpop.f32.mrb[172].mxu0 }
 0x24f   :  { %v5121_v18 = vpop.f32.mrb[172].mxu1  ;;  %v5082_v47 = vpop.f32.mrb[173].mxu0 }
 0x250   :  { %v5083_v45 = vadd.f32 %v5082_v47, %v5081_v52  ;;  %v5122_v21 = vpop.f32.mrb[173].mxu1  ;;  %v5084_v7 = vpop.f32.mrb[174].mxu0 }
 0x251   :  { %v5123_v29 = vadd.f32 %v5122_v21, %v5121_v18  ;;  %v5124_v41 = vpop.f32.mrb[174].mxu1  ;;  %v5085_v37 = vpop.f32.mrb[175].mxu0 }
 0x252   :  { %v7549_v54 = vadd.f32 %v5083_v45, %v3431_v12  ;;  %v5086_v38 = vadd.f32 %v5085_v37, %v5084_v7  ;;  %v5125_v62 = vpop.f32.mrb[175].mxu1 }
 0x253   :  { %v7552_v13 = vadd.f32 %v5123_v29, %v7507_v53  ;;  %v5126_v50 = vadd.f32 %v5125_v62, %v5124_v41 }
 0x254   :  { %v7555_v2 = vadd.f32 %v5086_v38, %v7514_v26 }
 0x255   :  { %v7558_v63 = vadd.f32 %v5126_v50, %v7511_v23 }
 0x256   :  { %v5167_v22 = vpop.f32.mrb[176].mxu0 }
 0x257   :  { %v5127_v36 = vpop.f32.mrb[176].mxu1  ;;  %v5168_v27 = vpop.f32.mrb[177].mxu0 }
 0x258   :  { %v5128_v48 = vpop.f32.mrb[177].mxu1  ;;  %v5169_v8 = vadd.f32 %v5168_v27, %v5167_v22  ;;  %v5170_v3 = vpop.f32.mrb[178].mxu0 }
 0x259   :  { %v5129_v12 = vadd.f32 %v5128_v48, %v5127_v36  ;;  %v5130_v1 = vpop.f32.mrb[178].mxu1  ;;  %v5171_v4 = vpop.f32.mrb[179].mxu0 }
 0x25a   :  { %v5131_v42 = vpop.f32.mrb[179].mxu1  ;;  %v5172_v11 = vadd.f32 %v5171_v4, %v5170_v3  ;;  %v7561_v53 = vadd.f32 %v5169_v8, %v7519_v43 }
 0x25b   :  { %v7564_v26 = vadd.f32 %v5129_v12, %v7516_v9  ;;  %v5132_v59 = vadd.f32 %v5131_v42, %v5130_v1 }
 0x25c   :  { %v7567_v23 = vadd.f32 %v5172_v11, %v7525_v57 }
 0x25d   :  { %v7570_v40 = vadd.f32 %v5132_v59, %v7522_v19 }
 0x25e   :  { %v5173_v46 = vpop.f32.mrb[180].mxu0 }
 0x25f   :  { %v5133_v33 = vpop.f32.mrb[180].mxu1  ;;  %v5174_v30 = vpop.f32.mrb[181].mxu0 }
 0x260   :  { %v5134_v14 = vpop.f32.mrb[181].mxu1  ;;  %v5175_v52 = vadd.f32 %v5174_v30, %v5173_v46  ;;  %v5176_v18 = vpop.f32.mrb[182].mxu0 }
 0x261   :  { %v5135_v47 = vadd.f32 %v5134_v14, %v5133_v33  ;;  %v5136_v45 = vpop.f32.mrb[182].mxu1  ;;  %v5177_v43 = vpop.f32.mrb[183].mxu0 }
 0x262   :  { %v5137_v21 = vpop.f32.mrb[183].mxu1  ;;  %v5178_v7 = vadd.f32 %v5177_v43, %v5176_v18  ;;  %v3674_v9 = vadd.f32 %v5175_v52, %v7530_v35 }
 0x263   :  { %v7574_v29 = vadd.f32 %v5135_v47, %v7527_v0  ;;  %v5138_v57 = vadd.f32 %v5137_v21, %v5136_v45 }
 0x264   :  { %v3677_v19 = vadd.f32 %v5178_v7, %v7536_v51 }
 0x265   :  { %v7578_v41 = vadd.f32 %v5138_v57, %v7533_v15 }
 0x266   :  { %v5179_v37 = vpop.f32.mrb[184].mxu0 }
 0x267   :  { %v5139_v38 = vpop.f32.mrb[184].mxu1  ;;  %v5180_v62 = vpop.f32.mrb[185].mxu0 }
 0x268   :  { %v5140_v50 = vpop.f32.mrb[185].mxu1  ;;  %v5181_v22 = vadd.f32 %v5180_v62, %v5179_v37  ;;  %v5182_v36 = vpop.f32.mrb[186].mxu0 }
 0x269   :  { %v5141_v27 = vadd.f32 %v5140_v50, %v5139_v38  ;;  %v5142_v48 = vpop.f32.mrb[186].mxu1  ;;  %v5183_v8 = vpop.f32.mrb[187].mxu0 }
 0x26a   :  { %v5143_v3 = vpop.f32.mrb[187].mxu1  ;;  %v5184_v35 = vadd.f32 %v5183_v8, %v5182_v36  ;;  %v3682_v0 = vadd.f32 %v5181_v22, %v7541_v10 }
 0x26b   :  { %v7582_v12 = vadd.f32 %v5141_v27, %v7538_v39  ;;  %v5144_v51 = vadd.f32 %v5143_v3, %v5142_v48 }
 0x26c   :  { %v2336_v1 = vpop.xlane.xlu0 %2335  ;;  %v7585_v15 = vadd.f32 %v5184_v35, %v7547_v32 }
 0x26d   :  { %v7588_v4 = vadd.f32 %v5144_v51, %v7544_v49  ;;  %v2337_v42 = vrot.slane %v2336_v1, 4 }
 0x26e   :  { %v5185_v11 = vpop.f32.mrb[188].mxu0 }
 0x26f   :  { %v2338_v59 = vadd.f32 %v2337_v42, %v2336_v1  ;;  %v5145_v46 = vpop.f32.mrb[188].mxu1  ;;  %v5186_v33 = vpop.f32.mrb[189].mxu0 }
 0x270   :  { %v5146_v30 = vpop.f32.mrb[189].mxu1  ;;  %v5187_v14 = vadd.f32 %v5186_v33, %v5185_v11  ;;  %v5188_v52 = vpop.f32.mrb[190].mxu0 }
 0x271   :  { %v2339_v10 = vrot.slane %v2338_v59, 2  ;;  %v5147_v18 = vadd.f32 %v5146_v30, %v5145_v46  ;;  %v5148_v39 = vpop.f32.mrb[190].mxu1  ;;  %v5189_v47 = vpop.f32.mrb[191].mxu0 }
 0x272   :  { %v5149_v45 = vpop.f32.mrb[191].mxu1  ;;  %v5190_v43 = vadd.f32 %v5189_v47, %v5188_v52  ;;  %v3690_v32 = vadd.f32 %v5187_v14, %v7552_v13 }
 0x273   :  { %v7592_v21 = vadd.f32 %v5147_v18, %v7549_v54  ;;  %v5150_v49 = vadd.f32 %v5149_v45, %v5148_v39  ;;  %v2340_v7 = vadd.f32 %v2339_v10, %v2338_v59 }
 0x274   :  { %v3693_v57 = vadd.f32 %v5190_v43, %v7558_v63 }
 0x275   :  { %v7596_v37 = vadd.f32 %v5150_v49, %v7555_v2  ;;  %v2341_v38 = vrot.slane %v2340_v7, 1 }
 0x276   :  { %v5191_v62 = vpop.f32.mrb[192].mxu0 }
 0x277   :  { %v5261_v50 = vpop.f32.mrb[192].mxu1  ;;  %v5192_v22 = vpop.f32.mrb[193].mxu0  ;;  %v2342_v36 = vadd.f32 %v2341_v38, %v2340_v7 }
 0x278   :  { %v3771_v27 = vadd.f32 %v5261_v50, %v3674_v9  ;;  %v5193_v48 = vadd.f32 %v5192_v22, %v5191_v62  ;;  %v3762_v8 = vpop.f32.mrb[193].mxu1  ;;  %v5194_v3 = vpop.f32.mrb[194].mxu0 }
 0x279   :  { %v3763_v13 = vadd.f32 %v3762_v8, %v7561_v53  ;;  %v5262_v54 = vpop.f32.mrb[194].mxu1  ;;  %5275 = vpush %v2342_v36  ;;  %v5195_v35 = vpop.f32.mrb[195].mxu0 }
 0x27a   :  { %v3774_v51 = vadd.f32 %v5262_v54, %v3677_v19  ;;  %v5196_v1 = vadd.f32 %v5195_v35, %v5194_v3  ;;  %v3765_v63 = vpop.f32.mrb[195].mxu1  ;;  %v3698_v2 = vadd.f32 %v5193_v48, %v7564_v26  ;;  %v3827_v42 = vmax.f32 %v3771_v27, 0.0 }
 0x27b   :  { %v3825_v11 = vmax.f32 %v3763_v13, 0.0  ;;  %v3766_v59 = vadd.f32 %v3765_v63, %v7567_v23 }
 0x27c   :  { %v3701_v46 = vadd.f32 %v5196_v1, %v7570_v40  ;;  %v3828_v33 = vmax.f32 %v3774_v51, 0.0  ;;  %v3843_v53 = vmul.f32 %v3827_v42, %v7244_v60 }
 0x27d   :  { %v3841_v9 = vmul.f32 %v3825_v11, %v7235_v31  ;;  %v3826_v30 = vmax.f32 %v3766_v59, 0.0 }
 0x27e   :  { %v5197_v14 = vpop.f32.mrb[196].mxu0  ;;  %v3844_v23 = vmul.f32 %v3828_v33, %v7260_v25  ;;  %v3860_v50 = vsel %vm2303_vm1, %v3843_v53, 0.0 }
 0x27f   :  { %v3842_v52 = vmul.f32 %v3826_v30, %v7249_v6  ;;  %v5265_v19 = vpop.f32.mrb[196].mxu1  ;;  %v5198_v10 = vpop.f32.mrb[197].mxu0  ;;  %v3857_v45 = vsel %vm2303_vm1, %v3841_v9, 0.0 }
 0x280   :  { %v3787_v18 = vadd.f32 %v5265_v19, %v3690_v32  ;;  %v5199_v39 = vadd.f32 %v5198_v10, %v5197_v14  ;;  %v3778_v26 = vpop.f32.mrb[197].mxu1  ;;  %v5200_v47 = vpop.f32.mrb[198].mxu0  ;;  %v3862_v48 = vsel %vm2303_vm1, %v3844_v23, 0.0 }
 0x281   :  { %v3858_v40 = vsel %vm2303_vm1, %v3842_v52, 0.0  ;;  %v3779_v31 = vadd.f32 %v3778_v26, %v3682_v0  ;;  %v5266_v43 = vpop.f32.mrb[198].mxu1  ;;  %v5201_v49 = vpop.f32.mrb[199].mxu0 }
 0x282   :  { %v3859_v7 = vadd.f32 %v3858_v40, %v3857_v45  ;;  %v3831_v38 = vmax.f32 %v3787_v18, 0.0  ;;  %v3790_v60 = vadd.f32 %v5266_v43, %v3693_v57  ;;  %v5202_v62 = vadd.f32 %v5201_v49, %v5200_v47  ;;  %v3781_v6 = vpop.f32.mrb[199].mxu1 }
 0x283   :  { %v3829_v32 = vmax.f32 %v3779_v31, 0.0  ;;  %v3782_v22 = vadd.f32 %v3781_v6, %v7585_v15  ;;  %v3706_v36 = vadd.f32 %v5199_v39, %v7574_v29 }
 0x284   :  { %v3861_v27 = vadd.f32 %v3860_v50, %v3859_v7  ;;  %v3709_v25 = vadd.f32 %v5202_v62, %v7578_v41  ;;  %v3832_v8 = vmax.f32 %v3790_v60, 0.0  ;;  %v3847_v57 = vmul.f32 %v3831_v38, %v7287_v44 }
 0x285   :  { %v3845_v0 = vmul.f32 %v3829_v32, %v7276_v20  ;;  %v3830_v3 = vmax.f32 %v3782_v22, 0.0 }
 0x286   :  { %v3863_v13 = vadd.f32 %v3862_v48, %v3861_v27  ;;  %v5203_v54 = vpop.f32.mrb[200].mxu0  ;;  %v3848_v59 = vmul.f32 %v3832_v8, %v7300_v24  ;;  %v3868_v30 = vsel %vm2303_vm1, %v3847_v57, 0.0 }
 0x287   :  { %v3864_v35 = vsel %vm2303_vm1, %v3845_v0, 0.0  ;;  %v3846_v51 = vmul.f32 %v3830_v3, %v7292_v34  ;;  %v5269_v15 = vpop.f32.mrb[200].mxu1  ;;  %v5204_v1 = vpop.f32.mrb[201].mxu0 }
 0x288   :  { %v3865_v29 = vadd.f32 %v3864_v35, %v3863_v13  ;;  %v3803_v63 = vadd.f32 %v5269_v15, %v3706_v36  ;;  %v5205_v42 = vadd.f32 %v5204_v1, %v5203_v54  ;;  %v3794_v41 = vpop.f32.mrb[201].mxu1  ;;  %v5206_v11 = vpop.f32.mrb[202].mxu0  ;;  %v3870_v24 = vsel %vm2303_vm1, %v3848_v59, 0.0 }
 0x289   :  { %v3866_v20 = vsel %vm2303_vm1, %v3846_v51, 0.0  ;;  %v3795_v9 = vadd.f32 %v3794_v41, %v3698_v2  ;;  %v5270_v33 = vpop.f32.mrb[202].mxu1  ;;  %v5207_v44 = vpop.f32.mrb[203].mxu0 }
 0x28a   :  { %v3867_v14 = vadd.f32 %v3866_v20, %v3865_v29  ;;  %v3806_v53 = vadd.f32 %v5270_v33, %v3709_v25  ;;  %v5208_v52 = vadd.f32 %v5207_v44, %v5206_v11  ;;  %v3797_v34 = vpop.f32.mrb[203].mxu1  ;;  %v3835_v19 = vmax.f32 %v3803_v63, 0.0 }
 0x28b   :  { %v3833_v10 = vmax.f32 %v3795_v9, 0.0  ;;  %v3798_v18 = vadd.f32 %v3797_v34, %v3701_v46  ;;  %v3714_v39 = vadd.f32 %v5205_v42, %v7582_v12 }
 0x28c   :  { %v3869_v26 = vadd.f32 %v3868_v30, %v3867_v14  ;;  %v3717_v47 = vadd.f32 %v5208_v52, %v7588_v4  ;;  %v3836_v45 = vmax.f32 %v3806_v53, 0.0  ;;  %v3851_v43 = vmul.f32 %v3835_v19, %v7322_v61 }
 0x28d   :  { %v3849_v2 = vmul.f32 %v3833_v10, %v7312_v5  ;;  %v3834_v23 = vmax.f32 %v3798_v18, 0.0 }
 0x28e   :  { %v3871_v40 = vadd.f32 %v3870_v24, %v3869_v26  ;;  %v5209_v31 = vpop.f32.mrb[204].mxu0  ;;  %v3852_v6 = vmul.f32 %v3836_v45, %v7334_v56 }
 0x28f   :  { %v3872_v49 = vsel %vm2303_vm1, %v3849_v2, 0.0  ;;  %v3850_v7 = vmul.f32 %v3834_v23, %v7327_v55  ;;  %v5273_v46 = vpop.f32.mrb[204].mxu1  ;;  %v5210_v38 = vpop.f32.mrb[205].mxu0  ;;  %v3876_v55 = vsel %vm2303_vm1, %v3851_v43, 0.0 }
 0x290   :  { %v3873_v12 = vadd.f32 %v3872_v49, %v3871_v40  ;;  %v5211_v60 = vadd.f32 %v5210_v38, %v5209_v31  ;;  %v3810_v62 = vpop.f32.mrb[205].mxu1  ;;  %v5212_v4 = vpop.f32.mrb[206].mxu0  ;;  %v3878_v56 = vsel %vm2303_vm1, %v3852_v6, 0.0 }
 0x291   :  { %v3874_v5 = vsel %vm2303_vm1, %v3850_v7, 0.0  ;;  %v3811_v50 = vadd.f32 %v3810_v62, %v3714_v39  ;;  %v5274_v32 = vpop.f32.mrb[206].mxu1  ;;  %v5213_v22 = vpop.f32.mrb[207].mxu0 }
 0x292   :  { %v3875_v36 = vadd.f32 %v3874_v5, %v3873_v12  ;;  %v3722_v61 = vadd.f32 %v5211_v60, %v7592_v21  ;;  %v5214_v27 = vadd.f32 %v5213_v22, %v5212_v4  ;;  %v3813_v25 = vpop.f32.mrb[207].mxu1 }
 0x293   :  { %v3837_v48 = vmax.f32 %v3811_v50, 0.0  ;;  %v3814_v0 = vadd.f32 %v3813_v25, %v3717_v47 }
 0x294   :  { %v3877_v8 = vadd.f32 %v3876_v55, %v3875_v36  ;;  %v3819_v3 = vadd.f32 %v5273_v46, %v3722_v61  ;;  %v3725_v57 = vadd.f32 %v5214_v27, %v7596_v37 }
 0x295   :  { %v3853_v13 = vmul.f32 %v3837_v48, %v7348_v28  ;;  %v3838_v54 = vmax.f32 %v3814_v0, 0.0 }
 0x296   :  { %v3839_v35 = vmax.f32 %v3819_v3, 0.0  ;;  %v3879_v51 = vadd.f32 %v3878_v56, %v3877_v8  ;;  %v3822_v15 = vadd.f32 %v5274_v32, %v3725_v57 }
 0x297   :  { %v3880_v21 = vsel %vm2303_vm1, %v3853_v13, 0.0  ;;  %v3854_v1 = vmul.f32 %v3838_v54, %v7364_v17  ;;  %v10_v17 = vstv %s7651_s4 }
 0x298   :  { %v3881_v29 = vadd.f32 %v3880_v21, %v3879_v51  ;;  %v3840_v63 = vmax.f32 %v3822_v15, 0.0  ;;  %v3855_v42 = vmul.f32 %v3839_v35, %v7359_v58  ;;  %11 = vst [vmem:[#allocation2] sm:$0x1] %v10_v17 }
 0x299   :  { %v3882_v41 = vsel %vm2303_vm1, %v3854_v1, 0.0 }
 0x29a   :  { %v3856_v37 = vmul.f32 %v3840_v63, %v7372_v16  ;;  %v3883_v11 = vadd.f32 %v3882_v41, %v3881_v29  ;;  %v3884_v59 = vsel %vm2303_vm1, %v3855_v42, 0.0 }
 0x29c   :  { %v3885_v28 = vadd.f32 %v3884_v59, %v3883_v11  ;;  %v3886_v20 = vsel %vm2303_vm1, %v3856_v37, 0.0 }
 0x29e   :  { %v3887_v9 = vadd.f32 %v3886_v20, %v3885_v28 }
 0x29f   :  { %v4434_v52 = vld [vmem:[#allocation2] ss:$0 sm:$0xff] }
 0x2a0   :  { %3888 = vadd.xlane.f32.xlu1 %v3887_v9 }
 0x2aa   :  { %s5276_s23 = spop %5275 }
 0x2ab   :  { %v2344_v34 = vstv %s5276_s23 }
 0x32d   :  { %v3889_v33 = vpop.xlane.xlu1 %3888 }
 0x32e   :  { %v3890_v44 = vrot.slane %v3889_v33, 4 }
 0x330   :  { %v3891_v58 = vadd.f32 %v3890_v44, %v3889_v33 }
 0x332   :  { %v3892_v30 = vrot.slane %v3891_v58, 2 }
 0x334   :  { %v3893_v14 = vadd.f32 %v3892_v30, %v3891_v58 }
 0x336   :  { %v3894_v53 = vrot.slane %v3893_v14, 1 }
 0x338   :  { %v3895_v16 = vadd.f32 %v3894_v53, %v3893_v14 }
 0x33a   :  { %5277 = vpush %v3895_v16 }
 0x36b   :  { %s5278_s24 = spop %5277 }
 0x36c   :  { %v3897_v19 = vstv %s5278_s24 }
 0x36d   :  { %v3899_v10 = vsel %vm3898_vm2, %v2344_v34, %v3897_v19 }
 0x36e   :  { %v3907_v18 = vadd.f32 %v4434_v52, %v3899_v10 }
 0x370   :  { %3909 = vst.msk [vmem:[%s7652_s5] sm:$0x3] %vm3908_vm3, %v3907_v18 }

</bundles_post_ra>
